<compile_context>
chip_gen: v5e
topology: v5e:2x2
jax: 0.10.0
libtpu: 0.0.40
codegen_flags: <defaults>
</compile_context>

<pallas_src>
import functools
import math

import jax
import jax.numpy as jnp
from jax.experimental import pallas as pl
from jax.experimental.pallas import tpu as pltpu

# ---- small, shape-agnostic stand-in config for bert-base-uncased ----
VOCAB = 64          # real: 30522
TYPE_VOCAB = 2
MAX_POS = 32        # real: 512
HIDDEN = 128        # real: 768
N_HEADS = 4         # real: 12
HEAD_DIM = HIDDEN // N_HEADS
INTER = 4 * HIDDEN  # real: 3072
N_LAYERS = 2        # real: 12
NUM_LABELS = 2      # l0 = nn.Linear(768, 2)
L0_PAD = 128        # span head padded to a lane-dense width; sliced outside
LN_EPS = 1e-12

DTYPE = jnp.bfloat16        # activation / weight dtype (f32 accumulation)


# --------------------------- generation-aware budgets ---------------------------

def _physical_vmem_bytes():
    try:
        info = pltpu.get_tpu_info()
        cap = int(getattr(info, "vmem_capacity_bytes", 0) or 0)
        if cap > 0:
            return cap
    except Exception:
        pass
    return 64 * 1024 * 1024      # conservative fallback = v7x physical VMEM


_VMEM_PHYS = _physical_vmem_bytes()
# ~75% of physical VMEM: ~96 MiB on 128 MiB parts (v5e/v6e), ~48 MiB on 64 MiB parts (v7x).
VMEM_LIMIT_BYTES = min(100 * 1024 * 1024, int(_VMEM_PHYS * 0.75))
_BIG_VMEM = VMEM_LIMIT_BYTES >= 72 * 1024 * 1024
_ROW_TILE_CAP = 1024 if _BIG_VMEM else 512       # keeps linear_add_ln(_head) under the v7x budget
_COL_TILE_CAP = 2048 if _BIG_VMEM else 1024


# --------------------------- tiling helpers ---------------------------

def _row_tile(rows):
    """Largest MXU-friendly row tile (<= generation cap) that divides `rows`."""
    # TODO(synk): rows that are not a multiple of 8 are not padded here; real BERT rows
    # (B*512) are always aligned, and the toy config uses rows=32.
    for t in (1024, 512, 256, 128, 64, 32, 16, 8):
        if t <= _ROW_TILE_CAP and rows % t == 0:
            return t
    return rows


def _col_tile(n):
    """Tile the output (lane) dimension only when it is large (real-size FFN)."""
    if n <= _COL_TILE_CAP:
        return n
    for t in (2048, 1024, 512, 256, 128):
        if t <= _COL_TILE_CAP and n % t == 0:
            return t
    return n


def _q_tile(s):
    """Query-axis tile for attention (bounds the live score matrix to <= 256 x S)."""
    if s <= 256:
        return s
    for t in (256, 128, 64, 32, 16, 8):
        if s % t == 0:
            return t
    return s


def _compiler_params(semantics):
    return pltpu.CompilerParams(dimension_semantics=semantics,
                                vmem_limit_bytes=VMEM_LIMIT_BYTES)


# --------------------------- plain linear (+ activation) ---------------------------

def _linear_kernel(x_ref, w_ref, b_ref, o_ref, *, activation):
    y = jnp.dot(x_ref[...], w_ref[...], preferred_element_type=jnp.float32)
    y = y + b_ref[...]
    if activation == "gelu":
        # TODO(synk): HF BERT uses exact erf-GELU; tanh approximation used here.
        y = jax.nn.gelu(y, approximate=True)
    elif activation == "tanh":
        y = jnp.tanh(y)
    o_ref[...] = y.astype(o_ref.dtype)


def linear(x2d, w, b, activation=None):
    rows, k = x2d.shape
    n = w.shape[1]
    tm = _row_tile(rows)
    tn = _col_tile(n)
    # N-tile OUTER, row-tile INNER: the weight block index is constant across the inner
    # axis, so the weight stays resident in VMEM (no (rows/tm)x re-streaming from HBM).
    return pl.pallas_call(
        functools.partial(_linear_kernel, activation=activation),
        out_shape=jax.ShapeDtypeStruct((rows, n), x2d.dtype),
        grid=(n // tn, rows // tm),
        in_specs=[
            pl.BlockSpec((tm, k), lambda j, i: (i, 0)),
            pl.BlockSpec((k, tn), lambda j, i: (0, j)),
            pl.BlockSpec((1, tn), lambda j, i: (0, j)),
        ],
        out_specs=pl.BlockSpec((tm, tn), lambda j, i: (i, j)),
        compiler_params=_compiler_params(("parallel", "parallel")),
    )(x2d, w, b.reshape(1, n))


# --------------------------- matmul + bias + residual + LayerNorm ---------------------------

def _linear_add_ln_kernel(x_ref, w_ref, b_ref, res_ref, g_ref, be_ref, o_ref):
    y = jnp.dot(x_ref[...], w_ref[...], preferred_element_type=jnp.float32)
    y = y + b_ref[...] + res_ref[...].astype(jnp.float32)
    mu = jnp.mean(y, axis=-1, keepdims=True)
    var = jnp.mean(jnp.square(y - mu), axis=-1, keepdims=True)
    y = (y - mu) * jax.lax.rsqrt(var + LN_EPS)
    o_ref[...] = (y * g_ref[...] + be_ref[...]).astype(o_ref.dtype)


def linear_add_ln(x2d, w, b, res2d, gamma, beta):
    rows, k = x2d.shape
    n = w.shape[1]
    tm = _row_tile(rows)
    # Single grid axis over rows; the full weight block index is constant -> resident.
    return pl.pallas_call(
        _linear_add_ln_kernel,
        out_shape=jax.ShapeDtypeStruct((rows, n), res2d.dtype),
        grid=(rows // tm,),
        in_specs=[
            pl.BlockSpec((tm, k), lambda i: (i, 0)),
            pl.BlockSpec((k, n), lambda i: (0, 0)),
            pl.BlockSpec((1, n), lambda i: (0, 0)),
            pl.BlockSpec((tm, n), lambda i: (i, 0)),
            pl.BlockSpec((1, n), lambda i: (0, 0)),
            pl.BlockSpec((1, n), lambda i: (0, 0)),
        ],
        out_specs=pl.BlockSpec((tm, n), lambda i: (i, 0)),
        compiler_params=_compiler_params(("parallel",)),
    )(x2d, w, b.reshape(1, n), res2d, gamma.reshape(1, n), beta.reshape(1, n))


def _linear_add_ln_head_kernel(x_ref, w_ref, b_ref, res_ref, g_ref, be_ref,
                               hw_ref, hb_ref, o_ref, logit_ref):
    # Final layer: w2 matmul + bias + residual + LayerNorm, then the padded span head
    # (H x 128, lane-dense) folded into the same epilogue.
    y = jnp.dot(x_ref[...], w_ref[...], preferred_element_type=jnp.float32)
    y = y + b_ref[...] + res_ref[...].astype(jnp.float32)
    mu = jnp.mean(y, axis=-1, keepdims=True)
    var = jnp.mean(jnp.square(y - mu), axis=-1, keepdims=True)
    y = (y - mu) * jax.lax.rsqrt(var + LN_EPS)
    y = y * g_ref[...] + be_ref[...]
    yb = y.astype(o_ref.dtype)
    o_ref[...] = yb
    logit_ref[...] = (jnp.dot(yb, hw_ref[...], preferred_element_type=jnp.float32)
                      + hb_ref[...]).astype(logit_ref.dtype)


def linear_add_ln_head(x2d, w, b, res2d, gamma, beta, head_w, head_b):
    rows, k = x2d.shape
    n = w.shape[1]
    npad = head_w.shape[1]
    tm = _row_tile(rows)
    return pl.pallas_call(
        _linear_add_ln_head_kernel,
        out_shape=(jax.ShapeDtypeStruct((rows, n), res2d.dtype),
                   jax.ShapeDtypeStruct((rows, npad), jnp.float32)),
        grid=(rows // tm,),
        in_specs=[
            pl.BlockSpec((tm, k), lambda i: (i, 0)),
            pl.BlockSpec((k, n), lambda i: (0, 0)),
            pl.BlockSpec((1, n), lambda i: (0, 0)),
            pl.BlockSpec((tm, n), lambda i: (i, 0)),
            pl.BlockSpec((1, n), lambda i: (0, 0)),
            pl.BlockSpec((1, n), lambda i: (0, 0)),
            pl.BlockSpec((n, npad), lambda i: (0, 0)),
            pl.BlockSpec((1, npad), lambda i: (0, 0)),
        ],
        out_specs=[
            pl.BlockSpec((tm, n), lambda i: (i, 0)),
            pl.BlockSpec((tm, npad), lambda i: (i, 0)),
        ],
        compiler_params=_compiler_params(("parallel",)),
    )(x2d, w, b.reshape(1, n), res2d, gamma.reshape(1, n), beta.reshape(1, n),
      head_w, head_b.reshape(1, npad))


# --------------------------- LayerNorm only (embeddings) ---------------------------

def _layernorm_kernel(x_ref, g_ref, b_ref, o_ref):
    x = x_ref[...].astype(jnp.float32)
    mu = jnp.mean(x, axis=-1, keepdims=True)
    var = jnp.mean(jnp.square(x - mu), axis=-1, keepdims=True)
    y = (x - mu) * jax.lax.rsqrt(var + LN_EPS)
    o_ref[...] = (y * g_ref[...] + b_ref[...]).astype(o_ref.dtype)


def layernorm(x2d, gamma, beta, out_dtype):
    rows, h = x2d.shape
    tm = _row_tile(rows)
    return pl.pallas_call(
        _layernorm_kernel,
        out_shape=jax.ShapeDtypeStruct((rows, h), out_dtype),
        grid=(rows // tm,),
        in_specs=[
            pl.BlockSpec((tm, h), lambda i: (i, 0)),
            pl.BlockSpec((1, h), lambda i: (0, 0)),
            pl.BlockSpec((1, h), lambda i: (0, 0)),
        ],
        out_specs=pl.BlockSpec((tm, h), lambda i: (i, 0)),
        compiler_params=_compiler_params(("parallel",)),
    )(x2d, gamma.reshape(1, h), beta.reshape(1, h))


# --------------------------- fused QKV projection (head-major output) ---------------------------

def _qkv_kernel(x_ref, w_ref, b_ref, o_ref):
    y = jnp.dot(x_ref[...], w_ref[0], preferred_element_type=jnp.float32)
    o_ref[0] = (y + b_ref[0]).astype(o_ref.dtype)


def qkv_proj(x2d, w_hm, b_hm):
    # x: [rows, H]; w_hm: [3*nH, H, dH]; output: [3*nH, rows, dH]  (slabs: q_0..q_{nH-1}, k_*, v_*)
    # Row-tile outer / head-slab inner: x stays resident across the inner axis; per-head
    # output blocks are lane-aligned (dH is the physical last dim), so attention never
    # slices heads out of the lane dimension.  Per-step matmul N = dH underfills the MXU's
    # N dimension; this trades a little MXU fill for zero relayouts downstream.
    rows, k = x2d.shape
    slabs, _, dh = w_hm.shape
    tm = _row_tile(rows)
    return pl.pallas_call(
        _qkv_kernel,
        out_shape=jax.ShapeDtypeStruct((slabs, rows, dh), x2d.dtype),
        grid=(rows // tm, slabs),
        in_specs=[
            pl.BlockSpec((tm, k), lambda i, j: (i, 0)),
            pl.BlockSpec((1, k, dh), lambda i, j: (j, 0, 0)),
            pl.BlockSpec((1, 1, dh), lambda i, j: (j, 0, 0)),
        ],
        out_specs=pl.BlockSpec((1, tm, dh), lambda i, j: (j, i, 0)),
        compiler_params=_compiler_params(("parallel", "parallel")),
    )(x2d, w_hm, b_hm)


# --------------------------- attention (grid over batch, head, query tile) ---------------------------

def _attention_kernel(q_ref, k_ref, v_ref, m_ref, o_ref, *, scale):
    q = q_ref[0]                                 # (tq, dH) bf16, lane-aligned block
    k = k_ref[0]                                 # (S,  dH) bf16
    v = v_ref[0]                                 # (S,  dH) bf16
    m = m_ref[0].astype(jnp.float32)             # (1, S) additive mask, lane-aligned
    s = jax.lax.dot_general(q, k, (((1,), (1,)), ((), ())),
                            preferred_element_type=jnp.float32) * scale
    s = s + m
    s = s - jnp.max(s, axis=-1, keepdims=True)
    p = jnp.exp(s)
    p = p * pl.reciprocal(jnp.sum(p, axis=-1, keepdims=True), approx=True)
    ctx = jnp.dot(p.astype(v.dtype), v, preferred_element_type=jnp.float32)
    o_ref[0] = ctx.astype(o_ref.dtype)           # full-block, unmasked store


def attention(qkv_hm, addmask, batch, seq):
    # qkv_hm: [3*nH, B*S, dH]; output context: [nH, B*S, dH]
    three_nh, rows, dh = qkv_hm.shape
    nh = three_nh // 3
    tq = _q_tile(seq)
    qt = seq // tq
    scale = 1.0 / math.sqrt(dh)
    # Grid (B, nH, q_tiles): K/V and the mask are constant across the innermost query-tile
    # axis (stay resident); >= B*nH independent parallel steps feed v7x's two TensorCores.
    return pl.pallas_call(
        functools.partial(_attention_kernel, scale=scale),
        out_shape=jax.ShapeDtypeStruct((nh, rows, dh), qkv_hm.dtype),
        grid=(batch, nh, qt),
        in_specs=[
            pl.BlockSpec((1, tq, dh), lambda bi, h, t: (h, bi * qt + t, 0)),
            pl.BlockSpec((1, seq, dh), lambda bi, h, t: (nh + h, bi, 0)),
            pl.BlockSpec((1, seq, dh), lambda bi, h, t: (2 * nh + h, bi, 0)),
            pl.BlockSpec((1, 1, seq), lambda bi, h, t: (bi, 0, 0)),
        ],
        out_specs=pl.BlockSpec((1, tq, dh), lambda bi, h, t: (h, bi * qt + t, 0)),
        compiler_params=_compiler_params(("parallel", "parallel", "parallel")),
    )(qkv_hm, qkv_hm, qkv_hm, addmask)


# --------------------------- attn output projection + residual + LN (head reduction) ---------------------------

def _attn_out_ln_kernel(ctx_ref, w_ref, b_ref, res_ref, g_ref, be_ref, o_ref, acc_ref,
                        *, n_heads):
    h = pl.program_id(1)

    @pl.when(h == 0)
    def _():
        acc_ref[...] = jnp.zeros_like(acc_ref)

    acc_ref[...] += jnp.dot(ctx_ref[0], w_ref[0], preferred_element_type=jnp.float32)

    @pl.when(h == n_heads - 1)
    def _():
        y = acc_ref[...] + b_ref[...] + res_ref[...].astype(jnp.float32)
        mu = jnp.mean(y, axis=-1, keepdims=True)
        var = jnp.mean(jnp.square(y - mu), axis=-1, keepdims=True)
        y = (y - mu) * jax.lax.rsqrt(var + LN_EPS)
        o_ref[...] = (y * g_ref[...] + be_ref[...]).astype(o_ref.dtype)


def attn_out_ln(ctx_hm, wo_hm, bo, res2d, gamma, beta):
    # ctx_hm: [nH, rows, dH]; wo_hm: [nH, dH, H].  Contract over H by accumulating the
    # per-head (tm,dH)x(dH,H) matmuls in an f32 scratch; no HBM transpose of the context.
    nh, rows, dh = ctx_hm.shape
    hdim = wo_hm.shape[2]
    tm = _row_tile(rows)
    return pl.pallas_call(
        functools.partial(_attn_out_ln_kernel, n_heads=nh),
        out_shape=jax.ShapeDtypeStruct((rows, hdim), res2d.dtype),
        grid=(rows // tm, nh),
        in_specs=[
            pl.BlockSpec((1, tm, dh), lambda i, h: (h, i, 0)),
            pl.BlockSpec((1, dh, hdim), lambda i, h: (h, 0, 0)),
            pl.BlockSpec((1, hdim), lambda i, h: (0, 0)),
            pl.BlockSpec((tm, hdim), lambda i, h: (i, 0)),
            pl.BlockSpec((1, hdim), lambda i, h: (0, 0)),
            pl.BlockSpec((1, hdim), lambda i, h: (0, 0)),
        ],
        out_specs=pl.BlockSpec((tm, hdim), lambda i, h: (i, 0)),
        scratch_shapes=[pltpu.VMEM((tm, hdim), jnp.float32)],
        compiler_params=_compiler_params(("parallel", "arbitrary")),
    )(ctx_hm, wo_hm, bo.reshape(1, hdim), res2d, gamma.reshape(1, hdim), beta.reshape(1, hdim))


# --------------------------- parameters ---------------------------

def init_params(key):
    ks = jax.random.split(key, 8 + 16 * N_LAYERS)
    it = iter(ks)

    def w(shape):
        return (0.02 * jax.random.normal(next(it), shape, dtype=jnp.float32)).astype(DTYPE)

    def zeros(shape):
        return jnp.zeros(shape, jnp.float32)

    def ones(shape):
        return jnp.ones(shape, jnp.float32)

    # span head padded to a lane-dense (H, 128); only the first NUM_LABELS columns are real.
    l0_w = jnp.zeros((HIDDEN, L0_PAD), jnp.float32)
    l0_w = l0_w.at[:, :NUM_LABELS].set(
        0.02 * jax.random.normal(next(it), (HIDDEN, NUM_LABELS), dtype=jnp.float32))

    params = {
        "word_emb": 0.02 * jax.random.normal(next(it), (VOCAB, HIDDEN), dtype=jnp.float32),
        "pos_emb": 0.02 * jax.random.normal(next(it), (MAX_POS, HIDDEN), dtype=jnp.float32),
        "type_emb": 0.02 * jax.random.normal(next(it), (TYPE_VOCAB, HIDDEN), dtype=jnp.float32),
        "emb_ln_g": ones((HIDDEN,)),
        "emb_ln_b": zeros((HIDDEN,)),
        "pool_w": w((HIDDEN, HIDDEN)),
        "pool_b": zeros((HIDDEN,)),
        "l0_w": l0_w.astype(DTYPE),
        "l0_b": zeros((L0_PAD,)),
        "layers": [],
    }
    for _ in range(N_LAYERS):
        params["layers"].append({
            # head-major fused QKV weight: slab s = q_h for s=h, k_h for s=nH+h, v_h for s=2nH+h;
            # w_qkv[h] corresponds to W_q.T[:, h*dH:(h+1)*dH] of a torch checkpoint, etc.
            "w_qkv": w((3 * N_HEADS, HIDDEN, HEAD_DIM)),
            "b_qkv": zeros((3 * N_HEADS, 1, HEAD_DIM)),
            # head-major attention output weight: wo[h] = W_o.T[h*dH:(h+1)*dH, :]
            "wo": w((N_HEADS, HEAD_DIM, HIDDEN)), "bo": zeros((HIDDEN,)),
            "ln1_g": ones((HIDDEN,)), "ln1_b": zeros((HIDDEN,)),
            "w1": w((HIDDEN, INTER)), "b1": zeros((INTER,)),
            "w2": w((INTER, HIDDEN)), "b2": zeros((HIDDEN,)),
            "ln2_g": ones((HIDDEN,)), "ln2_b": zeros((HIDDEN,)),
        })
    return params


# --------------------------- forward pass ---------------------------

def bert_base_uncased_forward(params, ids, mask, token_type_ids,
                              compute_unused_pooler=False):
    b, s = ids.shape
    rows = b * s

    # embeddings (gathers are glue; LayerNorm is a Pallas kernel)
    pos = jnp.arange(s, dtype=jnp.int32)[None, :]
    emb = (params["word_emb"][ids]
           + params["pos_emb"][pos]
           + params["type_emb"][token_type_ids]).reshape(rows, HIDDEN)
    x = layernorm(emb, params["emb_ln_g"], params["emb_ln_b"], out_dtype=DTYPE)

    # extended attention mask: (1 - mask) * -10000, shape (B, 1, S), f32
    addmask = ((1.0 - mask.astype(jnp.float32)) * -10000.0).reshape(b, 1, s)

    logits_pad = None
    n_layers = len(params["layers"])
    for li, lyr in enumerate(params["layers"]):
        # fused QKV projection -> head-major [3*nH, rows, dH] (no HBM head transpose)
        qkv_hm = qkv_proj(x, lyr["w_qkv"], lyr["b_qkv"])
        # attention over (B, nH, q_tiles); lane-aligned per-head blocks; ctx: [nH, rows, dH]
        ctx_hm = attention(qkv_hm, addmask, b, s)
        # output projection as a head reduction + bias + residual + LayerNorm fused
        x = attn_out_ln(ctx_hm, lyr["wo"], lyr["bo"], x, lyr["ln1_g"], lyr["ln1_b"])
        # feed-forward: GELU matmul, then matmul + residual + LayerNorm fused; the span
        # head is folded into the final layer's epilogue (no extra pass over x).
        inter = linear(x, lyr["w1"], lyr["b1"], activation="gelu")
        if li == n_layers - 1:
            x, logits_pad = linear_add_ln_head(inter, lyr["w2"], lyr["b2"], x,
                                               lyr["ln2_g"], lyr["ln2_b"],
                                               params["l0_w"], params["l0_b"])
        else:
            x = linear_add_ln(inter, lyr["w2"], lyr["b2"], x, lyr["ln2_g"], lyr["ln2_b"])

    sequence_output = x.reshape(b, s, HIDDEN)

    if compute_unused_pooler:
        # In the torch module the pooled output only feeds Dropout (identity in eval)
        # and the undefined `self.out`; its result is never used, so it is gated off.
        _pooled_output = linear(sequence_output[:, 0, :],
                                params["pool_w"], params["pool_b"],
                                activation="tanh")
        # TODO(synk): `self.out` is not defined in the reference __init__; output unused.

    # span head: l0 = Linear(H, 2), computed lane-dense (padded to 128) inside the final
    # fused kernel; slice the 2 real columns here.
    logits = logits_pad[:, :NUM_LABELS].astype(jnp.float32).reshape(b, s, NUM_LABELS)
    start_logits, end_logits = jnp.split(logits, 2, axis=-1)         # each (B, S, 1)

    def squeeze1(t):
        # torch .squeeze(1) only removes dim 1 if it has size 1 (no-op for S>1)
        return jnp.squeeze(t, axis=1) if t.shape[1] == 1 else t

    return squeeze1(start_logits), squeeze1(end_logits)


# --------------------------- main ---------------------------

if __name__ == "__main__":
    key = jax.random.PRNGKey(0)
    pkey, ikey = jax.random.split(key)
    params = init_params(pkey)

    B, S = 2, 16
    ids = jax.random.randint(ikey, (B, S), 0, VOCAB, dtype=jnp.int32)
    mask = jnp.ones((B, S), dtype=jnp.int32).at[:, S - 4:].set(0)          # padded tail
    token_type_ids = jnp.zeros((B, S), dtype=jnp.int32).at[:, S // 2:].set(1)

    fwd = jax.jit(bert_base_uncased_forward)
    start_logits, end_logits = fwd(params, ids, mask, token_type_ids)
    jax.block_until_ready((start_logits, end_logits))

    assert start_logits.shape == (B, S, 1), start_logits.shape
    assert end_logits.shape == (B, S, 1), end_logits.shape
    assert jnp.all(jnp.isfinite(start_logits)) and jnp.all(jnp.isfinite(end_logits))
    print("KERNEL_OK")
</pallas_src>

<mosaic_0001>
module attributes {stable_mosaic.version = 11 : i64} {
  func.func @_layernorm_kernel(%arg0: i32, %arg1: memref<32x128xf32, #tpu.memory_space<vmem>>, %arg2: memref<1x128xf32, #tpu.memory_space<vmem>>, %arg3: memref<1x128xf32, #tpu.memory_space<vmem>>, %arg4: memref<32x128xbf16, #tpu.memory_space<vmem>>) attributes {dimension_semantics = [#tpu.dimension_semantics<parallel>], iteration_bounds = array<i64: 1>, scalar_prefetch = 0 : i64, scratch_operands = 0 : i64, tpu.core_type = #tpu.core_type<tc>, window_params = [{transform_indices = @transform_0, window_bounds = array<i64: 32, 128>}, {pipeline_mode = #tpu.pipeline_mode<synchronous>, transform_indices = @transform_1, window_bounds = array<i64: 1, 128>}, {pipeline_mode = #tpu.pipeline_mode<synchronous>, transform_indices = @transform_2, window_bounds = array<i64: 1, 128>}, {transform_indices = @transform_3, window_bounds = array<i64: 32, 128>}]} {
    %c0 = arith.constant 0 : index
    %c0_0 = arith.constant 0 : index
    %0 = vector.load %arg1[%c0, %c0_0] : memref<32x128xf32, #tpu.memory_space<vmem>>, vector<32x128xf32>
    %cst = arith.constant dense<0.000000e+00> : vector<32xf32>
    %1 = vector.multi_reduction <add>, %0, %cst [1] : vector<32x128xf32> to vector<32xf32>
    %2 = vector.shape_cast %1 : vector<32xf32> to vector<32x1xf32>
    %cst_1 = arith.constant 1.280000e+02 : f32
    %3 = vector.broadcast %cst_1 : f32 to vector<32x1xf32>
    %4 = arith.divf %2, %3 : vector<32x1xf32>
    %5 = vector.broadcast %4 : vector<32x1xf32> to vector<32x128xf32>
    %6 = arith.subf %0, %5 : vector<32x128xf32>
    %7 = arith.mulf %6, %6 : vector<32x128xf32>
    %cst_2 = arith.constant dense<0.000000e+00> : vector<32xf32>
    %8 = vector.multi_reduction <add>, %7, %cst_2 [1] : vector<32x128xf32> to vector<32xf32>
    %9 = vector.shape_cast %8 : vector<32xf32> to vector<32x1xf32>
    %cst_3 = arith.constant 1.280000e+02 : f32
    %10 = vector.broadcast %cst_3 : f32 to vector<32x1xf32>
    %11 = arith.divf %9, %10 : vector<32x1xf32>
    %12 = vector.broadcast %4 : vector<32x1xf32> to vector<32x128xf32>
    %13 = arith.subf %0, %12 : vector<32x128xf32>
    %cst_4 = arith.constant 9.99999996E-13 : f32
    %14 = vector.broadcast %cst_4 : f32 to vector<32x1xf32>
    %15 = arith.addf %11, %14 : vector<32x1xf32>
    %16 = math.rsqrt %15 : vector<32x1xf32>
    %17 = vector.broadcast %16 : vector<32x1xf32> to vector<32x128xf32>
    %18 = arith.mulf %13, %17 : vector<32x128xf32>
    %c0_5 = arith.constant 0 : index
    %c0_6 = arith.constant 0 : index
    %19 = vector.load %arg2[%c0_5, %c0_6] : memref<1x128xf32, #tpu.memory_space<vmem>>, vector<1x128xf32>
    %20 = vector.broadcast %19 : vector<1x128xf32> to vector<32x128xf32>
    %21 = arith.mulf %18, %20 : vector<32x128xf32>
    %c0_7 = arith.constant 0 : index
    %c0_8 = arith.constant 0 : index
    %22 = vector.load %arg3[%c0_7, %c0_8] : memref<1x128xf32, #tpu.memory_space<vmem>>, vector<1x128xf32>
    %23 = vector.broadcast %22 : vector<1x128xf32> to vector<32x128xf32>
    %24 = arith.addf %21, %23 : vector<32x128xf32>
    %25 = arith.truncf %24 : vector<32x128xf32> to vector<32x128xbf16>
    %c0_9 = arith.constant 0 : index
    %c0_10 = arith.constant 0 : index
    %26 = vector.load %arg4[%c0_9, %c0_10] : memref<32x128xbf16, #tpu.memory_space<vmem>>, vector<32x128xbf16>
    tpu.vector_store %arg4[%c0_9, %c0_10], %25 {strides = array<i32>} : memref<32x128xbf16, #tpu.memory_space<vmem>>, vector<32x128xbf16>,
    return
  }
  func.func @transform_0(%arg0: i32) -> (i32, i32) {
    %c0_i32 = arith.constant 0 : i32
    %c0_i32_0 = arith.constant 0 : i32
    return %arg0, %c0_i32 : i32, i32
  }
  func.func @transform_1(%arg0: i32) -> (i32, i32) {
    %c0_i32 = arith.constant 0 : i32
    %c0_i32_0 = arith.constant 0 : i32
    %c0_i32_1 = arith.constant 0 : i32
    return %c0_i32, %c0_i32_0 : i32, i32
  }
  func.func @transform_2(%arg0: i32) -> (i32, i32) {
    %c0_i32 = arith.constant 0 : i32
    %c0_i32_0 = arith.constant 0 : i32
    %c0_i32_1 = arith.constant 0 : i32
    return %c0_i32, %c0_i32_0 : i32, i32
  }
  func.func @transform_3(%arg0: i32) -> (i32, i32) {
    %c0_i32 = arith.constant 0 : i32
    %c0_i32_0 = arith.constant 0 : i32
    return %arg0, %c0_i32 : i32, i32
  }
}

module attributes {stable_mosaic.version = 11 : i64} {
  func.func @_qkv_kernel(%arg0: i32, %arg1: i32, %arg2: memref<32x128xbf16, #tpu.memory_space<vmem>>, %arg3: memref<1x128x32xbf16, #tpu.memory_space<vmem>>, %arg4: memref<1x1x32xf32, #tpu.memory_space<vmem>>, %arg5: memref<1x32x32xbf16, #tpu.memory_space<vmem>>) attributes {dimension_semantics = [#tpu.dimension_semantics<parallel>, #tpu.dimension_semantics<parallel>], iteration_bounds = array<i64: 1, 12>, scalar_prefetch = 0 : i64, scratch_operands = 0 : i64, tpu.core_type = #tpu.core_type<tc>, window_params = [{transform_indices = @transform_0, window_bounds = array<i64: 32, 128>}, {transform_indices = @transform_1, window_bounds = array<i64: 1, 128, 32>}, {transform_indices = @transform_2, window_bounds = array<i64: 1, 1, 32>}, {transform_indices = @transform_3, window_bounds = array<i64: 1, 32, 32>}]} {
    %c0 = arith.constant 0 : index
    %c0_0 = arith.constant 0 : index
    %0 = vector.load %arg2[%c0, %c0_0] : memref<32x128xbf16, #tpu.memory_space<vmem>>, vector<32x128xbf16>
    %c0_1 = arith.constant 0 : index
    %c0_2 = arith.constant 0 : index
    %c0_3 = arith.constant 0 : index
    %1 = vector.load %arg3[%c0_1, %c0_2, %c0_3] : memref<1x128x32xbf16, #tpu.memory_space<vmem>>, vector<1x128x32xbf16>
    %2 = vector.shape_cast %1 : vector<1x128x32xbf16> to vector<128x32xbf16>
    %cst = arith.constant dense<0.000000e+00> : vector<32x32xf32>
    %3 = tpu.matmul %0, %2, %cst {dimension_numbers = #tpu.dot_dimension_numbers<[1], [0], [0], [1], [0, 0, 1, 1], [], []>} : vector<32x128xbf16>, vector<128x32xbf16>, vector<32x32xf32> -> vector<32x32xf32>
    %c0_4 = arith.constant 0 : index
    %c0_5 = arith.constant 0 : index
    %c0_6 = arith.constant 0 : index
    %4 = vector.load %arg4[%c0_4, %c0_5, %c0_6] : memref<1x1x32xf32, #tpu.memory_space<vmem>>, vector<1x1x32xf32>
    %5 = vector.shape_cast %4 : vector<1x1x32xf32> to vector<1x32xf32>
    %6 = vector.broadcast %5 : vector<1x32xf32> to vector<32x32xf32>
    %7 = arith.addf %3, %6 : vector<32x32xf32>
    %8 = arith.truncf %7 : vector<32x32xf32> to vector<32x32xbf16>
    %c0_7 = arith.constant 0 : index
    %c0_8 = arith.constant 0 : index
    %c0_9 = arith.constant 0 : index
    %9 = vector.load %arg5[%c0_7, %c0_8, %c0_9] : memref<1x32x32xbf16, #tpu.memory_space<vmem>>, vector<1x32x32xbf16>
    %10 = vector.shape_cast %9 : vector<1x32x32xbf16> to vector<32x32xbf16>
    %11 = vector.shape_cast %8 : vector<32x32xbf16> to vector<1x32x32xbf16>
    tpu.vector_store %arg5[%c0_7, %c0_8, %c0_9], %11 {strides = array<i32>} : memref<1x32x32xbf16, #tpu.memory_space<vmem>>, vector<1x32x32xbf16>,
    return
  }
  func.func @transform_0(%arg0: i32, %arg1: i32) -> (i32, i32) {
    %c0_i32 = arith.constant 0 : i32
    %c0_i32_0 = arith.constant 0 : i32
    return %arg0, %c0_i32 : i32, i32
  }
  func.func @transform_1(%arg0: i32, %arg1: i32) -> (i32, i32, i32) {
    %c0_i32 = arith.constant 0 : i32
    %c0_i32_0 = arith.constant 0 : i32
    %c0_i32_1 = arith.constant 0 : i32
    return %arg1, %c0_i32, %c0_i32_0 : i32, i32, i32
  }
  func.func @transform_2(%arg0: i32, %arg1: i32) -> (i32, i32, i32) {
    %c0_i32 = arith.constant 0 : i32
    %c0_i32_0 = arith.constant 0 : i32
    %c0_i32_1 = arith.constant 0 : i32
    return %arg1, %c0_i32, %c0_i32_0 : i32, i32, i32
  }
  func.func @transform_3(%arg0: i32, %arg1: i32) -> (i32, i32, i32) {
    %c0_i32 = arith.constant 0 : i32
    %c0_i32_0 = arith.constant 0 : i32
    return %arg1, %arg0, %c0_i32 : i32, i32, i32
  }
}

module attributes {stable_mosaic.version = 11 : i64} {
  func.func @_attention_kernel(%arg0: i32, %arg1: i32, %arg2: i32, %arg3: memref<1x16x32xbf16, #tpu.memory_space<vmem>>, %arg4: memref<1x16x32xbf16, #tpu.memory_space<vmem>>, %arg5: memref<1x16x32xbf16, #tpu.memory_space<vmem>>, %arg6: memref<1x1x16xf32, #tpu.memory_space<vmem>>, %arg7: memref<1x16x32xbf16, #tpu.memory_space<vmem>>) attributes {dimension_semantics = [#tpu.dimension_semantics<parallel>, #tpu.dimension_semantics<parallel>, #tpu.dimension_semantics<parallel>], iteration_bounds = array<i64: 2, 4, 1>, scalar_prefetch = 0 : i64, scratch_operands = 0 : i64, tpu.core_type = #tpu.core_type<tc>, window_params = [{transform_indices = @transform_0, window_bounds = array<i64: 1, 16, 32>}, {transform_indices = @transform_1, window_bounds = array<i64: 1, 16, 32>}, {transform_indices = @transform_2, window_bounds = array<i64: 1, 16, 32>}, {transform_indices = @transform_3, window_bounds = array<i64: 1, 1, 16>}, {transform_indices = @transform_4, window_bounds = array<i64: 1, 16, 32>}]} {
    %c0 = arith.constant 0 : index
    %c0_0 = arith.constant 0 : index
    %c0_1 = arith.constant 0 : index
    %0 = vector.load %arg3[%c0, %c0_0, %c0_1] : memref<1x16x32xbf16, #tpu.memory_space<vmem>>, vector<1x16x32xbf16>
    %1 = vector.shape_cast %0 : vector<1x16x32xbf16> to vector<16x32xbf16>
    %c0_2 = arith.constant 0 : index
    %c0_3 = arith.constant 0 : index
    %c0_4 = arith.constant 0 : index
    %2 = vector.load %arg4[%c0_2, %c0_3, %c0_4] : memref<1x16x32xbf16, #tpu.memory_space<vmem>>, vector<1x16x32xbf16>
    %3 = vector.shape_cast %2 : vector<1x16x32xbf16> to vector<16x32xbf16>
    %c0_5 = arith.constant 0 : index
    %c0_6 = arith.constant 0 : index
    %c0_7 = arith.constant 0 : index
    %4 = vector.load %arg5[%c0_5, %c0_6, %c0_7] : memref<1x16x32xbf16, #tpu.memory_space<vmem>>, vector<1x16x32xbf16>
    %5 = vector.shape_cast %4 : vector<1x16x32xbf16> to vector<16x32xbf16>
    %c0_8 = arith.constant 0 : index
    %c0_9 = arith.constant 0 : index
    %c0_10 = arith.constant 0 : index
    %6 = vector.load %arg6[%c0_8, %c0_9, %c0_10] : memref<1x1x16xf32, #tpu.memory_space<vmem>>, vector<1x1x16xf32>
    %7 = vector.shape_cast %6 : vector<1x1x16xf32> to vector<1x16xf32>
    %cst = arith.constant dense<0.000000e+00> : vector<16x16xf32>
    %8 = tpu.matmul %1, %3, %cst {dimension_numbers = #tpu.dot_dimension_numbers<[1], [1], [0], [0], [0, 0, 1, 0], [], []>} : vector<16x32xbf16>, vector<16x32xbf16>, vector<16x16xf32> -> vector<16x16xf32>
    %cst_11 = arith.constant 0.176776692 : f32
    %9 = vector.broadcast %cst_11 : f32 to vector<16x16xf32>
    %10 = arith.mulf %8, %9 : vector<16x16xf32>
    %11 = vector.broadcast %7 : vector<1x16xf32> to vector<16x16xf32>
    %12 = arith.addf %10, %11 : vector<16x16xf32>
    %cst_12 = arith.constant dense<0xFF800000> : vector<16xf32>
    %13 = vector.multi_reduction <maximumf>, %12, %cst_12 [1] : vector<16x16xf32> to vector<16xf32>
    %14 = vector.shape_cast %13 : vector<16xf32> to vector<16x1xf32>
    %15 = vector.broadcast %14 : vector<16x1xf32> to vector<16x16xf32>
    %16 = arith.subf %12, %15 : vector<16x16xf32>
    %17 = math.exp %16 : vector<16x16xf32>
    %cst_13 = arith.constant dense<0.000000e+00> : vector<16xf32>
    %18 = vector.multi_reduction <add>, %17, %cst_13 [1] : vector<16x16xf32> to vector<16xf32>
    %19 = vector.shape_cast %18 : vector<16xf32> to vector<16x1xf32>
    %20 = tpu.reciprocal %19 {approx = true} : vector<16x1xf32> -> vector<16x1xf32>
    %21 = vector.broadcast %20 : vector<16x1xf32> to vector<16x16xf32>
    %22 = arith.mulf %17, %21 : vector<16x16xf32>
    %23 = arith.truncf %22 : vector<16x16xf32> to vector<16x16xbf16>
    %cst_14 = arith.constant dense<0.000000e+00> : vector<16x32xf32>
    %24 = tpu.matmul %23, %5, %cst_14 {dimension_numbers = #tpu.dot_dimension_numbers<[1], [0], [0], [1], [0, 0, 1, 1], [], []>} : vector<16x16xbf16>, vector<16x32xbf16>, vector<16x32xf32> -> vector<16x32xf32>
    %25 = arith.truncf %24 : vector<16x32xf32> to vector<16x32xbf16>
    %c0_15 = arith.constant 0 : index
    %c0_16 = arith.constant 0 : index
    %c0_17 = arith.constant 0 : index
    %26 = vector.load %arg7[%c0_15, %c0_16, %c0_17] : memref<1x16x32xbf16, #tpu.memory_space<vmem>>, vector<1x16x32xbf16>
    %27 = vector.shape_cast %26 : vector<1x16x32xbf16> to vector<16x32xbf16>
    %28 = vector.shape_cast %25 : vector<16x32xbf16> to vector<1x16x32xbf16>
    tpu.vector_store %arg7[%c0_15, %c0_16, %c0_17], %28 {strides = array<i32>} : memref<1x16x32xbf16, #tpu.memory_space<vmem>>, vector<1x16x32xbf16>,
    return
  }
  func.func @transform_0(%arg0: i32, %arg1: i32, %arg2: i32) -> (i32, i32, i32) {
    %c1_i32 = arith.constant 1 : i32
    %0 = arith.muli %arg0, %c1_i32 : i32
    %1 = arith.addi %0, %arg2 : i32
    %c0_i32 = arith.constant 0 : i32
    %c0_i32_0 = arith.constant 0 : i32
    return %arg1, %1, %c0_i32 : i32, i32, i32
  }
  func.func @transform_1(%arg0: i32, %arg1: i32, %arg2: i32) -> (i32, i32, i32) {
    %c4_i32 = arith.constant 4 : i32
    %0 = arith.addi %c4_i32, %arg1 : i32
    %c0_i32 = arith.constant 0 : i32
    %c0_i32_0 = arith.constant 0 : i32
    return %0, %arg0, %c0_i32 : i32, i32, i32
  }
  func.func @transform_2(%arg0: i32, %arg1: i32, %arg2: i32) -> (i32, i32, i32) {
    %c8_i32 = arith.constant 8 : i32
    %0 = arith.addi %c8_i32, %arg1 : i32
    %c0_i32 = arith.constant 0 : i32
    %c0_i32_0 = arith.constant 0 : i32
    return %0, %arg0, %c0_i32 : i32, i32, i32
  }
  func.func @transform_3(%arg0: i32, %arg1: i32, %arg2: i32) -> (i32, i32, i32) {
    %c0_i32 = arith.constant 0 : i32
    %c0_i32_0 = arith.constant 0 : i32
    %c0_i32_1 = arith.constant 0 : i32
    return %arg0, %c0_i32, %c0_i32_0 : i32, i32, i32
  }
  func.func @transform_4(%arg0: i32, %arg1: i32, %arg2: i32) -> (i32, i32, i32) {
    %c1_i32 = arith.constant 1 : i32
    %0 = arith.muli %arg0, %c1_i32 : i32
    %1 = arith.addi %0, %arg2 : i32
    %c0_i32 = arith.constant 0 : i32
    %c0_i32_0 = arith.constant 0 : i32
    return %arg1, %1, %c0_i32 : i32, i32, i32
  }
}

module attributes {stable_mosaic.version = 11 : i64} {
  func.func @_attn_out_ln_kernel(%arg0: i32, %arg1: i32, %arg2: memref<1x32x32xbf16, #tpu.memory_space<vmem>>, %arg3: memref<1x32x128xbf16, #tpu.memory_space<vmem>>, %arg4: memref<1x128xf32, #tpu.memory_space<vmem>>, %arg5: memref<32x128xbf16, #tpu.memory_space<vmem>>, %arg6: memref<1x128xf32, #tpu.memory_space<vmem>>, %arg7: memref<1x128xf32, #tpu.memory_space<vmem>>, %arg8: memref<32x128xbf16, #tpu.memory_space<vmem>>, %arg9: memref<32x128xf32, #tpu.memory_space<vmem>>) attributes {dimension_semantics = [#tpu.dimension_semantics<parallel>, #tpu.dimension_semantics<arbitrary>], iteration_bounds = array<i64: 1, 4>, scalar_prefetch = 0 : i64, scratch_operands = 1 : i64, tpu.core_type = #tpu.core_type<tc>, window_params = [{transform_indices = @transform_0, window_bounds = array<i64: 1, 32, 32>}, {transform_indices = @transform_1, window_bounds = array<i64: 1, 32, 128>}, {pipeline_mode = #tpu.pipeline_mode<synchronous>, transform_indices = @transform_2, window_bounds = array<i64: 1, 128>}, {transform_indices = @transform_3, window_bounds = array<i64: 32, 128>}, {pipeline_mode = #tpu.pipeline_mode<synchronous>, transform_indices = @transform_4, window_bounds = array<i64: 1, 128>}, {pipeline_mode = #tpu.pipeline_mode<synchronous>, transform_indices = @transform_5, window_bounds = array<i64: 1, 128>}, {transform_indices = @transform_6, window_bounds = array<i64: 32, 128>}]} {
    %c0_i32 = arith.constant 0 : i32
    %0 = arith.cmpi eq, %arg1, %c0_i32 : i32
    %1 = arith.extui %0 : i1 to i32
    %c0_i32_0 = arith.constant 0 : i32
    %2 = arith.cmpi ne, %1, %c0_i32_0 : i32
    scf.if %2 {
      %cst_11 = arith.constant 0.000000e+00 : f32
      %14 = vector.broadcast %cst_11 : f32 to vector<32x128xf32>
      %c0_12 = arith.constant 0 : index
      %c0_13 = arith.constant 0 : index
      %15 = vector.load %arg9[%c0_12, %c0_13] : memref<32x128xf32, #tpu.memory_space<vmem>>, vector<32x128xf32>
      tpu.vector_store %arg9[%c0_12, %c0_13], %14 {strides = array<i32>} : memref<32x128xf32, #tpu.memory_space<vmem>>, vector<32x128xf32>,
    } else {
    }
    %c0 = arith.constant 0 : index
    %c0_1 = arith.constant 0 : index
    %3 = vector.load %arg9[%c0, %c0_1] : memref<32x128xf32, #tpu.memory_space<vmem>>, vector<32x128xf32>
    %c0_2 = arith.constant 0 : index
    %c0_3 = arith.constant 0 : index
    %c0_4 = arith.constant 0 : index
    %4 = vector.load %arg2[%c0_2, %c0_3, %c0_4] : memref<1x32x32xbf16, #tpu.memory_space<vmem>>, vector<1x32x32xbf16>
    %5 = vector.shape_cast %4 : vector<1x32x32xbf16> to vector<32x32xbf16>
    %c0_5 = arith.constant 0 : index
    %c0_6 = arith.constant 0 : index
    %c0_7 = arith.constant 0 : index
    %6 = vector.load %arg3[%c0_5, %c0_6, %c0_7] : memref<1x32x128xbf16, #tpu.memory_space<vmem>>, vector<1x32x128xbf16>
    %7 = vector.shape_cast %6 : vector<1x32x128xbf16> to vector<32x128xbf16>
    %cst = arith.constant dense<0.000000e+00> : vector<32x128xf32>
    %8 = tpu.matmul %5, %7, %cst {dimension_numbers = #tpu.dot_dimension_numbers<[1], [0], [0], [1], [0, 0, 1, 1], [], []>} : vector<32x32xbf16>, vector<32x128xbf16>, vector<32x128xf32> -> vector<32x128xf32>
    %9 = arith.addf %3, %8 : vector<32x128xf32>
    %c0_8 = arith.constant 0 : index
    %c0_9 = arith.constant 0 : index
    %10 = vector.load %arg9[%c0_8, %c0_9] : memref<32x128xf32, #tpu.memory_space<vmem>>, vector<32x128xf32>
    tpu.vector_store %arg9[%c0_8, %c0_9], %9 {strides = array<i32>} : memref<32x128xf32, #tpu.memory_space<vmem>>, vector<32x128xf32>,
    %c3_i32 = arith.constant 3 : i32
    %11 = arith.cmpi eq, %arg1, %c3_i32 : i32
    %12 = arith.extui %11 : i1 to i32
    %c0_i32_10 = arith.constant 0 : i32
    %13 = arith.cmpi ne, %12, %c0_i32_10 : i32
    scf.if %13 {
      %c0_11 = arith.constant 0 : index
      %c0_12 = arith.constant 0 : index
      %14 = vector.load %arg9[%c0_11, %c0_12] : memref<32x128xf32, #tpu.memory_space<vmem>>, vector<32x128xf32>
      %c0_13 = arith.constant 0 : index
      %c0_14 = arith.constant 0 : index
      %15 = vector.load %arg4[%c0_13, %c0_14] : memref<1x128xf32, #tpu.memory_space<vmem>>, vector<1x128xf32>
      %16 = vector.broadcast %15 : vector<1x128xf32> to vector<32x128xf32>
      %17 = arith.addf %14, %16 : vector<32x128xf32>
      %c0_15 = arith.constant 0 : index
      %c0_16 = arith.constant 0 : index
      %18 = vector.load %arg5[%c0_15, %c0_16] : memref<32x128xbf16, #tpu.memory_space<vmem>>, vector<32x128xbf16>
      %19 = arith.extf %18 : vector<32x128xbf16> to vector<32x128xf32>
      %20 = arith.addf %17, %19 : vector<32x128xf32>
      %cst_17 = arith.constant dense<0.000000e+00> : vector<32xf32>
      %21 = vector.multi_reduction <add>, %20, %cst_17 [1] : vector<32x128xf32> to vector<32xf32>
      %22 = vector.shape_cast %21 : vector<32xf32> to vector<32x1xf32>
      %cst_18 = arith.constant 1.280000e+02 : f32
      %23 = vector.broadcast %cst_18 : f32 to vector<32x1xf32>
      %24 = arith.divf %22, %23 : vector<32x1xf32>
      %25 = vector.broadcast %24 : vector<32x1xf32> to vector<32x128xf32>
      %26 = arith.subf %20, %25 : vector<32x128xf32>
      %27 = arith.mulf %26, %26 : vector<32x128xf32>
      %cst_19 = arith.constant dense<0.000000e+00> : vector<32xf32>
      %28 = vector.multi_reduction <add>, %27, %cst_19 [1] : vector<32x128xf32> to vector<32xf32>
      %29 = vector.shape_cast %28 : vector<32xf32> to vector<32x1xf32>
      %cst_20 = arith.constant 1.280000e+02 : f32
      %30 = vector.broadcast %cst_20 : f32 to vector<32x1xf32>
      %31 = arith.divf %29, %30 : vector<32x1xf32>
      %32 = vector.broadcast %24 : vector<32x1xf32> to vector<32x128xf32>
      %33 = arith.subf %20, %32 : vector<32x128xf32>
      %cst_21 = arith.constant 9.99999996E-13 : f32
      %34 = vector.broadcast %cst_21 : f32 to vector<32x1xf32>
      %35 = arith.addf %31, %34 : vector<32x1xf32>
      %36 = math.rsqrt %35 : vector<32x1xf32>
      %37 = vector.broadcast %36 : vector<32x1xf32> to vector<32x128xf32>
      %38 = arith.mulf %33, %37 : vector<32x128xf32>
      %c0_22 = arith.constant 0 : index
      %c0_23 = arith.constant 0 : index
      %39 = vector.load %arg6[%c0_22, %c0_23] : memref<1x128xf32, #tpu.memory_space<vmem>>, vector<1x128xf32>
      %40 = vector.broadcast %39 : vector<1x128xf32> to vector<32x128xf32>
      %41 = arith.mulf %38, %40 : vector<32x128xf32>
      %c0_24 = arith.constant 0 : index
      %c0_25 = arith.constant 0 : index
      %42 = vector.load %arg7[%c0_24, %c0_25] : memref<1x128xf32, #tpu.memory_space<vmem>>, vector<1x128xf32>
      %43 = vector.broadcast %42 : vector<1x128xf32> to vector<32x128xf32>
      %44 = arith.addf %41, %43 : vector<32x128xf32>
      %45 = arith.truncf %44 : vector<32x128xf32> to vector<32x128xbf16>
      %c0_26 = arith.constant 0 : index
      %c0_27 = arith.constant 0 : index
      %46 = vector.load %arg8[%c0_26, %c0_27] : memref<32x128xbf16, #tpu.memory_space<vmem>>, vector<32x128xbf16>
      tpu.vector_store %arg8[%c0_26, %c0_27], %45 {strides = array<i32>} : memref<32x128xbf16, #tpu.memory_space<vmem>>, vector<32x128xbf16>,
    } else {
    }
    return
  }
  func.func @transform_0(%arg0: i32, %arg1: i32) -> (i32, i32, i32) {
    %c0_i32 = arith.constant 0 : i32
    %c0_i32_0 = arith.constant 0 : i32
    return %arg1, %arg0, %c0_i32 : i32, i32, i32
  }
  func.func @transform_1(%arg0: i32, %arg1: i32) -> (i32, i32, i32) {
    %c0_i32 = arith.constant 0 : i32
    %c0_i32_0 = arith.constant 0 : i32
    %c0_i32_1 = arith.constant 0 : i32
    return %arg1, %c0_i32, %c0_i32_0 : i32, i32, i32
  }
  func.func @transform_2(%arg0: i32, %arg1: i32) -> (i32, i32) {
    %c0_i32 = arith.constant 0 : i32
    %c0_i32_0 = arith.constant 0 : i32
    %c0_i32_1 = arith.constant 0 : i32
    return %c0_i32, %c0_i32_0 : i32, i32
  }
  func.func @transform_3(%arg0: i32, %arg1: i32) -> (i32, i32) {
    %c0_i32 = arith.constant 0 : i32
    %c0_i32_0 = arith.constant 0 : i32
    return %arg0, %c0_i32 : i32, i32
  }
  func.func @transform_4(%arg0: i32, %arg1: i32) -> (i32, i32) {
    %c0_i32 = arith.constant 0 : i32
    %c0_i32_0 = arith.constant 0 : i32
    %c0_i32_1 = arith.constant 0 : i32
    return %c0_i32, %c0_i32_0 : i32, i32
  }
  func.func @transform_5(%arg0: i32, %arg1: i32) -> (i32, i32) {
    %c0_i32 = arith.constant 0 : i32
    %c0_i32_0 = arith.constant 0 : i32
    %c0_i32_1 = arith.constant 0 : i32
    return %c0_i32, %c0_i32_0 : i32, i32
  }
  func.func @transform_6(%arg0: i32, %arg1: i32) -> (i32, i32) {
    %c0_i32 = arith.constant 0 : i32
    %c0_i32_0 = arith.constant 0 : i32
    return %arg0, %c0_i32 : i32, i32
  }
}

module attributes {stable_mosaic.version = 11 : i64} {
  func.func @_linear_kernel(%arg0: i32, %arg1: i32, %arg2: memref<32x128xbf16, #tpu.memory_space<vmem>>, %arg3: memref<128x512xbf16, #tpu.memory_space<vmem>>, %arg4: memref<1x512xf32, #tpu.memory_space<vmem>>, %arg5: memref<32x512xbf16, #tpu.memory_space<vmem>>) attributes {dimension_semantics = [#tpu.dimension_semantics<parallel>, #tpu.dimension_semantics<parallel>], iteration_bounds = array<i64: 1, 1>, scalar_prefetch = 0 : i64, scratch_operands = 0 : i64, tpu.core_type = #tpu.core_type<tc>, window_params = [{transform_indices = @transform_0, window_bounds = array<i64: 32, 128>}, {transform_indices = @transform_1, window_bounds = array<i64: 128, 512>}, {transform_indices = @transform_2, window_bounds = array<i64: 1, 512>}, {transform_indices = @transform_3, window_bounds = array<i64: 32, 512>}]} {
    %c0 = arith.constant 0 : index
    %c0_0 = arith.constant 0 : index
    %0 = vector.load %arg2[%c0, %c0_0] : memref<32x128xbf16, #tpu.memory_space<vmem>>, vector<32x128xbf16>
    %c0_1 = arith.constant 0 : index
    %c0_2 = arith.constant 0 : index
    %1 = vector.load %arg3[%c0_1, %c0_2] : memref<128x512xbf16, #tpu.memory_space<vmem>>, vector<128x512xbf16>
    %cst = arith.constant dense<0.000000e+00> : vector<32x512xf32>
    %2 = tpu.matmul %0, %1, %cst {dimension_numbers = #tpu.dot_dimension_numbers<[1], [0], [0], [1], [0, 0, 1, 1], [], []>} : vector<32x128xbf16>, vector<128x512xbf16>, vector<32x512xf32> -> vector<32x512xf32>
    %c0_3 = arith.constant 0 : index
    %c0_4 = arith.constant 0 : index
    %3 = vector.load %arg4[%c0_3, %c0_4] : memref<1x512xf32, #tpu.memory_space<vmem>>, vector<1x512xf32>
    %4 = vector.broadcast %3 : vector<1x512xf32> to vector<32x512xf32>
    %5 = arith.addf %2, %4 : vector<32x512xf32>
    %6 = arith.mulf %5, %5 : vector<32x512xf32>
    %7 = arith.mulf %5, %6 : vector<32x512xf32>
    %cst_5 = arith.constant 4.471500e-02 : f32
    %8 = vector.broadcast %cst_5 : f32 to vector<32x512xf32>
    %9 = arith.mulf %8, %7 : vector<32x512xf32>
    %10 = arith.addf %5, %9 : vector<32x512xf32>
    %cst_6 = arith.constant 0.797884583 : f32
    %11 = vector.broadcast %cst_6 : f32 to vector<32x512xf32>
    %12 = arith.mulf %11, %10 : vector<32x512xf32>
    %13 = math.tanh %12 : vector<32x512xf32>
    %cst_7 = arith.constant 1.000000e+00 : f32
    %14 = vector.broadcast %cst_7 : f32 to vector<32x512xf32>
    %15 = arith.addf %14, %13 : vector<32x512xf32>
    %cst_8 = arith.constant 5.000000e-01 : f32
    %16 = vector.broadcast %cst_8 : f32 to vector<32x512xf32>
    %17 = arith.mulf %16, %15 : vector<32x512xf32>
    %18 = arith.mulf %5, %17 : vector<32x512xf32>
    %19 = arith.truncf %18 : vector<32x512xf32> to vector<32x512xbf16>
    %c0_9 = arith.constant 0 : index
    %c0_10 = arith.constant 0 : index
    %20 = vector.load %arg5[%c0_9, %c0_10] : memref<32x512xbf16, #tpu.memory_space<vmem>>, vector<32x512xbf16>
    tpu.vector_store %arg5[%c0_9, %c0_10], %19 {strides = array<i32>} : memref<32x512xbf16, #tpu.memory_space<vmem>>, vector<32x512xbf16>,
    return
  }
  func.func @transform_0(%arg0: i32, %arg1: i32) -> (i32, i32) {
    %c0_i32 = arith.constant 0 : i32
    %c0_i32_0 = arith.constant 0 : i32
    return %arg1, %c0_i32 : i32, i32
  }
  func.func @transform_1(%arg0: i32, %arg1: i32) -> (i32, i32) {
    %c0_i32 = arith.constant 0 : i32
    %c0_i32_0 = arith.constant 0 : i32
    return %c0_i32, %arg0 : i32, i32
  }
  func.func @transform_2(%arg0: i32, %arg1: i32) -> (i32, i32) {
    %c0_i32 = arith.constant 0 : i32
    %c0_i32_0 = arith.constant 0 : i32
    return %c0_i32, %arg0 : i32, i32
  }
  func.func @transform_3(%arg0: i32, %arg1: i32) -> (i32, i32) {
    %c0_i32 = arith.constant 0 : i32
    return %arg1, %arg0 : i32, i32
  }
}

module attributes {stable_mosaic.version = 11 : i64} {
  func.func @_linear_add_ln_kernel(%arg0: i32, %arg1: memref<32x512xbf16, #tpu.memory_space<vmem>>, %arg2: memref<512x128xbf16, #tpu.memory_space<vmem>>, %arg3: memref<1x128xf32, #tpu.memory_space<vmem>>, %arg4: memref<32x128xbf16, #tpu.memory_space<vmem>>, %arg5: memref<1x128xf32, #tpu.memory_space<vmem>>, %arg6: memref<1x128xf32, #tpu.memory_space<vmem>>, %arg7: memref<32x128xbf16, #tpu.memory_space<vmem>>) attributes {dimension_semantics = [#tpu.dimension_semantics<parallel>], iteration_bounds = array<i64: 1>, scalar_prefetch = 0 : i64, scratch_operands = 0 : i64, tpu.core_type = #tpu.core_type<tc>, window_params = [{transform_indices = @transform_0, window_bounds = array<i64: 32, 512>}, {pipeline_mode = #tpu.pipeline_mode<synchronous>, transform_indices = @transform_1, window_bounds = array<i64: 512, 128>}, {pipeline_mode = #tpu.pipeline_mode<synchronous>, transform_indices = @transform_2, window_bounds = array<i64: 1, 128>}, {transform_indices = @transform_3, window_bounds = array<i64: 32, 128>}, {pipeline_mode = #tpu.pipeline_mode<synchronous>, transform_indices = @transform_4, window_bounds = array<i64: 1, 128>}, {pipeline_mode = #tpu.pipeline_mode<synchronous>, transform_indices = @transform_5, window_bounds = array<i64: 1, 128>}, {transform_indices = @transform_6, window_bounds = array<i64: 32, 128>}]} {
    %c0 = arith.constant 0 : index
    %c0_0 = arith.constant 0 : index
    %0 = vector.load %arg1[%c0, %c0_0] : memref<32x512xbf16, #tpu.memory_space<vmem>>, vector<32x512xbf16>
    %c0_1 = arith.constant 0 : index
    %c0_2 = arith.constant 0 : index
    %1 = vector.load %arg2[%c0_1, %c0_2] : memref<512x128xbf16, #tpu.memory_space<vmem>>, vector<512x128xbf16>
    %cst = arith.constant dense<0.000000e+00> : vector<32x128xf32>
    %2 = tpu.matmul %0, %1, %cst {dimension_numbers = #tpu.dot_dimension_numbers<[1], [0], [0], [1], [0, 0, 1, 1], [], []>} : vector<32x512xbf16>, vector<512x128xbf16>, vector<32x128xf32> -> vector<32x128xf32>
    %c0_3 = arith.constant 0 : index
    %c0_4 = arith.constant 0 : index
    %3 = vector.load %arg3[%c0_3, %c0_4] : memref<1x128xf32, #tpu.memory_space<vmem>>, vector<1x128xf32>
    %4 = vector.broadcast %3 : vector<1x128xf32> to vector<32x128xf32>
    %5 = arith.addf %2, %4 : vector<32x128xf32>
    %c0_5 = arith.constant 0 : index
    %c0_6 = arith.constant 0 : index
    %6 = vector.load %arg4[%c0_5, %c0_6] : memref<32x128xbf16, #tpu.memory_space<vmem>>, vector<32x128xbf16>
    %7 = arith.extf %6 : vector<32x128xbf16> to vector<32x128xf32>
    %8 = arith.addf %5, %7 : vector<32x128xf32>
    %cst_7 = arith.constant dense<0.000000e+00> : vector<32xf32>
    %9 = vector.multi_reduction <add>, %8, %cst_7 [1] : vector<32x128xf32> to vector<32xf32>
    %10 = vector.shape_cast %9 : vector<32xf32> to vector<32x1xf32>
    %cst_8 = arith.constant 1.280000e+02 : f32
    %11 = vector.broadcast %cst_8 : f32 to vector<32x1xf32>
    %12 = arith.divf %10, %11 : vector<32x1xf32>
    %13 = vector.broadcast %12 : vector<32x1xf32> to vector<32x128xf32>
    %14 = arith.subf %8, %13 : vector<32x128xf32>
    %15 = arith.mulf %14, %14 : vector<32x128xf32>
    %cst_9 = arith.constant dense<0.000000e+00> : vector<32xf32>
    %16 = vector.multi_reduction <add>, %15, %cst_9 [1] : vector<32x128xf32> to vector<32xf32>
    %17 = vector.shape_cast %16 : vector<32xf32> to vector<32x1xf32>
    %cst_10 = arith.constant 1.280000e+02 : f32
    %18 = vector.broadcast %cst_10 : f32 to vector<32x1xf32>
    %19 = arith.divf %17, %18 : vector<32x1xf32>
    %20 = vector.broadcast %12 : vector<32x1xf32> to vector<32x128xf32>
    %21 = arith.subf %8, %20 : vector<32x128xf32>
    %cst_11 = arith.constant 9.99999996E-13 : f32
    %22 = vector.broadcast %cst_11 : f32 to vector<32x1xf32>
    %23 = arith.addf %19, %22 : vector<32x1xf32>
    %24 = math.rsqrt %23 : vector<32x1xf32>
    %25 = vector.broadcast %24 : vector<32x1xf32> to vector<32x128xf32>
    %26 = arith.mulf %21, %25 : vector<32x128xf32>
    %c0_12 = arith.constant 0 : index
    %c0_13 = arith.constant 0 : index
    %27 = vector.load %arg5[%c0_12, %c0_13] : memref<1x128xf32, #tpu.memory_space<vmem>>, vector<1x128xf32>
    %28 = vector.broadcast %27 : vector<1x128xf32> to vector<32x128xf32>
    %29 = arith.mulf %26, %28 : vector<32x128xf32>
    %c0_14 = arith.constant 0 : index
    %c0_15 = arith.constant 0 : index
    %30 = vector.load %arg6[%c0_14, %c0_15] : memref<1x128xf32, #tpu.memory_space<vmem>>, vector<1x128xf32>
    %31 = vector.broadcast %30 : vector<1x128xf32> to vector<32x128xf32>
    %32 = arith.addf %29, %31 : vector<32x128xf32>
    %33 = arith.truncf %32 : vector<32x128xf32> to vector<32x128xbf16>
    %c0_16 = arith.constant 0 : index
    %c0_17 = arith.constant 0 : index
    %34 = vector.load %arg7[%c0_16, %c0_17] : memref<32x128xbf16, #tpu.memory_space<vmem>>, vector<32x128xbf16>
    tpu.vector_store %arg7[%c0_16, %c0_17], %33 {strides = array<i32>} : memref<32x128xbf16, #tpu.memory_space<vmem>>, vector<32x128xbf16>,
    return
  }
  func.func @transform_0(%arg0: i32) -> (i32, i32) {
    %c0_i32 = arith.constant 0 : i32
    %c0_i32_0 = arith.constant 0 : i32
    return %arg0, %c0_i32 : i32, i32
  }
  func.func @transform_1(%arg0: i32) -> (i32, i32) {
    %c0_i32 = arith.constant 0 : i32
    %c0_i32_0 = arith.constant 0 : i32
    %c0_i32_1 = arith.constant 0 : i32
    return %c0_i32, %c0_i32_0 : i32, i32
  }
  func.func @transform_2(%arg0: i32) -> (i32, i32) {
    %c0_i32 = arith.constant 0 : i32
    %c0_i32_0 = arith.constant 0 : i32
    %c0_i32_1 = arith.constant 0 : i32
    return %c0_i32, %c0_i32_0 : i32, i32
  }
  func.func @transform_3(%arg0: i32) -> (i32, i32) {
    %c0_i32 = arith.constant 0 : i32
    %c0_i32_0 = arith.constant 0 : i32
    return %arg0, %c0_i32 : i32, i32
  }
  func.func @transform_4(%arg0: i32) -> (i32, i32) {
    %c0_i32 = arith.constant 0 : i32
    %c0_i32_0 = arith.constant 0 : i32
    %c0_i32_1 = arith.constant 0 : i32
    return %c0_i32, %c0_i32_0 : i32, i32
  }
  func.func @transform_5(%arg0: i32) -> (i32, i32) {
    %c0_i32 = arith.constant 0 : i32
    %c0_i32_0 = arith.constant 0 : i32
    %c0_i32_1 = arith.constant 0 : i32
    return %c0_i32, %c0_i32_0 : i32, i32
  }
  func.func @transform_6(%arg0: i32) -> (i32, i32) {
    %c0_i32 = arith.constant 0 : i32
    %c0_i32_0 = arith.constant 0 : i32
    return %arg0, %c0_i32 : i32, i32
  }
}

module attributes {stable_mosaic.version = 11 : i64} {
  func.func @_linear_add_ln_head_kernel(%arg0: i32, %arg1: memref<32x512xbf16, #tpu.memory_space<vmem>>, %arg2: memref<512x128xbf16, #tpu.memory_space<vmem>>, %arg3: memref<1x128xf32, #tpu.memory_space<vmem>>, %arg4: memref<32x128xbf16, #tpu.memory_space<vmem>>, %arg5: memref<1x128xf32, #tpu.memory_space<vmem>>, %arg6: memref<1x128xf32, #tpu.memory_space<vmem>>, %arg7: memref<128x128xbf16, #tpu.memory_space<vmem>>, %arg8: memref<1x128xf32, #tpu.memory_space<vmem>>, %arg9: memref<32x128xbf16, #tpu.memory_space<vmem>>, %arg10: memref<32x128xf32, #tpu.memory_space<vmem>>) attributes {dimension_semantics = [#tpu.dimension_semantics<parallel>], iteration_bounds = array<i64: 1>, scalar_prefetch = 0 : i64, scratch_operands = 0 : i64, tpu.core_type = #tpu.core_type<tc>, window_params = [{transform_indices = @transform_0, window_bounds = array<i64: 32, 512>}, {pipeline_mode = #tpu.pipeline_mode<synchronous>, transform_indices = @transform_1, window_bounds = array<i64: 512, 128>}, {pipeline_mode = #tpu.pipeline_mode<synchronous>, transform_indices = @transform_2, window_bounds = array<i64: 1, 128>}, {transform_indices = @transform_3, window_bounds = array<i64: 32, 128>}, {pipeline_mode = #tpu.pipeline_mode<synchronous>, transform_indices = @transform_4, window_bounds = array<i64: 1, 128>}, {pipeline_mode = #tpu.pipeline_mode<synchronous>, transform_indices = @transform_5, window_bounds = array<i64: 1, 128>}, {pipeline_mode = #tpu.pipeline_mode<synchronous>, transform_indices = @transform_6, window_bounds = array<i64: 128, 128>}, {pipeline_mode = #tpu.pipeline_mode<synchronous>, transform_indices = @transform_7, window_bounds = array<i64: 1, 128>}, {transform_indices = @transform_8, window_bounds = array<i64: 32, 128>}, {transform_indices = @transform_9, window_bounds = array<i64: 32, 128>}]} {
    %c0 = arith.constant 0 : index
    %c0_0 = arith.constant 0 : index
    %0 = vector.load %arg1[%c0, %c0_0] : memref<32x512xbf16, #tpu.memory_space<vmem>>, vector<32x512xbf16>
    %c0_1 = arith.constant 0 : index
    %c0_2 = arith.constant 0 : index
    %1 = vector.load %arg2[%c0_1, %c0_2] : memref<512x128xbf16, #tpu.memory_space<vmem>>, vector<512x128xbf16>
    %cst = arith.constant dense<0.000000e+00> : vector<32x128xf32>
    %2 = tpu.matmul %0, %1, %cst {dimension_numbers = #tpu.dot_dimension_numbers<[1], [0], [0], [1], [0, 0, 1, 1], [], []>} : vector<32x512xbf16>, vector<512x128xbf16>, vector<32x128xf32> -> vector<32x128xf32>
    %c0_3 = arith.constant 0 : index
    %c0_4 = arith.constant 0 : index
    %3 = vector.load %arg3[%c0_3, %c0_4] : memref<1x128xf32, #tpu.memory_space<vmem>>, vector<1x128xf32>
    %4 = vector.broadcast %3 : vector<1x128xf32> to vector<32x128xf32>
    %5 = arith.addf %2, %4 : vector<32x128xf32>
    %c0_5 = arith.constant 0 : index
    %c0_6 = arith.constant 0 : index
    %6 = vector.load %arg4[%c0_5, %c0_6] : memref<32x128xbf16, #tpu.memory_space<vmem>>, vector<32x128xbf16>
    %7 = arith.extf %6 : vector<32x128xbf16> to vector<32x128xf32>
    %8 = arith.addf %5, %7 : vector<32x128xf32>
    %cst_7 = arith.constant dense<0.000000e+00> : vector<32xf32>
    %9 = vector.multi_reduction <add>, %8, %cst_7 [1] : vector<32x128xf32> to vector<32xf32>
    %10 = vector.shape_cast %9 : vector<32xf32> to vector<32x1xf32>
    %cst_8 = arith.constant 1.280000e+02 : f32
    %11 = vector.broadcast %cst_8 : f32 to vector<32x1xf32>
    %12 = arith.divf %10, %11 : vector<32x1xf32>
    %13 = vector.broadcast %12 : vector<32x1xf32> to vector<32x128xf32>
    %14 = arith.subf %8, %13 : vector<32x128xf32>
    %15 = arith.mulf %14, %14 : vector<32x128xf32>
    %cst_9 = arith.constant dense<0.000000e+00> : vector<32xf32>
    %16 = vector.multi_reduction <add>, %15, %cst_9 [1] : vector<32x128xf32> to vector<32xf32>
    %17 = vector.shape_cast %16 : vector<32xf32> to vector<32x1xf32>
    %cst_10 = arith.constant 1.280000e+02 : f32
    %18 = vector.broadcast %cst_10 : f32 to vector<32x1xf32>
    %19 = arith.divf %17, %18 : vector<32x1xf32>
    %20 = vector.broadcast %12 : vector<32x1xf32> to vector<32x128xf32>
    %21 = arith.subf %8, %20 : vector<32x128xf32>
    %cst_11 = arith.constant 9.99999996E-13 : f32
    %22 = vector.broadcast %cst_11 : f32 to vector<32x1xf32>
    %23 = arith.addf %19, %22 : vector<32x1xf32>
    %24 = math.rsqrt %23 : vector<32x1xf32>
    %25 = vector.broadcast %24 : vector<32x1xf32> to vector<32x128xf32>
    %26 = arith.mulf %21, %25 : vector<32x128xf32>
    %c0_12 = arith.constant 0 : index
    %c0_13 = arith.constant 0 : index
    %27 = vector.load %arg5[%c0_12, %c0_13] : memref<1x128xf32, #tpu.memory_space<vmem>>, vector<1x128xf32>
    %28 = vector.broadcast %27 : vector<1x128xf32> to vector<32x128xf32>
    %29 = arith.mulf %26, %28 : vector<32x128xf32>
    %c0_14 = arith.constant 0 : index
    %c0_15 = arith.constant 0 : index
    %30 = vector.load %arg6[%c0_14, %c0_15] : memref<1x128xf32, #tpu.memory_space<vmem>>, vector<1x128xf32>
    %31 = vector.broadcast %30 : vector<1x128xf32> to vector<32x128xf32>
    %32 = arith.addf %29, %31 : vector<32x128xf32>
    %33 = arith.truncf %32 : vector<32x128xf32> to vector<32x128xbf16>
    %c0_16 = arith.constant 0 : index
    %c0_17 = arith.constant 0 : index
    %34 = vector.load %arg9[%c0_16, %c0_17] : memref<32x128xbf16, #tpu.memory_space<vmem>>, vector<32x128xbf16>
    tpu.vector_store %arg9[%c0_16, %c0_17], %33 {strides = array<i32>} : memref<32x128xbf16, #tpu.memory_space<vmem>>, vector<32x128xbf16>,
    %c0_18 = arith.constant 0 : index
    %c0_19 = arith.constant 0 : index
    %35 = vector.load %arg7[%c0_18, %c0_19] : memref<128x128xbf16, #tpu.memory_space<vmem>>, vector<128x128xbf16>
    %cst_20 = arith.constant dense<0.000000e+00> : vector<32x128xf32>
    %36 = tpu.matmul %33, %35, %cst_20 {dimension_numbers = #tpu.dot_dimension_numbers<[1], [0], [0], [1], [0, 0, 1, 1], [], []>} : vector<32x128xbf16>, vector<128x128xbf16>, vector<32x128xf32> -> vector<32x128xf32>
    %c0_21 = arith.constant 0 : index
    %c0_22 = arith.constant 0 : index
    %37 = vector.load %arg8[%c0_21, %c0_22] : memref<1x128xf32, #tpu.memory_space<vmem>>, vector<1x128xf32>
    %38 = vector.broadcast %37 : vector<1x128xf32> to vector<32x128xf32>
    %39 = arith.addf %36, %38 : vector<32x128xf32>
    %c0_23 = arith.constant 0 : index
    %c0_24 = arith.constant 0 : index
    %40 = vector.load %arg10[%c0_23, %c0_24] : memref<32x128xf32, #tpu.memory_space<vmem>>, vector<32x128xf32>
    tpu.vector_store %arg10[%c0_23, %c0_24], %39 {strides = array<i32>} : memref<32x128xf32, #tpu.memory_space<vmem>>, vector<32x128xf32>,
    return
  }
  func.func @transform_0(%arg0: i32) -> (i32, i32) {
    %c0_i32 = arith.constant 0 : i32
    %c0_i32_0 = arith.constant 0 : i32
    return %arg0, %c0_i32 : i32, i32
  }
  func.func @transform_1(%arg0: i32) -> (i32, i32) {
    %c0_i32 = arith.constant 0 : i32
    %c0_i32_0 = arith.constant 0 : i32
    %c0_i32_1 = arith.constant 0 : i32
    return %c0_i32, %c0_i32_0 : i32, i32
  }
  func.func @transform_2(%arg0: i32) -> (i32, i32) {
    %c0_i32 = arith.constant 0 : i32
    %c0_i32_0 = arith.constant 0 : i32
    %c0_i32_1 = arith.constant 0 : i32
    return %c0_i32, %c0_i32_0 : i32, i32
  }
  func.func @transform_3(%arg0: i32) -> (i32, i32) {
    %c0_i32 = arith.constant 0 : i32
    %c0_i32_0 = arith.constant 0 : i32
    return %arg0, %c0_i32 : i32, i32
  }
  func.func @transform_4(%arg0: i32) -> (i32, i32) {
    %c0_i32 = arith.constant 0 : i32
    %c0_i32_0 = arith.constant 0 : i32
    %c0_i32_1 = arith.constant 0 : i32
    return %c0_i32, %c0_i32_0 : i32, i32
  }
  func.func @transform_5(%arg0: i32) -> (i32, i32) {
    %c0_i32 = arith.constant 0 : i32
    %c0_i32_0 = arith.constant 0 : i32
    %c0_i32_1 = arith.constant 0 : i32
    return %c0_i32, %c0_i32_0 : i32, i32
  }
  func.func @transform_6(%arg0: i32) -> (i32, i32) {
    %c0_i32 = arith.constant 0 : i32
    %c0_i32_0 = arith.constant 0 : i32
    %c0_i32_1 = arith.constant 0 : i32
    return %c0_i32, %c0_i32_0 : i32, i32
  }
  func.func @transform_7(%arg0: i32) -> (i32, i32) {
    %c0_i32 = arith.constant 0 : i32
    %c0_i32_0 = arith.constant 0 : i32
    %c0_i32_1 = arith.constant 0 : i32
    return %c0_i32, %c0_i32_0 : i32, i32
  }
  func.func @transform_8(%arg0: i32) -> (i32, i32) {
    %c0_i32 = arith.constant 0 : i32
    %c0_i32_0 = arith.constant 0 : i32
    return %arg0, %c0_i32 : i32, i32
  }
  func.func @transform_9(%arg0: i32) -> (i32, i32) {
    %c0_i32 = arith.constant 0 : i32
    %c0_i32_0 = arith.constant 0 : i32
    return %arg0, %c0_i32 : i32, i32
  }
}

</mosaic_0001>

<bundles_post_ra>
// kernel: bert_base_uncased_forward.13
= control target key start
LH: loop header
LB: loop body
LE: loop exit
PB: predicated region body
PF: predicated region fallthrough
CT: control target
= control target key end

     0   :  { %s745_s15 = smov 0   ;;  %s747_s16 = smov 0   ;;  %s829_s0 = inlined_call_operand.vmem [shape: bf16[12,32,32], index: 0, kind: input, shape index: {}, may-alias: {0,1,2}]   ;;  %s830_s1 = inlined_call_operand.vmem [shape: bf16[12,32,32], index: 1, kind: input, shape index: {}, may-alias: {0,1,2}]   ;;  %s831_s2 = inlined_call_operand.vmem [shape: bf16[12,32,32], index: 2, kind: input, shape index: {}, may-alias: {0,1,2}]   ;;  %s832_s3 = inlined_call_operand.vmem [shape: f32[2,1,16], index: 3, kind: input, shape index: {}]   ;;  %s833_s4 = inlined_call_operand.vmem [shape: bf16[4,32,32], index: 4, kind: output, shape index: {}]  }
   0x1   :  { %s749_s17 = smov 0   ;;  %s751_s18 = smov 0  }
   0x2   :  { %s753_s19 = smov 0  }
   0x3 LB: > { %s29_s20 = sadd.s32 1, %s710_s17  ;;  %s33_s21 = sadd.s32 1, %s714_s18  ;;  %s718_s19 = sphi %s753_s19, %s14_s19   ;;  %s714_s18 = sphi %s751_s18, %s837_s18   ;;  %s710_s17 = sphi %s749_s17, %s836_s17   ;;  %s706_s16 = sphi %s747_s16, %s835_s16   ;;  %s702_s15 = sphi %s745_s15, %s834_s15  }
   0x4   : > { %p31_p0 = scmp.ge.s32.totalorder %s29_s20, 4  ;;  %p599_p1 = scmp.ge.s32.totalorder %s718_s19, 1 }
   0x5   : > { %p246_p2 = scmp.lt.s32.totalorder %s718_s19, 9 }
   0x6   : > { %s839_s20 = smov (%p31_p0, %s29_s20), 0  ;;  %s841_s21 = smov (!%p31_p0, %s33_s21), %s714_s18 }
   0x7   : > { %p247_p3 = pnand %p599_p1, %p246_p2  ;;  %p35_p4 = scmp.ge.s32.totalorder %s841_s21, 2 }
   0x8   : > { %s600_s22 = sshll.u32 (!%p247_p3), %s706_s16, 1  ;;  %s317_s23 = sadd.s32 (!%p247_p3), 4, %s702_s15 }
   0x9   : > { %s843_s21 = smov (%p35_p4, %s841_s21), 0  ;;  %250 = sbr.rel (%p247_p3) target bundleno = 560 (0x230), region = 36 }
   0xa   : > { %p309_p5 = scmp.lt.s32.totalorder (!%p247_p3), %s600_s22, 3  ;;  %p319_p6 = scmp.lt.s32.totalorder (!%p247_p3), %s317_s23, 11 }
   0xb   : > { %p307_p7 = scmp.lt.s32.totalorder (!%p247_p3), %s702_s15, 11  ;;  %p341_p8 = scmp.lt.s32.totalorder (!%p247_p3), %s706_s16, 1 }
   0xc   : > { %s329_s14 = sadd.s32 (!%p247_p3), 8, %s702_s15  ;;  %p346_p10 = scmp.lt.s32.totalorder (!%p247_p3), %s702_s15, 3 }
   0xd   : > { %p331_p9 = scmp.lt.s32.totalorder (!%p247_p3), %s329_s14, 11 }
   0xe   : > { %s845_s22 = smov (!%p309_p5, %s600_s22), 3  ;;  %s847_s23 = smov (!%p319_p6, %s317_s23), 11  ;;  %vm374_vm0 = vcmask 261120   ;;  %vm402_vm1 = vcmask 130048   ;;  %vm451_vm2 = vcmask 257024  }
   0xf   : > { %s308_s24 = scalar_select %p307_p7, %s702_s15, 11 }
  0x10   : > { %s604_s25 = sshll.u32 %s847_s23, 2  ;;  %s849_s16 = smov (!%p341_p8, %s706_s16), 1 }
  0x11   : > { %s324_s26 = sadd.s32 %s604_s25, %s845_s22  ;;  %s601_s27 = sshll.u32 %s308_s24, 2 }
  0x12   : > { %s605_s28 = sshll.u32 %s324_s26, 2  ;;  %s312_s29 = sadd.s32 %s601_s27, %s845_s22 }
  0x13   : > { %s326_s6 = scalar_lea.vmem %s830_s1, %s605_s28  ;;  %s602_s7 = sshll.u32 %s312_s29, 2 }
  0x14   : > { %v629_v0 = vld [vmem:[%s326_s6] sm:$0xff]  ;;  %s314_s10 = scalar_lea.vmem %s829_s0, %s602_s7  ;;  %s343_s13 = scalar_lea.vmem %s832_s3, %s849_s16 }
  0x15   : > { %v379_v1 = vsel %vm374_vm0, %v629_v0, 0  ;;  %v628_v2 = vld [vmem:[%s314_s10] sm:$0xff]  ;;  %s851_s14 = smov (!%p331_p9, %s329_s14), 11  ;;  %s853_s15 = smov (!%p346_p10, %s702_s15), 3 }
  0x16   : > { %388 = vmatpush.bf16.xpose.msra.mxu0 %v379_v1  ;;  %v671_v3 = vld [vmem:[%s343_s13] ss:$0 sm:$0xff]  ;;  %s607_s16 = sshll.u32 %s851_s14, 2  ;;  %s610_s28 = sshll.u32 %s853_s15, 2 }
  0x17   : > { %s336_s23 = sadd.s32 %s607_s16, %s845_s22  ;;  %s351_s29 = sadd.s32 %s610_s28, %s845_s22 }
  0x18   : > { %s608_s24 = sshll.u32 %s336_s23, 2  ;;  %s611_s30 = sshll.u32 %s351_s29, 2 }
  0x19   : > { %s338_s27 = scalar_lea.vmem %s831_s2, %s608_s24  ;;  %s353_s7 = scalar_lea.vmem %s833_s4, %s611_s30 }
  0x1a   : > { %v630_v22 = vld [vmem:[%s338_s27] sm:$0xff] }
  0x1b   : > { %442 = vmatpush.bf16.msra.mxu1 %v630_v22 }
  0x1d   : > { %620 = vmatmul.msk.bf16.vlgmr.msra.gmra.mxu0 %vm374_vm0, %v628_v2 }
  0x9a   : > { %v390_v4 = vpop.f32.mrf.mxu0 }
  0x9b   : > { %v395_v5 = vmul.f32 0.17677669, %v390_v4 }
  0x9d   : > { %v400_v6 = vadd.f32 %v671_v3, %v395_v5 }
  0x9f   : > { %v403_v7 = vsel %vm402_vm1, %v400_v6, -inf }
  0xa0   : > { %404 = vmax.xlane.f32.xlu0 %v403_v7 }
  0xa2   : > { %v392_v8 = vpop.f32.mrf.mxu0 }
  0xa3   : > { %v396_v9 = vmul.f32 0.17677669, %v392_v8 }
  0xa5   : > { %v401_v10 = vadd.f32 %v671_v3, %v396_v9 }
  0xa7   : > { %v406_v11 = vsel %vm402_vm1, %v401_v10, -inf }
  0xa8   : > { %407 = vmax.xlane.f32.xlu0 %v406_v11 }
 0x113   : > { %v405_v12 = vpop.xlane.xlu0 %404 }
 0x114   : > { %v409_v13 = vsub.f32 %v400_v6, %v405_v12 }
 0x116   : > { %v411_v14 = vmul.f32 1.442695, %v409_v13 }
 0x118   : > { %672 = vpow2.f32 %v411_v14 }
 0x11b   : > { %v408_v15 = vpop.xlane.xlu0 %407 }
 0x11c   : > { %v410_v16 = vsub.f32 %v401_v10, %v408_v15 }
 0x11e   : > { %v673_v17 = vpop.eup %672  ;;  %v413_v18 = vmul.f32 1.442695, %v410_v16 }
 0x11f   : > { %v415_v19 = vsel %vm402_vm1, %v673_v17, 0.0 }
 0x120   : > { %674 = vpow2.f32 %v413_v18  ;;  %416 = vadd.xlane.f32.xlu1 %v415_v19 }
 0x126   : > { %v675_v20 = vpop.eup %674 }
 0x127   : > { %v418_v21 = vsel %vm402_vm1, %v675_v20, 0.0 }
 0x128   : > { %419 = vadd.xlane.f32.xlu1 %v418_v21 }
 0x193   : > { %v417_v23 = vpop.xlane.xlu1 %416 }
 0x194   : > { %676 = vrcp.f32 %v417_v23 }
 0x19a   : > { %v677_v25 = vpop.eup %676 }
 0x19b   : > { %v420_v24 = vpop.xlane.xlu1 %419  ;;  %v423_v27 = vmul.f32 %v677_v25, %v673_v17 }
 0x19c   : > { %678 = vrcp.f32 %v420_v24 }
 0x1a2   : > { %v679_v26 = vpop.eup %678 }
 0x1a3   : > { %v424_v28 = vmul.f32 %v679_v26, %v675_v20 }
 0x1a5   : > { %v425_v29 = vpack.c.bf16 %v424_v28, %v423_v27 }
 0x1a7   : > { %625 = vmatmul.msk.bf16.vlgmr.msra.gmra.mxu1 %vm402_vm1, %v425_v29 }
 0x224   : > { %v444_v30 = vpop.f32.mrf.mxu1 }
 0x225   : > { %v449_v31 = vpack.c.bf16 %v444_v30, %v444_v30 }
 0x227   : > { %452 = vst.msk [vmem:[%s353_s7] sm:$0xf] %vm451_vm2, %v449_v31 }
 0x22c   : > { %v446_v32 = vpop.f32.mrf.mxu1 }
 0x22d   : > { %v450_v33 = vpack.c.bf16 %v446_v32, %v446_v32 }
 0x22f   : > { %453 = vst.msk [vmem:[%s353_s7 + $0x4] sm:$0xf] %vm451_vm2, %v450_v33 }
 0x230 PF: > { %s14_s19 = sadd.s32 1, %s718_s19   ;;  %s834_s15 = smov %s710_s17 }
 0x231   : > { %p11_p11 = scmp.ge.s32.totalorder %s14_s19, 10   ;;  %s835_s16 = smov %s714_s18 }
 0x232   : > { %s836_s17 = smov %s839_s20  ;;  %s837_s18 = smov %s843_s21 }
 0x233   :  { %13 = sbr.rel (!%p11_p11) target bundleno = 3 (0x3), region = 75 }

// kernel: bert_base_uncased_forward.11
= control target key start
LH: loop header
LB: loop body
LE: loop exit
PB: predicated region body
PF: predicated region fallthrough
CT: control target
= control target key end

     0   :  { %v157_v4 = vmov 128.0   ;;  %s222_s0 = inlined_call_operand.vmem [shape: f32[32,128], index: 0, kind: input, shape index: {}]   ;;  %s223_s1 = inlined_call_operand.vmem [shape: f32[1,128], index: 1, kind: input, shape index: {}]   ;;  %s224_s2 = inlined_call_operand.vmem [shape: f32[1,128], index: 2, kind: input, shape index: {}]   ;;  %s225_s3 = inlined_call_operand.vmem [shape: bf16[32,128], index: 3, kind: output, shape index: {}]  }
   0x1   :  { %v16_v0 = vld [vmem:[%s222_s0 + $0x10] sm:$0xff]  ;;  %v14_v1 = vld [vmem:[%s222_s0] sm:$0xff]  ;;  %v17_v2 = vld [vmem:[%s222_s0 + $0x18] sm:$0xff]  ;;  %147 = vrcp.f32 %v157_v4 }
   0x2   :  { %22 = vadd.xlane.f32.xlu1 %v16_v0  ;;  %18 = vadd.xlane.f32.xlu0 %v14_v1  ;;  %v15_v3 = vld [vmem:[%s222_s0 + $0x8] sm:$0xff]  ;;  %v145_v62 = vld [vmem:[%s223_s1] ss:$0 sm:$0xff] }
   0x7   :  { %v148_v5 = vpop.eup %147 }
   0x8   :  { %v27_v6 = vmul.f32 128.0, %v148_v5  ;;  %vm31_vm0 = vweird.f32 %v148_v5 }
   0xa   :  { %24 = vadd.xlane.f32.xlu1 %v17_v2  ;;  %20 = vadd.xlane.f32.xlu0 %v15_v3  ;;  %v28_v7 = vsub.f32 1.0, %v27_v6 }
   0xc   :  { %v29_v8 = vmul.f32 %v148_v5, %v28_v7 }
   0xe   :  { %v30_v9 = vadd.f32 %v148_v5, %v29_v8 }
  0x10   :  { %v32_v10 = vsel %vm31_vm0, %v148_v5, %v30_v9  ;;  %v146_v5 = vld [vmem:[%s224_s2] ss:$0 sm:$0xff] }
  0x75   :  { %v23_v11 = vpop.xlane.xlu1 %22  ;;  %v19_v12 = vpop.xlane.xlu0 %18 }
  0x76   :  { %v35_v13 = vmul.f32 %v32_v10, %v23_v11  ;;  %v33_v14 = vmul.f32 %v32_v10, %v19_v12 }
  0x78   :  { %v190_v15 = vsub.f32 %v16_v0, %v35_v13  ;;  %v192_v16 = vsub.f32 %v14_v1, %v33_v14 }
  0x7a   :  { %v43_v17 = vmul.f32 %v190_v15, %v190_v15  ;;  %v41_v18 = vmul.f32 %v192_v16, %v192_v16 }
  0x7c   :  { %49 = vadd.xlane.f32.xlu0 %v43_v17  ;;  %45 = vadd.xlane.f32.xlu2 %v41_v18 }
  0x7d   :  { %v25_v19 = vpop.xlane.xlu1 %24  ;;  %v21_v20 = vpop.xlane.xlu0 %20 }
  0x7e   :  { %v36_v21 = vmul.f32 %v32_v10, %v25_v19  ;;  %v34_v22 = vmul.f32 %v32_v10, %v21_v20 }
  0x80   :  { %v198_v23 = vsub.f32 %v17_v2, %v36_v21  ;;  %v200_v24 = vsub.f32 %v15_v3, %v34_v22 }
  0x82   :  { %v44_v25 = vmul.f32 %v198_v23, %v198_v23  ;;  %v42_v26 = vmul.f32 %v200_v24, %v200_v24 }
  0x84   :  { %51 = vadd.xlane.f32.xlu1 %v44_v25  ;;  %47 = vadd.xlane.f32.xlu2 %v42_v26 }
  0xef   :  { %v46_v27 = vpop.xlane.xlu2 %45  ;;  %v50_v28 = vpop.xlane.xlu0 %49 }
  0xf0   :  { %v53_v29 = vmul.f32 %v46_v27, %v32_v10  ;;  %v55_v30 = vmul.f32 %v50_v28, %v32_v10 }
  0xf2   :  { %v57_v31 = vadd.f32 1e-12, %v53_v29  ;;  %v59_v32 = vadd.f32 1e-12, %v55_v30 }
  0xf4   :  { %149 = vrsqrt.f32 %v57_v31  ;;  %vm87_vm3 = vweird.f32 %v59_v32  ;;  %vm67_vm4 = vweird.f32 %v57_v31 }
  0xf5   :  { %151 = vrsqrt.f32 %v59_v32 }
  0xf7   :  { %v52_v33 = vpop.xlane.xlu1 %51  ;;  %v48_v34 = vpop.xlane.xlu2 %47 }
  0xf8   :  { %v56_v35 = vmul.f32 %v52_v33, %v32_v10  ;;  %v54_v36 = vmul.f32 %v48_v34, %v32_v10 }
  0xfa   :  { %v150_v37 = vpop.eup %149  ;;  %v60_v38 = vadd.f32 1e-12, %v56_v35  ;;  %v58_v39 = vadd.f32 1e-12, %v54_v36 }
  0xfb   :  { %v152_v40 = vpop.eup %151  ;;  %v62_v41 = vmul.f32 %v150_v37, %v57_v31  ;;  %vm68_vm2 = vweird.f32 %v150_v37 }
  0xfc   :  { %v82_v42 = vmul.f32 %v152_v40, %v59_v32  ;;  %153 = vrsqrt.f32 %v60_v38  ;;  %vm88_vm1 = vweird.f32 %v152_v40  ;;  %vm69_vm6 = vmor %vm67_vm4, %vm68_vm2  ;;  %vm97_vm9 = vweird.f32 %v60_v38 }
  0xfd   :  { %v63_v43 = vmul.f32 %v150_v37, %v62_v41  ;;  %155 = vrsqrt.f32 %v58_v39  ;;  %vm89_vm5 = vmor %vm87_vm3, %vm88_vm1  ;;  %vm77_vm11 = vweird.f32 %v58_v39 }
  0xfe   :  { %v83_v44 = vmul.f32 %v152_v40, %v82_v42 }
  0xff   :  { %v64_v45 = vmul.f32 0.5, %v63_v43 }
 0x100   :  { %v84_v46 = vmul.f32 0.5, %v83_v44 }
 0x101   :  { %v65_v47 = vsub.f32 1.5, %v64_v45 }
 0x102   :  { %v154_v48 = vpop.eup %153  ;;  %v85_v49 = vsub.f32 1.5, %v84_v46 }
 0x103   :  { %v156_v50 = vpop.eup %155  ;;  %v92_v51 = vmul.f32 %v154_v48, %v60_v38  ;;  %v66_v52 = vmul.f32 %v150_v37, %v65_v47  ;;  %vm98_vm7 = vweird.f32 %v154_v48 }
 0x104   :  { %v86_v53 = vmul.f32 %v152_v40, %v85_v49  ;;  %v72_v54 = vmul.f32 %v156_v50, %v58_v39  ;;  %vm78_vm8 = vweird.f32 %v156_v50  ;;  %vm99_vm10 = vmor %vm97_vm9, %vm98_vm7 }
 0x105   :  { %v93_v55 = vmul.f32 %v154_v48, %v92_v51  ;;  %v70_v59 = vsel %vm69_vm6, %v150_v37, %v66_v52  ;;  %vm79_vm12 = vmor %vm77_vm11, %vm78_vm8 }
 0x106   :  { %v73_v56 = vmul.f32 %v156_v50, %v72_v54  ;;  %v90_v57 = vsel %vm89_vm5, %v152_v40, %v86_v53  ;;  %v101_v1 = vmul.f32 %v70_v59, %v192_v16 }
 0x107   :  { %v94_v58 = vmul.f32 0.5, %v93_v55  ;;  %v103_v63 = vmul.f32 %v90_v57, %v190_v15 }
 0x108   :  { %v74_v60 = vmul.f32 0.5, %v73_v56  ;;  %v109_v9 = vmul.f32 %v145_v62, %v101_v1 }
 0x109   :  { %v95_v61 = vsub.f32 1.5, %v94_v58  ;;  %v111_v6 = vmul.f32 %v145_v62, %v103_v63 }
 0x10a   :  { %v75_v0 = vsub.f32 1.5, %v74_v60  ;;  %v117_v15 = vadd.f32 %v146_v5, %v109_v9 }
 0x10b   :  { %v96_v2 = vmul.f32 %v154_v48, %v95_v61  ;;  %v119_v13 = vadd.f32 %v146_v5, %v111_v6 }
 0x10c   :  { %v76_v3 = vmul.f32 %v156_v50, %v75_v0 }
 0x10d   :  { %v100_v4 = vsel %vm99_vm10, %v154_v48, %v96_v2 }
 0x10e   :  { %v104_v7 = vmul.f32 %v100_v4, %v198_v23  ;;  %v80_v8 = vsel %vm79_vm12, %v156_v50, %v76_v3 }
 0x10f   :  { %v102_v10 = vmul.f32 %v80_v8, %v200_v24 }
 0x110   :  { %v112_v11 = vmul.f32 %v145_v62, %v104_v7 }
 0x111   :  { %v110_v12 = vmul.f32 %v145_v62, %v102_v10 }
 0x112   :  { %v120_v14 = vadd.f32 %v146_v5, %v112_v11 }
 0x113   :  { %v118_v16 = vadd.f32 %v146_v5, %v110_v12 }
 0x114   :  { %v141_v17 = vpack.c.bf16 %v120_v14, %v119_v13 }
 0x115   :  { %v136_v18 = vpack.c.bf16 %v118_v16, %v117_v15 }
 0x116   :  { %143 = vst [vmem:[%s225_s3 + $0x8] sm:$0xff] %v141_v17  }
 0x117   :  { %137 = vst [vmem:[%s225_s3] sm:$0xff] %v136_v18  }

// kernel: bert_base_uncased_forward.12
= control target key start
LH: loop header
LB: loop body
LE: loop exit
PB: predicated region body
PF: predicated region fallthrough
CT: control target
= control target key end

     0   :  { %s588_s12 = smov 0   ;;  %s590_s13 = smov 0   ;;  %s635_s0 = inlined_call_operand.vmem [shape: bf16[32,128], index: 0, kind: input, shape index: {}]   ;;  %s636_s1 = inlined_call_operand.vmem [shape: bf16[12,128,32], index: 1, kind: input, shape index: {}]   ;;  %s637_s2 = inlined_call_operand.vmem [shape: f32[12,1,32], index: 2, kind: input, shape index: {}]   ;;  %s638_s3 = inlined_call_operand.vmem [shape: bf16[12,32,32], index: 3, kind: output, shape index: {}]  }
   0x1   :  { %s592_s14 = smov 0  }
   0x2 LB: > { %s22_s15 = sadd.s32 1, %s562_s13  ;;  %p452_p0 = scmp.ge.s32.totalorder %s566_s14, 1  ;;  %s566_s14 = sphi %s592_s14, %s13_s14   ;;  %s562_s13 = sphi %s590_s13, %s640_s13   ;;  %s558_s12 = sphi %s588_s12, %s639_s12  }
   0x3   : > { %p23_p1 = scmp.ge.s32.totalorder %s22_s15, 12  ;;  %p170_p2 = scmp.lt.s32.totalorder %s566_s14, 13 }
   0x5   : > { %s642_s15 = smov (%p23_p1, %s22_s15), 0  ;;  %p171_p3 = pnand %p452_p0, %p170_p2 }
   0x6   : > { %p212_p4 = scmp.lt.s32.totalorder (!%p171_p3), %s558_s12, 11 }
   0x7   : > { %174 = sbr.rel (%p171_p3) target bundleno = 187 (0xbb), region = 32 }
   0xc   : > { %s644_s12 = smov (!%p212_p4, %s558_s12), 11  ;;  %v501_v8 = vld [vmem:[%s635_s0] sm:$0xff]  ;;  %v502_v9 = vld [vmem:[%s635_s0 + $0x8] sm:$0xff]  ;;  %vm337_vm0 = vcmask 257024  }
   0xd   : > { %s499_s16 = sshll.u32 %s644_s12, 6  ;;  %s219_s19 = scalar_lea.vmem %s637_s2, %s644_s12 }
   0xe   : > { %s216_s22 = scalar_lea.vmem %s636_s1, %s499_s16  ;;  %v543_v10 = vld [vmem:[%s219_s19] ss:$0 sm:$0xff]  ;;  %s500_s27 = sshll.u32 %s644_s12, 4 }
   0xf   : > { %v510_v0 = vld [vmem:[%s216_s22 + $0x38] sm:$0xff]  ;;  %v509_v1 = vld [vmem:[%s216_s22 + $0x30] sm:$0xff]  ;;  %v508_v2 = vld [vmem:[%s216_s22 + $0x28] sm:$0xff]  ;;  %s228_s30 = scalar_lea.vmem %s638_s3, %s500_s27 }
  0x10   : > { %314 = vmatpush.bf16.msra.mxu0 %v510_v0  ;;  %511 = vmatpush.bf16.msra.mxu1 %v510_v0  ;;  %v507_v3 = vld [vmem:[%s216_s22 + $0x20] sm:$0xff]  ;;  %v506_v4 = vld [vmem:[%s216_s22 + $0x18] sm:$0xff]  ;;  %v505_v5 = vld [vmem:[%s216_s22 + $0x10] sm:$0xff] }
  0x11   : > { %v504_v6 = vld [vmem:[%s216_s22 + $0x8] sm:$0xff]  ;;  %v503_v7 = vld [vmem:[%s216_s22] sm:$0xff] }
  0x14   : > { %315 = vmatpush.bf16.msra.mxu0 %v509_v1  ;;  %512 = vmatpush.bf16.msra.mxu1 %v509_v1 }
  0x18   : > { %316 = vmatpush.bf16.msra.mxu0 %v508_v2  ;;  %513 = vmatpush.bf16.msra.mxu1 %v508_v2 }
  0x1c   : > { %317 = vmatpush.bf16.msra.mxu0 %v507_v3  ;;  %514 = vmatpush.bf16.msra.mxu1 %v507_v3 }
  0x20   : > { %318 = vmatpush.bf16.msra.mxu0 %v506_v4  ;;  %515 = vmatpush.bf16.msra.mxu1 %v506_v4 }
  0x24   : > { %319 = vmatpush.bf16.msra.mxu0 %v505_v5  ;;  %516 = vmatpush.bf16.msra.mxu1 %v505_v5 }
  0x28   : > { %320 = vmatpush.bf16.msra.mxu0 %v504_v6  ;;  %517 = vmatpush.bf16.msra.mxu1 %v504_v6 }
  0x2c   : > { %321 = vmatpush.bf16.msra.mxu0 %v503_v7  ;;  %518 = vmatpush.bf16.msra.mxu1 %v503_v7 }
  0x2f   : > { %322 = vmatmul.bf16.vlgmr.msra.gmra.mxu0 %v501_v8  ;;  %327 = vmatmul.bf16.vlgmr.msra.gmra.mxu1 %v502_v9 }
  0xac   : > { %v323_v11 = vpop.f32.mrf.mxu0  ;;  %v328_v12 = vpop.f32.mrf.mxu1 }
  0xad   : > { %v324_v13 = vadd.f32 %v543_v10, %v323_v11  ;;  %v329_v14 = vadd.f32 %v543_v10, %v328_v12 }
  0xaf   : > { %v333_v15 = vpack.c.bf16 %v324_v13, %v324_v13  ;;  %v335_v16 = vpack.c.bf16 %v329_v14, %v329_v14 }
  0xb1   : > { %338 = vst.msk [vmem:[%s228_s30] sm:$0xf] %vm337_vm0, %v333_v15 }
  0xb2   : > { %340 = vst.msk [vmem:[%s228_s30 + $0x8] sm:$0xf] %vm337_vm0, %v335_v16 }
  0xb4   : > { %v325_v17 = vpop.f32.mrf.mxu0  ;;  %v330_v18 = vpop.f32.mrf.mxu1 }
  0xb5   : > { %v326_v19 = vadd.f32 %v543_v10, %v325_v17  ;;  %v331_v20 = vadd.f32 %v543_v10, %v330_v18 }
  0xb7   : > { %v334_v21 = vpack.c.bf16 %v326_v19, %v326_v19  ;;  %v336_v22 = vpack.c.bf16 %v331_v20, %v331_v20 }
  0xb9   : > { %339 = vst.msk [vmem:[%s228_s30 + $0x4] sm:$0xf] %vm337_vm0, %v334_v21 }
  0xba   : > { %341 = vst.msk [vmem:[%s228_s30 + $0xc] sm:$0xf] %vm337_vm0, %v336_v22 }
  0xbb PF: > { %s13_s14 = sadd.s32 1, %s566_s14   ;;  %s639_s12 = smov %s562_s13 }
  0xbc   : > { %p10_p5 = scmp.ge.s32.totalorder %s13_s14, 14   ;;  %s640_s13 = smov %s642_s15 }
  0xbe   :  { %12 = sbr.rel (!%p10_p5) target bundleno = 2 (0x2), region = 68 }

// kernel: bert_base_uncased_forward.14
= control target key start
LH: loop header
LB: loop body
LE: loop exit
PB: predicated region body
PF: predicated region fallthrough
CT: control target
= control target key end

     0   :  { %s795_s21 = smov 0   ;;  %s797_s22 = smov 0   ;;  %s875_s0 = inlined_call_operand.vmem [shape: bf16[4,32,32], index: 0, kind: input, shape index: {}]   ;;  %s876_s1 = inlined_call_operand.vmem [shape: bf16[4,32,128], index: 1, kind: input, shape index: {}]   ;;  %s877_s2 = inlined_call_operand.vmem [shape: f32[1,128], index: 2, kind: input, shape index: {}]   ;;  %s878_s3 = inlined_call_operand.vmem [shape: bf16[32,128], index: 3, kind: input, shape index: {}]   ;;  %s879_s4 = inlined_call_operand.vmem [shape: f32[1,128], index: 4, kind: input, shape index: {}]   ;;  %s880_s5 = inlined_call_operand.vmem [shape: f32[1,128], index: 5, kind: input, shape index: {}]   ;;  %s881_s6 = inlined_call_operand.vmem [shape: bf16[32,128], index: 6, kind: output, shape index: {}]  }
   0x1   :  { %s799_s23 = smov 0  }
   0x2 LB: > { %s25_s24 = sadd.s32 1, %s752_s22  ;;  %p638_p0 = scmp.ge.s32.totalorder %s756_s23, 1  ;;  %s756_s23 = sphi %s799_s23, %s16_s23   ;;  %s752_s22 = sphi %s797_s22, %s883_s22   ;;  %s748_s21 = sphi %s795_s21, %s882_s21  }
   0x3   : > { %p26_p1 = scmp.ge.s32.totalorder %s25_s24, 4  ;;  %p252_p2 = scmp.lt.s32.totalorder %s756_s23, 5 }
   0x5   : > { %s885_s24 = smov (%p26_p1, %s25_s24), 0  ;;  %p253_p3 = pnand %p638_p0, %p252_p2 }
   0x6   : > { %p297_p4 = scmp.lt.s32.totalorder (!%p253_p3), %s748_s21, 3  ;;  %p643_p5 = scmp.ne.s32.totalorder (!%p253_p3), %s748_s21, 0 }
   0x7   : > { %256 = sbr.rel (%p253_p3) target bundleno = 452 (0x1c4), region = 44 }
   0xc   : > { %s298_s25 = scalar_select %p297_p4, %s748_s21, 3 }
   0xd   : > { %327 = sbr.rel (%p643_p5) target bundleno = 23 (0x17), region = 48 }
   0xe   : > { %s667_s26 = sshll.u32 %s298_s25, 4 }
   0xf   : > { %s304_s29 = scalar_lea.vmem %s875_s0, %s667_s26  ;;  %s310_s8 = scalar_lea.vmem %s876_s1, %s667_s26 }
  0x12   : > { %v758_v0 = vmov 0.0  }
  0x13   : > { %328 = vst [vmem:[#allocation2 + $0x10] sm:$0xff] %v758_v0 }
  0x14   : > { %329 = vst [vmem:[#allocation2] sm:$0xff] %v758_v0 }
  0x15   : > { %330 = vst [vmem:[#allocation2 + $0x18] sm:$0xff] %v758_v0 }
  0x16   : > { %331 = vst [vmem:[#allocation2 + $0x8] sm:$0xff] %v758_v0 }
  0x17 PF: > { %v672_v1 = vld [vmem:[%s310_s8 + $0x8] sm:$0xff]  ;;  %v671_v2 = vld [vmem:[%s310_s8] sm:$0xff]  ;;  %vm366_vm0 = vcmask 261120   ;;  %p662_p6 = scmp.ne.s32.totalorder %s748_s21, 3 }
  0x18   : > { %379 = vmatpush.bf16.msra.mxu0 %v672_v1  ;;  %693 = vmatpush.bf16.msra.mxu1 %v672_v1  ;;  %v669_v3 = vld [vmem:[%s304_s29] sm:$0xff]  ;;  %v670_v4 = vld [vmem:[%s304_s29 + $0x8] sm:$0xff] }
  0x1a   : > { %v332_v5 = vld [vmem:[#allocation2 + $0x10] sm:$0xff] }
  0x1b   : > { %v333_v11 = vld [vmem:[#allocation2] sm:$0xff] }
  0x1c   : > { %380 = vmatpush.bf16.msra.mxu0 %v671_v2  ;;  %694 = vmatpush.bf16.msra.mxu1 %v671_v2  ;;  %v334_v6 = vld [vmem:[#allocation2 + $0x18] sm:$0xff] }
  0x1d   : > { %v335_v12 = vld [vmem:[#allocation2 + $0x8] sm:$0xff] }
  0x1f   : > { %660 = vmatmul.msk.bf16.vlgmr.msra.gmra.mxu0 %vm366_vm0, %v669_v3  ;;  %661 = vmatmul.msk.bf16.vlgmr.msra.gmra.mxu1 %vm366_vm0, %v670_v4 }
  0x9c   : > { %v382_v7 = vpop.f32.mrf.mxu0  ;;  %v387_v8 = vpop.f32.mrf.mxu1 }
  0x9d   : > { %v392_v9 = vadd.f32 %v382_v7, %v332_v5  ;;  %v394_v10 = vadd.f32 %v387_v8, %v334_v6 }
  0x9f   : > { %396 = vst [vmem:[#allocation2 + $0x10] sm:$0xff] %v392_v9 }
  0xa0   : > { %398 = vst [vmem:[#allocation2 + $0x18] sm:$0xff] %v394_v10 }
  0xa4   : > { %v384_v13 = vpop.f32.mrf.mxu0  ;;  %v389_v14 = vpop.f32.mrf.mxu1  ;;  %403 = sbr.rel (%p662_p6) target bundleno = 452 (0x1c4), region = 52 }
  0xa5   : > { %v393_v15 = vadd.f32 %v384_v13, %v333_v11  ;;  %v395_v16 = vadd.f32 %v389_v14, %v335_v12 }
  0xa7   : > { %397 = vst [vmem:[#allocation2] sm:$0xff] %v393_v15 }
  0xa8   : > { %399 = vst [vmem:[#allocation2 + $0x8] sm:$0xff] %v395_v16 }
  0xa9   : > { %v406_v17 = vld [vmem:[#allocation2 + $0x18] sm:$0xff]  ;;  %v721_v18 = vld [vmem:[%s877_s2] ss:$0 sm:$0xff]  ;;  %v691_v19 = vld [vmem:[%s878_s3 + $0x8] sm:$0xff]   ;;  %v759_v36 = vmov 128.0  }
  0xaa   : > { %v404_v20 = vld [vmem:[#allocation2 + $0x10] sm:$0xff]  ;;  %v674_v21 = vld [vmem:[%s878_s3] sm:$0xff]   ;;  %v414_v22 = vadd.f32 %v721_v18, %v406_v17  ;;  %v679_v23 = vunpack.c.l.bf16 %v691_v19  ;;  %v680_v31 = vunpack.c.h.bf16 %v691_v19  ;;  %724 = vrcp.f32 %v759_v36 }
  0xab   : > { %v412_v24 = vadd.f32 %v721_v18, %v404_v20  ;;  %v675_v25 = vunpack.c.l.bf16 %v674_v21  ;;  %v676_v33 = vunpack.c.h.bf16 %v674_v21 }
  0xac   : > { %v426_v28 = vadd.f32 %v679_v23, %v414_v22 }
  0xad   : > { %v424_v29 = vadd.f32 %v675_v25, %v412_v24 }
  0xae   : > { %v405_v27 = vld [vmem:[#allocation2] sm:$0xff]  ;;  %432 = vadd.xlane.f32.xlu1 %v426_v28 }
  0xaf   : > { %v407_v26 = vld [vmem:[#allocation2 + $0x8] sm:$0xff]  ;;  %428 = vadd.xlane.f32.xlu0 %v424_v29  ;;  %v413_v32 = vadd.f32 %v721_v18, %v405_v27 }
  0xb0   : > { %v415_v30 = vadd.f32 %v721_v18, %v407_v26  ;;  %v725_v37 = vpop.eup %724 }
  0xb1   : > { %v425_v35 = vadd.f32 %v676_v33, %v413_v32  ;;  %v437_v38 = vmul.f32 128.0, %v725_v37  ;;  %vm441_vm1 = vweird.f32 %v725_v37 }
  0xb2   : > { %v427_v34 = vadd.f32 %v680_v31, %v415_v30  ;;  %v722_v30 = vld [vmem:[%s879_s4] ss:$0 sm:$0xff] }
  0xb3   : > { %v438_v39 = vsub.f32 1.0, %v437_v38 }
  0xb5   : > { %v439_v40 = vmul.f32 %v725_v37, %v438_v39 }
  0xb6   : > { %434 = vadd.xlane.f32.xlu1 %v427_v34 }
  0xb7   : > { %430 = vadd.xlane.f32.xlu0 %v425_v35  ;;  %v440_v41 = vadd.f32 %v725_v37, %v439_v40 }
  0xb9   : > { %v442_v42 = vsel %vm441_vm1, %v725_v37, %v440_v41  ;;  %v723_v37 = vld [vmem:[%s880_s5] ss:$0 sm:$0xff] }
 0x121   : > { %v433_v43 = vpop.xlane.xlu1 %432 }
 0x122   : > { %v429_v44 = vpop.xlane.xlu0 %428  ;;  %v445_v45 = vmul.f32 %v442_v42, %v433_v43 }
 0x123   : > { %v443_v46 = vmul.f32 %v442_v42, %v429_v44 }
 0x124   : > { %v834_v47 = vsub.f32 %v426_v28, %v445_v45 }
 0x125   : > { %v836_v48 = vsub.f32 %v424_v29, %v443_v46 }
 0x126   : > { %v453_v49 = vmul.f32 %v834_v47, %v834_v47 }
 0x127   : > { %v451_v50 = vmul.f32 %v836_v48, %v836_v48 }
 0x128   : > { %459 = vadd.xlane.f32.xlu0 %v453_v49 }
 0x129   : > { %455 = vadd.xlane.f32.xlu2 %v451_v50  ;;  %v435_v51 = vpop.xlane.xlu1 %434 }
 0x12a   : > { %v431_v52 = vpop.xlane.xlu0 %430  ;;  %v446_v53 = vmul.f32 %v442_v42, %v435_v51 }
 0x12b   : > { %v444_v54 = vmul.f32 %v442_v42, %v431_v52 }
 0x12c   : > { %v842_v55 = vsub.f32 %v427_v34, %v446_v53 }
 0x12d   : > { %v844_v56 = vsub.f32 %v425_v35, %v444_v54 }
 0x12e   : > { %v454_v57 = vmul.f32 %v842_v55, %v842_v55 }
 0x12f   : > { %v452_v58 = vmul.f32 %v844_v56, %v844_v56 }
 0x130   : > { %461 = vadd.xlane.f32.xlu1 %v454_v57 }
 0x131   : > { %457 = vadd.xlane.f32.xlu2 %v452_v58 }
 0x19b   : > { %v460_v60 = vpop.xlane.xlu0 %459 }
 0x19c   : > { %v456_v59 = vpop.xlane.xlu2 %455  ;;  %v465_v62 = vmul.f32 %v460_v60, %v442_v42 }
 0x19d   : > { %v463_v61 = vmul.f32 %v456_v59, %v442_v42 }
 0x19e   : > { %v469_v0 = vadd.f32 1e-12, %v465_v62 }
 0x19f   : > { %v467_v63 = vadd.f32 1e-12, %v463_v61 }
 0x1a0   : > { %vm497_vm4 = vweird.f32 %v469_v0 }
 0x1a1   : > { %726 = vrsqrt.f32 %v467_v63  ;;  %vm477_vm5 = vweird.f32 %v467_v63 }
 0x1a2   : > { %728 = vrsqrt.f32 %v469_v0 }
 0x1a3   : > { %v462_v1 = vpop.xlane.xlu1 %461 }
 0x1a4   : > { %v458_v2 = vpop.xlane.xlu2 %457  ;;  %v466_v3 = vmul.f32 %v462_v1, %v442_v42 }
 0x1a5   : > { %v464_v4 = vmul.f32 %v458_v2, %v442_v42 }
 0x1a6   : > { %v470_v6 = vadd.f32 1e-12, %v466_v3 }
 0x1a7   : > { %v727_v5 = vpop.eup %726  ;;  %v468_v7 = vadd.f32 1e-12, %v464_v4 }
 0x1a8   : > { %v729_v8 = vpop.eup %728  ;;  %v472_v9 = vmul.f32 %v727_v5, %v467_v63  ;;  %730 = vrsqrt.f32 %v470_v6  ;;  %vm478_vm3 = vweird.f32 %v727_v5  ;;  %vm507_vm10 = vweird.f32 %v470_v6 }
 0x1a9   : > { %v492_v10 = vmul.f32 %v729_v8, %v469_v0  ;;  %732 = vrsqrt.f32 %v468_v7  ;;  %vm498_vm2 = vweird.f32 %v729_v8  ;;  %vm479_vm7 = vmor %vm477_vm5, %vm478_vm3  ;;  %vm487_vm12 = vweird.f32 %v468_v7 }
 0x1aa   : > { %v473_v11 = vmul.f32 %v727_v5, %v472_v9  ;;  %vm499_vm6 = vmor %vm497_vm4, %vm498_vm2 }
 0x1ab   : > { %v493_v12 = vmul.f32 %v729_v8, %v492_v10 }
 0x1ac   : > { %v474_v13 = vmul.f32 0.5, %v473_v11 }
 0x1ad   : > { %v494_v14 = vmul.f32 0.5, %v493_v12 }
 0x1ae   : > { %v475_v15 = vsub.f32 1.5, %v474_v13  ;;  %v731_v16 = vpop.eup %730 }
 0x1af   : > { %v495_v17 = vsub.f32 1.5, %v494_v14  ;;  %v733_v18 = vpop.eup %732  ;;  %v502_v19 = vmul.f32 %v731_v16, %v470_v6  ;;  %vm508_vm8 = vweird.f32 %v731_v16 }
 0x1b0   : > { %v476_v20 = vmul.f32 %v727_v5, %v475_v15  ;;  %v482_v22 = vmul.f32 %v733_v18, %v468_v7  ;;  %vm488_vm9 = vweird.f32 %v733_v18  ;;  %vm509_vm11 = vmor %vm507_vm10, %vm508_vm8 }
 0x1b1   : > { %v496_v21 = vmul.f32 %v729_v8, %v495_v17  ;;  %v503_v23 = vmul.f32 %v731_v16, %v502_v19  ;;  %vm489_vm13 = vmor %vm487_vm12, %vm488_vm9 }
 0x1b2   : > { %v483_v24 = vmul.f32 %v733_v18, %v482_v22  ;;  %v480_v27 = vsel %vm479_vm7, %v727_v5, %v476_v20 }
 0x1b3   : > { %v500_v25 = vsel %vm499_vm6, %v729_v8, %v496_v21  ;;  %v504_v26 = vmul.f32 0.5, %v503_v23  ;;  %v511_v33 = vmul.f32 %v480_v27, %v836_v48 }
 0x1b4   : > { %v484_v28 = vmul.f32 0.5, %v483_v24  ;;  %v513_v31 = vmul.f32 %v500_v25, %v834_v47 }
 0x1b5   : > { %v505_v29 = vsub.f32 1.5, %v504_v26  ;;  %v519_v41 = vmul.f32 %v722_v30, %v511_v33 }
 0x1b6   : > { %v485_v32 = vsub.f32 1.5, %v484_v28  ;;  %v521_v38 = vmul.f32 %v722_v30, %v513_v31 }
 0x1b7   : > { %v506_v34 = vmul.f32 %v731_v16, %v505_v29  ;;  %v527_v47 = vadd.f32 %v723_v37, %v519_v41 }
 0x1b8   : > { %v486_v35 = vmul.f32 %v733_v18, %v485_v32  ;;  %v529_v45 = vadd.f32 %v723_v37, %v521_v38 }
 0x1b9   : > { %v510_v36 = vsel %vm509_vm11, %v731_v16, %v506_v34 }
 0x1ba   : > { %v514_v39 = vmul.f32 %v510_v36, %v842_v55  ;;  %v490_v40 = vsel %vm489_vm13, %v733_v18, %v486_v35 }
 0x1bb   : > { %v512_v42 = vmul.f32 %v490_v40, %v844_v56 }
 0x1bc   : > { %v522_v43 = vmul.f32 %v722_v30, %v514_v39 }
 0x1bd   : > { %v520_v44 = vmul.f32 %v722_v30, %v512_v42 }
 0x1be   : > { %v530_v46 = vadd.f32 %v723_v37, %v522_v43 }
 0x1bf   : > { %v528_v48 = vadd.f32 %v723_v37, %v520_v44 }
 0x1c0   : > { %v689_v49 = vpack.c.bf16 %v530_v46, %v529_v45 }
 0x1c1   : > { %v684_v50 = vpack.c.bf16 %v528_v48, %v527_v47 }
 0x1c2   : > { %692 = vst [vmem:[%s881_s6 + $0x8] sm:$0xff] %v689_v49  }
 0x1c3   : > { %685 = vst [vmem:[%s881_s6] sm:$0xff] %v684_v50  }
 0x1c4 PF: > { %s16_s23 = sadd.s32 1, %s756_s23   ;;  %s882_s21 = smov %s752_s22 }
 0x1c5   : > { %p13_p7 = scmp.ge.s32.totalorder %s16_s23, 6   ;;  %s883_s22 = smov %s885_s24 }
 0x1c7   :  { %15 = sbr.rel (!%p13_p7) target bundleno = 2 (0x2), region = 88 }

// kernel: bert_base_uncased_forward.15
= control target key start
LH: loop header
LB: loop body
LE: loop exit
PB: predicated region body
PF: predicated region fallthrough
CT: control target
= control target key end

     0   :  { %s1048_s1 = inlined_call_operand.vmem [shape: bf16[128,512], index: 1, kind: input, shape index: {}]   ;;  %s1049_s0 = inlined_call_operand.vmem [shape: bf16[32,128], index: 0, kind: input, shape index: {}]   ;;  %s1050_s2 = inlined_call_operand.vmem [shape: f32[1,512], index: 2, kind: input, shape index: {}]   ;;  %s1051_s3 = inlined_call_operand.vmem [shape: bf16[32,512], index: 3, kind: output, shape index: {}]  }
   0x1   :  { %v594_v0 = vld [vmem:[%s1048_s1 + $0xe0] sm:$0xf]  ;;  %v640_v1 = vld [vmem:[%s1048_s1 + $0xec] sm:$0xf0]  ;;  %v638_v2 = vld [vmem:[%s1048_s1 + $0xe4] sm:$0xf] }
   0x2   :  { %v595_v3 = vor.u32 %v640_v1, %v594_v0  ;;  %v596_v4 = vld [vmem:[%s1048_s1 + $0xf0] sm:$0xf0]  ;;  %v602_v5 = vld [vmem:[%s1048_s1 + $0xe8] sm:$0xf]  ;;  %v641_v6 = vld [vmem:[%s1048_s1 + $0xf4] sm:$0xf0] }
   0x3   :  { %v599_v7 = vor.u32 %v638_v2, %v596_v4  ;;  %v603_v8 = vor.u32 %v641_v6, %v602_v5  ;;  %v639_v9 = vld [vmem:[%s1048_s1 + $0xec] sm:$0xf]  ;;  %v604_v10 = vld [vmem:[%s1048_s1 + $0xf8] sm:$0xf0]  ;;  %v578_v11 = vld [vmem:[%s1048_s1 + $0xc0] sm:$0xf] }
   0x4   :  { %232 = vmatpush.bf16.msra.mxu0 %v595_v3  ;;  %v607_v12 = vor.u32 %v639_v9, %v604_v10  ;;  %v636_v13 = vld [vmem:[%s1048_s1 + $0xcc] sm:$0xf0]  ;;  %v634_v14 = vld [vmem:[%s1048_s1 + $0xc4] sm:$0xf]  ;;  %v580_v15 = vld [vmem:[%s1048_s1 + $0xd0] sm:$0xf0] }
   0x5   :  { %251 = vmatpush.bf16.msra.mxu1 %v599_v7  ;;  %270 = vmatpush.bf16.msra.mxu2 %v603_v8  ;;  %v579_v16 = vor.u32 %v636_v13, %v578_v11  ;;  %v583_v17 = vor.u32 %v634_v14, %v580_v15  ;;  %v586_v18 = vld [vmem:[%s1048_s1 + $0xc8] sm:$0xf]  ;;  %v637_v19 = vld [vmem:[%s1048_s1 + $0xd4] sm:$0xf0]  ;;  %v635_v20 = vld [vmem:[%s1048_s1 + $0xcc] sm:$0xf] }
   0x6   :  { %289 = vmatpush.bf16.msra.mxu3 %v607_v12  ;;  %v587_v21 = vor.u32 %v637_v19, %v586_v18  ;;  %v588_v22 = vld [vmem:[%s1048_s1 + $0xd8] sm:$0xf0]  ;;  %v562_v23 = vld [vmem:[%s1048_s1 + $0xa0] sm:$0xf]  ;;  %v632_v24 = vld [vmem:[%s1048_s1 + $0xac] sm:$0xf0] }
   0x7   :  { %v591_v25 = vor.u32 %v635_v20, %v588_v22  ;;  %v630_v26 = vld [vmem:[%s1048_s1 + $0xa4] sm:$0xf]  ;;  %v564_v27 = vld [vmem:[%s1048_s1 + $0xb0] sm:$0xf0]  ;;  %v570_v28 = vld [vmem:[%s1048_s1 + $0xa8] sm:$0xf]  ;;  %v563_v29 = vor.u32 %v632_v24, %v562_v23 }
   0x8   :  { %233 = vmatpush.bf16.msra.mxu0 %v579_v16  ;;  %v633_v30 = vld [vmem:[%s1048_s1 + $0xb4] sm:$0xf0]  ;;  %v631_v31 = vld [vmem:[%s1048_s1 + $0xac] sm:$0xf]  ;;  %v572_v32 = vld [vmem:[%s1048_s1 + $0xb8] sm:$0xf0]  ;;  %v567_v33 = vor.u32 %v630_v26, %v564_v27 }
   0x9   :  { %252 = vmatpush.bf16.msra.mxu1 %v583_v17  ;;  %271 = vmatpush.bf16.msra.mxu2 %v587_v21  ;;  %v571_v34 = vor.u32 %v633_v30, %v570_v28  ;;  %v546_v35 = vld [vmem:[%s1048_s1 + $0x80] sm:$0xf]  ;;  %v628_v36 = vld [vmem:[%s1048_s1 + $0x8c] sm:$0xf0]  ;;  %v626_v37 = vld [vmem:[%s1048_s1 + $0x84] sm:$0xf]  ;;  %v575_v38 = vor.u32 %v631_v31, %v572_v32 }
   0xa   :  { %290 = vmatpush.bf16.msra.mxu3 %v591_v25  ;;  %v548_v39 = vld [vmem:[%s1048_s1 + $0x90] sm:$0xf0]  ;;  %v554_v40 = vld [vmem:[%s1048_s1 + $0x88] sm:$0xf]  ;;  %v629_v41 = vld [vmem:[%s1048_s1 + $0x94] sm:$0xf0]  ;;  %v547_v44 = vor.u32 %v628_v36, %v546_v35 }
   0xb   :  { %v627_v42 = vld [vmem:[%s1048_s1 + $0x8c] sm:$0xf]  ;;  %v556_v43 = vld [vmem:[%s1048_s1 + $0x98] sm:$0xf0]  ;;  %v551_v45 = vor.u32 %v626_v37, %v548_v39  ;;  %v555_v46 = vor.u32 %v629_v41, %v554_v40  ;;  %v530_v47 = vld [vmem:[%s1048_s1 + $0x60] sm:$0xf] }
   0xc   :  { %234 = vmatpush.bf16.msra.mxu0 %v563_v29  ;;  %v624_v48 = vld [vmem:[%s1048_s1 + $0x6c] sm:$0xf0]  ;;  %v622_v49 = vld [vmem:[%s1048_s1 + $0x64] sm:$0xf]  ;;  %v559_v50 = vor.u32 %v627_v42, %v556_v43  ;;  %v532_v51 = vld [vmem:[%s1048_s1 + $0x70] sm:$0xf0] }
   0xd   :  { %253 = vmatpush.bf16.msra.mxu1 %v567_v33  ;;  %272 = vmatpush.bf16.msra.mxu2 %v571_v34  ;;  %v538_v52 = vld [vmem:[%s1048_s1 + $0x68] sm:$0xf]  ;;  %v625_v53 = vld [vmem:[%s1048_s1 + $0x74] sm:$0xf0]  ;;  %v623_v54 = vld [vmem:[%s1048_s1 + $0x6c] sm:$0xf]  ;;  %v531_v56 = vor.u32 %v624_v48, %v530_v47  ;;  %v535_v57 = vor.u32 %v622_v49, %v532_v51 }
   0xe   :  { %291 = vmatpush.bf16.msra.mxu3 %v575_v38  ;;  %v540_v55 = vld [vmem:[%s1048_s1 + $0x78] sm:$0xf0]  ;;  %v539_v58 = vor.u32 %v625_v53, %v538_v52  ;;  %v514_v59 = vld [vmem:[%s1048_s1 + $0x40] sm:$0xf]  ;;  %v620_v60 = vld [vmem:[%s1048_s1 + $0x4c] sm:$0xf0] }
   0xf   :  { %v618_v61 = vld [vmem:[%s1048_s1 + $0x44] sm:$0xf]  ;;  %v543_v62 = vor.u32 %v623_v54, %v540_v55  ;;  %v516_v63 = vld [vmem:[%s1048_s1 + $0x50] sm:$0xf0]  ;;  %v522_v0 = vld [vmem:[%s1048_s1 + $0x48] sm:$0xf]  ;;  %v515_v4 = vor.u32 %v620_v60, %v514_v59 }
  0x10   :  { %235 = vmatpush.bf16.msra.mxu0 %v547_v44  ;;  %v621_v1 = vld [vmem:[%s1048_s1 + $0x54] sm:$0xf0]  ;;  %v619_v2 = vld [vmem:[%s1048_s1 + $0x4c] sm:$0xf]  ;;  %v524_v3 = vld [vmem:[%s1048_s1 + $0x58] sm:$0xf0]  ;;  %v519_v5 = vor.u32 %v618_v61, %v516_v63 }
  0x11   :  { %254 = vmatpush.bf16.msra.mxu1 %v551_v45  ;;  %273 = vmatpush.bf16.msra.mxu2 %v555_v46  ;;  %v523_v6 = vor.u32 %v621_v1, %v522_v0  ;;  %v498_v7 = vld [vmem:[%s1048_s1 + $0x20] sm:$0xf]  ;;  %v616_v8 = vld [vmem:[%s1048_s1 + $0x2c] sm:$0xf0]  ;;  %v614_v9 = vld [vmem:[%s1048_s1 + $0x24] sm:$0xf]  ;;  %v527_v10 = vor.u32 %v619_v2, %v524_v3 }
  0x12   :  { %292 = vmatpush.bf16.msra.mxu3 %v559_v50  ;;  %v500_v11 = vld [vmem:[%s1048_s1 + $0x30] sm:$0xf0]  ;;  %v506_v12 = vld [vmem:[%s1048_s1 + $0x28] sm:$0xf]  ;;  %v617_v13 = vld [vmem:[%s1048_s1 + $0x34] sm:$0xf0]  ;;  %v499_v16 = vor.u32 %v616_v8, %v498_v7 }
  0x13   :  { %v615_v14 = vld [vmem:[%s1048_s1 + $0x2c] sm:$0xf]  ;;  %v508_v15 = vld [vmem:[%s1048_s1 + $0x38] sm:$0xf0]  ;;  %v503_v17 = vor.u32 %v614_v9, %v500_v11  ;;  %v507_v18 = vor.u32 %v617_v13, %v506_v12  ;;  %v482_v19 = vld [vmem:[%s1048_s1] sm:$0xf] }
  0x14   :  { %236 = vmatpush.bf16.msra.mxu0 %v531_v56  ;;  %v612_v20 = vld [vmem:[%s1048_s1 + $0xc] sm:$0xf0]  ;;  %v610_v21 = vld [vmem:[%s1048_s1 + $0x4] sm:$0xf]  ;;  %v511_v22 = vor.u32 %v615_v14, %v508_v15  ;;  %v484_v23 = vld [vmem:[%s1048_s1 + $0x10] sm:$0xf0] }
  0x15   :  { %255 = vmatpush.bf16.msra.mxu1 %v535_v57  ;;  %274 = vmatpush.bf16.msra.mxu2 %v539_v58  ;;  %v490_v24 = vld [vmem:[%s1048_s1 + $0x8] sm:$0xf]  ;;  %v613_v25 = vld [vmem:[%s1048_s1 + $0x14] sm:$0xf0]  ;;  %v611_v26 = vld [vmem:[%s1048_s1 + $0xc] sm:$0xf]  ;;  %v483_v28 = vor.u32 %v612_v20, %v482_v19  ;;  %v487_v29 = vor.u32 %v610_v21, %v484_v23 }
  0x16   :  { %293 = vmatpush.bf16.msra.mxu3 %v543_v62  ;;  %v492_v27 = vld [vmem:[%s1048_s1 + $0x18] sm:$0xf0]  ;;  %v491_v30 = vor.u32 %v613_v25, %v490_v24  ;;  %v608_v32 = vld [vmem:[%s1049_s0] sm:$0xff]  ;;  %v609_v33 = vld [vmem:[%s1049_s0 + $0x8] sm:$0xff] }
  0x17   :  { %v495_v31 = vor.u32 %v611_v26, %v492_v27  ;;  %v50_v34 = vld [vmem:[%s1050_s2] sm:$0xf] }
  0x18   :  { %237 = vmatpush.bf16.msra.mxu0 %v515_v4  ;;  %v895_v35 = vperm.slane %v50_v34, 0  ;;  %v897_v36 = vperm.slane %v50_v34, 1  ;;  %v909_v43 = vperm.slane %v50_v34, 2  ;;  %v912_v45 = vperm.slane %v50_v34, 3 }
  0x19   :  { %256 = vmatpush.bf16.msra.mxu1 %v519_v5  ;;  %275 = vmatpush.bf16.msra.mxu2 %v523_v6 }
  0x1a   :  { %294 = vmatpush.bf16.msra.mxu3 %v527_v10 }
  0x1c   :  { %238 = vmatpush.bf16.msra.mxu0 %v499_v16 }
  0x1d   :  { %257 = vmatpush.bf16.msra.mxu1 %v503_v17  ;;  %276 = vmatpush.bf16.msra.mxu2 %v507_v18 }
  0x1e   :  { %295 = vmatpush.bf16.msra.mxu3 %v511_v22 }
  0x20   :  { %239 = vmatpush.bf16.msra.mxu0 %v483_v28 }
  0x21   :  { %258 = vmatpush.bf16.msra.mxu1 %v487_v29  ;;  %277 = vmatpush.bf16.msra.mxu2 %v491_v30 }
  0x22   :  { %296 = vmatpush.bf16.msra.mxu3 %v495_v31 }
  0x23   :  { %240 = vmatmul.bf16.vlgmr.msra.gmra.mxu0 %v608_v32 }
  0x24   :  { %259 = vmatmul.bf16.vlgmr.msra.gmra.mxu1 %v608_v32  ;;  %278 = vmatmul.bf16.vlgmr.msra.gmra.mxu2 %v608_v32 }
  0x25   :  { %297 = vmatmul.bf16.vlgmr.msra.gmra.mxu3 %v608_v32 }
  0x33   :  { %245 = vmatmul.bf16.gmra.mxu0 %v609_v33 }
  0x34   :  { %264 = vmatmul.bf16.gmra.mxu1 %v609_v33  ;;  %283 = vmatmul.bf16.gmra.mxu2 %v609_v33 }
  0x35   :  { %302 = vmatmul.bf16.gmra.mxu3 %v609_v33 }
  0xa0   :  { %v241_v37 = vpop.f32.mrf.mxu0 }
  0xa1   :  { %v900_v38 = vadd.f32 %v241_v37, %v895_v35  ;;  %v260_v39 = vpop.f32.mrf.mxu1 }
  0xa2   :  { %v903_v40 = vadd.f32 %v260_v39, %v897_v36 }
  0xa3   :  { %v308_v41 = vmul.f32 %v900_v38, %v900_v38 }
  0xa4   :  { %v309_v42 = vmul.f32 %v903_v40, %v903_v40 }
  0xa5   :  { %v324_v44 = vmul.f32 %v308_v41, %v900_v38 }
  0xa6   :  { %v325_v46 = vmul.f32 %v309_v42, %v903_v40 }
  0xa7   :  { %v340_v47 = vmul.f32 0.044715, %v324_v44  ;;  %v279_v48 = vpop.f32.mrf.mxu2 }
  0xa8   :  { %v341_v49 = vmul.f32 0.044715, %v325_v46  ;;  %v916_v50 = vadd.f32 %v279_v48, %v909_v43  ;;  %v298_v51 = vpop.f32.mrf.mxu3  ;;  %v243_v52 = vpop.f32.mrf.mxu0 }
  0xa9   :  { %v356_v53 = vadd.f32 %v340_v47, %v900_v38  ;;  %v920_v54 = vadd.f32 %v298_v51, %v912_v45  ;;  %v923_v55 = vadd.f32 %v243_v52, %v895_v35  ;;  %v262_v56 = vpop.f32.mrf.mxu1 }
  0xaa   :  { %v357_v57 = vadd.f32 %v341_v49, %v903_v40  ;;  %v310_v58 = vmul.f32 %v916_v50, %v916_v50  ;;  %v929_v59 = vadd.f32 %v262_v56, %v897_v36 }
  0xab   :  { %v372_v60 = vmul.f32 0.7978846, %v356_v53  ;;  %v311_v61 = vmul.f32 %v920_v54, %v920_v54  ;;  %v312_v62 = vmul.f32 %v923_v55, %v923_v55 }
  0xac   :  { %v373_v63 = vmul.f32 0.7978846, %v357_v57  ;;  %v326_v0 = vmul.f32 %v310_v58, %v916_v50  ;;  %v313_v1 = vmul.f32 %v929_v59, %v929_v59 }
  0xad   :  { %642 = vtanh.f32 %v372_v60  ;;  %v327_v2 = vmul.f32 %v311_v61, %v920_v54  ;;  %v328_v3 = vmul.f32 %v312_v62, %v923_v55 }
  0xae   :  { %644 = vtanh.f32 %v373_v63  ;;  %v342_v4 = vmul.f32 0.044715, %v326_v0  ;;  %v329_v5 = vmul.f32 %v313_v1, %v929_v59 }
  0xaf   :  { %v343_v6 = vmul.f32 0.044715, %v327_v2  ;;  %v344_v7 = vmul.f32 0.044715, %v328_v3  ;;  %v281_v8 = vpop.f32.mrf.mxu2 }
  0xb0   :  { %v358_v9 = vadd.f32 %v342_v4, %v916_v50  ;;  %v345_v10 = vmul.f32 0.044715, %v329_v5  ;;  %v943_v11 = vadd.f32 %v281_v8, %v909_v43  ;;  %v300_v12 = vpop.f32.mrf.mxu3  ;;  %v246_v13 = vpop.f32.mrf.mxu0 }
  0xb1   :  { %v359_v14 = vadd.f32 %v343_v6, %v920_v54  ;;  %v360_v15 = vadd.f32 %v344_v7, %v923_v55  ;;  %v948_v16 = vadd.f32 %v300_v12, %v912_v45  ;;  %v951_v17 = vadd.f32 %v246_v13, %v895_v35  ;;  %v265_v18 = vpop.f32.mrf.mxu1 }
  0xb2   :  { %v374_v19 = vmul.f32 0.7978846, %v358_v9  ;;  %v361_v20 = vadd.f32 %v345_v10, %v929_v59  ;;  %v314_v21 = vmul.f32 %v943_v11, %v943_v11  ;;  %v957_v22 = vadd.f32 %v265_v18, %v897_v36 }
  0xb3   :  { %v643_v23 = vpop.eup %642  ;;  %v375_v24 = vmul.f32 0.7978846, %v359_v14  ;;  %v376_v25 = vmul.f32 0.7978846, %v360_v15  ;;  %v315_v26 = vmul.f32 %v948_v16, %v948_v16  ;;  %v316_v27 = vmul.f32 %v951_v17, %v951_v17 }
  0xb4   :  { %v645_v28 = vpop.eup %644  ;;  %v404_v29 = vadd.f32 1.0, %v643_v23  ;;  %646 = vtanh.f32 %v374_v19  ;;  %v377_v30 = vmul.f32 0.7978846, %v361_v20  ;;  %v330_v31 = vmul.f32 %v314_v21, %v943_v11 }
  0xb5   :  { %v405_v32 = vadd.f32 1.0, %v645_v28  ;;  %648 = vtanh.f32 %v375_v24  ;;  %v331_v33 = vmul.f32 %v315_v26, %v948_v16  ;;  %v332_v34 = vmul.f32 %v316_v27, %v951_v17 }
  0xb6   :  { %v420_v37 = vmul.f32 0.5, %v404_v29  ;;  %650 = vtanh.f32 %v376_v25  ;;  %v346_v39 = vmul.f32 0.044715, %v330_v31  ;;  %v317_v41 = vmul.f32 %v957_v22, %v957_v22 }
  0xb7   :  { %v421_v42 = vmul.f32 0.5, %v405_v32  ;;  %652 = vtanh.f32 %v377_v30  ;;  %v347_v44 = vmul.f32 0.044715, %v331_v33  ;;  %v348_v46 = vmul.f32 0.044715, %v332_v34  ;;  %v284_v47 = vpop.f32.mrf.mxu2 }
  0xb8   :  { %v436_v48 = vmul.f32 %v420_v37, %v900_v38  ;;  %v362_v49 = vadd.f32 %v346_v39, %v943_v11  ;;  %v333_v51 = vmul.f32 %v317_v41, %v957_v22  ;;  %v972_v52 = vadd.f32 %v284_v47, %v909_v43  ;;  %v303_v53 = vpop.f32.mrf.mxu3  ;;  %v248_v56 = vpop.f32.mrf.mxu0 }
  0xb9   :  { %v437_v57 = vmul.f32 %v421_v42, %v903_v40  ;;  %v363_v58 = vadd.f32 %v347_v44, %v948_v16  ;;  %v364_v60 = vadd.f32 %v348_v46, %v951_v17  ;;  %v978_v61 = vadd.f32 %v303_v53, %v912_v45  ;;  %v267_v19 = vpop.f32.mrf.mxu1 }
  0xba   :  { %v647_v62 = vpop.eup %646  ;;  %v378_v38 = vmul.f32 0.7978846, %v362_v49  ;;  %v349_v63 = vmul.f32 0.044715, %v333_v51  ;;  %v318_v0 = vmul.f32 %v972_v52, %v972_v52  ;;  %v983_v1 = vadd.f32 %v248_v56, %v895_v35 }
  0xbb   :  { %v649_v2 = vpop.eup %648  ;;  %v452_v3 = vpack.c.bf16 %v437_v57, %v436_v48  ;;  %v406_v4 = vadd.f32 1.0, %v647_v62  ;;  %v379_v40 = vmul.f32 0.7978846, %v363_v58  ;;  %v380_v5 = vmul.f32 0.7978846, %v364_v60 }
  0xbc   :  { %v651_v6 = vpop.eup %650  ;;  %v407_v7 = vadd.f32 1.0, %v649_v2  ;;  %654 = vtanh.f32 %v378_v38  ;;  %v365_v8 = vadd.f32 %v349_v63, %v957_v22  ;;  %v334_v9 = vmul.f32 %v318_v0, %v972_v52 }
  0xbd   :  { %v653_v10 = vpop.eup %652  ;;  %460 = vst [vmem:[%s1051_s3] sm:$0xff] %v452_v3  ;;  %v422_v12 = vmul.f32 0.5, %v406_v4  ;;  %v408_v35 = vadd.f32 1.0, %v651_v6  ;;  %656 = vtanh.f32 %v379_v40  ;;  %v319_v13 = vmul.f32 %v978_v61, %v978_v61 }
  0xbe   :  { %v423_v14 = vmul.f32 0.5, %v407_v7  ;;  %v409_v15 = vadd.f32 1.0, %v653_v10  ;;  %658 = vtanh.f32 %v380_v5  ;;  %v381_v18 = vmul.f32 0.7978846, %v365_v8 }
  0xbf   :  { %v438_v20 = vmul.f32 %v422_v12, %v916_v50  ;;  %v424_v21 = vmul.f32 0.5, %v408_v35  ;;  %v350_v23 = vmul.f32 0.044715, %v334_v9  ;;  %v335_v24 = vmul.f32 %v319_v13, %v978_v61  ;;  %v286_v25 = vpop.f32.mrf.mxu2 }
  0xc0   :  { %v439_v26 = vmul.f32 %v423_v14, %v920_v54  ;;  %v425_v27 = vmul.f32 0.5, %v409_v15  ;;  %660 = vtanh.f32 %v381_v18  ;;  %v320_v28 = vmul.f32 %v983_v1, %v983_v1  ;;  %v305_v62 = vpop.f32.mrf.mxu3 }
  0xc1   :  { %v440_v29 = vmul.f32 %v424_v21, %v923_v55  ;;  %v366_v30 = vadd.f32 %v350_v23, %v972_v52  ;;  %v351_v31 = vmul.f32 0.044715, %v335_v24  ;;  %v1000_v32 = vadd.f32 %v267_v19, %v897_v36 }
  0xc2   :  { %v655_v50 = vpop.eup %654  ;;  %v453_v33 = vpack.c.bf16 %v439_v26, %v438_v20  ;;  %v441_v34 = vmul.f32 %v425_v27, %v929_v59  ;;  %v336_v37 = vmul.f32 %v320_v28, %v983_v1  ;;  %v1005_v54 = vadd.f32 %v286_v25, %v909_v43 }
  0xc3   :  { %v657_v39 = vpop.eup %656  ;;  %v410_v41 = vadd.f32 1.0, %v655_v50  ;;  %v382_v42 = vmul.f32 0.7978846, %v366_v30  ;;  %v367_v55 = vadd.f32 %v351_v31, %v978_v61  ;;  %v321_v44 = vmul.f32 %v1000_v32, %v1000_v32 }
  0xc4   :  { %v659_v46 = vpop.eup %658  ;;  %461 = vst [vmem:[%s1051_s3 + $0x8] sm:$0xff] %v453_v33  ;;  %v454_v36 = vpack.c.bf16 %v441_v34, %v440_v29  ;;  %v411_v59 = vadd.f32 1.0, %v657_v39  ;;  %v352_v47 = vmul.f32 0.044715, %v336_v37  ;;  %v322_v43 = vmul.f32 %v1005_v54, %v1005_v54 }
  0xc5   :  { %v426_v48 = vmul.f32 0.5, %v410_v41  ;;  %v412_v49 = vadd.f32 1.0, %v659_v46  ;;  %662 = vtanh.f32 %v382_v42  ;;  %v383_v51 = vmul.f32 0.7978846, %v367_v55 }
  0xc6   :  { %v661_v53 = vpop.eup %660  ;;  %462 = vst [vmem:[%s1051_s3 + $0x10] sm:$0xff] %v454_v36  ;;  %v427_v56 = vmul.f32 0.5, %v411_v59  ;;  %v368_v57 = vadd.f32 %v352_v47, %v983_v1  ;;  %v337_v58 = vmul.f32 %v321_v44, %v1000_v32  ;;  %v338_v60 = vmul.f32 %v322_v43, %v1005_v54 }
  0xc7   :  { %v442_v38 = vmul.f32 %v426_v48, %v943_v11  ;;  %v428_v63 = vmul.f32 0.5, %v412_v49  ;;  %v413_v0 = vadd.f32 1.0, %v661_v53  ;;  %664 = vtanh.f32 %v383_v51 }
  0xc8   :  { %v443_v2 = vmul.f32 %v427_v56, %v948_v16  ;;  %v384_v3 = vmul.f32 0.7978846, %v368_v57  ;;  %v353_v4 = vmul.f32 0.044715, %v337_v58  ;;  %v354_v40 = vmul.f32 0.044715, %v338_v60 }
  0xc9   :  { %v444_v5 = vmul.f32 %v428_v63, %v951_v17  ;;  %v429_v6 = vmul.f32 0.5, %v413_v0  ;;  %v306_v7 = vadd.f32 %v305_v62, %v912_v45 }
  0xca   :  { %v455_v8 = vpack.c.bf16 %v443_v2, %v442_v38  ;;  %666 = vtanh.f32 %v384_v3  ;;  %v369_v9 = vadd.f32 %v353_v4, %v1000_v32  ;;  %v370_v10 = vadd.f32 %v354_v40, %v1005_v54 }
  0xcb   :  { %v663_v11 = vpop.eup %662  ;;  %v445_v12 = vmul.f32 %v429_v6, %v957_v22  ;;  %v323_v35 = vmul.f32 %v306_v7, %v306_v7 }
  0xcc   :  { %463 = vst [vmem:[%s1051_s3 + $0x18] sm:$0xff] %v455_v8  ;;  %v414_v16 = vadd.f32 1.0, %v663_v11  ;;  %v385_v13 = vmul.f32 0.7978846, %v369_v9  ;;  %v386_v17 = vmul.f32 0.7978846, %v370_v10 }
  0xcd   :  { %v665_v14 = vpop.eup %664  ;;  %v456_v15 = vpack.c.bf16 %v445_v12, %v444_v5  ;;  %v339_v45 = vmul.f32 %v323_v35, %v306_v7 }
  0xce   :  { %v430_v18 = vmul.f32 0.5, %v414_v16  ;;  %v415_v19 = vadd.f32 1.0, %v665_v14  ;;  %668 = vtanh.f32 %v385_v13 }
  0xcf   :  { %464 = vst [vmem:[%s1051_s3 + $0x20] sm:$0xff] %v456_v15  ;;  %670 = vtanh.f32 %v386_v17  ;;  %v355_v22 = vmul.f32 0.044715, %v339_v45 }
  0xd0   :  { %v667_v20 = vpop.eup %666  ;;  %v446_v21 = vmul.f32 %v430_v18, %v972_v52  ;;  %v431_v23 = vmul.f32 0.5, %v415_v19 }
  0xd1   :  { %v416_v24 = vadd.f32 1.0, %v667_v20  ;;  %v371_v25 = vadd.f32 %v355_v22, %v306_v7 }
  0xd2   :  { %v447_v26 = vmul.f32 %v431_v23, %v978_v61 }
  0xd3   :  { %v432_v27 = vmul.f32 0.5, %v416_v24  ;;  %v387_v28 = vmul.f32 0.7978846, %v371_v25 }
  0xd4   :  { %v669_v29 = vpop.eup %668  ;;  %v457_v30 = vpack.c.bf16 %v447_v26, %v446_v21 }
  0xd5   :  { %v671_v31 = vpop.eup %670  ;;  %v417_v50 = vadd.f32 1.0, %v669_v29  ;;  %672 = vtanh.f32 %v387_v28  ;;  %v448_v34 = vmul.f32 %v432_v27, %v983_v1 }
  0xd6   :  { %465 = vst [vmem:[%s1051_s3 + $0x28] sm:$0xff] %v457_v30  ;;  %v418_v33 = vadd.f32 1.0, %v671_v31 }
  0xd7   :  { %v433_v52 = vmul.f32 0.5, %v417_v50 }
  0xd8   :  { %v434_v39 = vmul.f32 0.5, %v418_v33 }
  0xd9   :  { %v449_v37 = vmul.f32 %v433_v52, %v1000_v32 }
  0xda   :  { %v450_v55 = vmul.f32 %v434_v39, %v1005_v54 }
  0xdb   :  { %v673_v41 = vpop.eup %672  ;;  %v458_v61 = vpack.c.bf16 %v449_v37, %v448_v34 }
  0xdc   :  { %v419_v42 = vadd.f32 1.0, %v673_v41 }
  0xdd   :  { %466 = vst [vmem:[%s1051_s3 + $0x30] sm:$0xff] %v458_v61 }
  0xde   :  { %v435_v44 = vmul.f32 0.5, %v419_v42 }
  0xe0   :  { %v451_v46 = vmul.f32 %v435_v44, %v306_v7 }
  0xe2   :  { %v459_v36 = vpack.c.bf16 %v451_v46, %v450_v55 }
  0xe4   :  { %467 = vst [vmem:[%s1051_s3 + $0x38] sm:$0xff] %v459_v36 }

// kernel: bert_base_uncased_forward.16
= control target key start
LH: loop header
LB: loop body
LE: loop exit
PB: predicated region body
PF: predicated region fallthrough
CT: control target
= control target key end

     0   :  { %s979_s1 = inlined_call_operand.vmem [shape: bf16[512,128], index: 1, kind: input, shape index: {}]   ;;  %s980_s2 = inlined_call_operand.vmem [shape: f32[1,128], index: 2, kind: input, shape index: {}]   ;;  %s981_s0 = inlined_call_operand.vmem [shape: bf16[32,512], index: 0, kind: input, shape index: {}]   ;;  %s982_s3 = inlined_call_operand.vmem [shape: bf16[32,128], index: 3, kind: input, shape index: {}]   ;;  %s983_s4 = inlined_call_operand.vmem [shape: f32[1,128], index: 4, kind: input, shape index: {}]   ;;  %s984_s5 = inlined_call_operand.vmem [shape: f32[1,128], index: 5, kind: input, shape index: {}]   ;;  %s985_s6 = inlined_call_operand.vmem [shape: bf16[32,128], index: 6, kind: output, shape index: {}]  }
   0x1   :  { %v709_v0 = vld [vmem:[%s979_s1 + $0x38] sm:$0xff]  ;;  %v708_v4 = vld [vmem:[%s979_s1 + $0x30] sm:$0xff]  ;;  %v707_v8 = vld [vmem:[%s979_s1 + $0x28] sm:$0xff] }
   0x2   :  { %v717_v1 = vld [vmem:[%s979_s1 + $0x78] sm:$0xff]  ;;  %331 = vmatpush.bf16.msra.mxu0 %v709_v0  ;;  %v716_v5 = vld [vmem:[%s979_s1 + $0x70] sm:$0xff]  ;;  %v715_v9 = vld [vmem:[%s979_s1 + $0x68] sm:$0xff] }
   0x3   :  { %v725_v2 = vld [vmem:[%s979_s1 + $0xb8] sm:$0xff]  ;;  %350 = vmatpush.bf16.msra.mxu1 %v717_v1  ;;  %v724_v6 = vld [vmem:[%s979_s1 + $0xb0] sm:$0xff]  ;;  %v723_v10 = vld [vmem:[%s979_s1 + $0xa8] sm:$0xff] }
   0x4   :  { %v733_v3 = vld [vmem:[%s979_s1 + $0xf8] sm:$0xff]  ;;  %369 = vmatpush.bf16.msra.mxu2 %v725_v2  ;;  %v732_v7 = vld [vmem:[%s979_s1 + $0xf0] sm:$0xff]  ;;  %v731_v11 = vld [vmem:[%s979_s1 + $0xe8] sm:$0xff] }
   0x5   :  { %388 = vmatpush.bf16.msra.mxu3 %v733_v3  ;;  %v706_v12 = vld [vmem:[%s979_s1 + $0x20] sm:$0xff]  ;;  %v705_v16 = vld [vmem:[%s979_s1 + $0x18] sm:$0xff]  ;;  %v704_v20 = vld [vmem:[%s979_s1 + $0x10] sm:$0xff] }
   0x6   :  { %332 = vmatpush.bf16.msra.mxu0 %v708_v4  ;;  %v714_v13 = vld [vmem:[%s979_s1 + $0x60] sm:$0xff]  ;;  %v713_v17 = vld [vmem:[%s979_s1 + $0x58] sm:$0xff]  ;;  %v712_v21 = vld [vmem:[%s979_s1 + $0x50] sm:$0xff] }
   0x7   :  { %351 = vmatpush.bf16.msra.mxu1 %v716_v5  ;;  %v722_v14 = vld [vmem:[%s979_s1 + $0xa0] sm:$0xff]  ;;  %v721_v18 = vld [vmem:[%s979_s1 + $0x98] sm:$0xff]  ;;  %v720_v22 = vld [vmem:[%s979_s1 + $0x90] sm:$0xff] }
   0x8   :  { %370 = vmatpush.bf16.msra.mxu2 %v724_v6  ;;  %v730_v15 = vld [vmem:[%s979_s1 + $0xe0] sm:$0xff]  ;;  %v729_v19 = vld [vmem:[%s979_s1 + $0xd8] sm:$0xff]  ;;  %v728_v23 = vld [vmem:[%s979_s1 + $0xd0] sm:$0xff] }
   0x9   :  { %389 = vmatpush.bf16.msra.mxu3 %v732_v7  ;;  %v703_v24 = vld [vmem:[%s979_s1 + $0x8] sm:$0xff]  ;;  %v702_v28 = vld [vmem:[%s979_s1] sm:$0xff]  ;;  %v696_v33 = vld [vmem:[%s981_s0 + $0xc] sm:$0xf0] }
   0xa   :  { %333 = vmatpush.bf16.msra.mxu0 %v707_v8  ;;  %v711_v25 = vld [vmem:[%s979_s1 + $0x48] sm:$0xff]  ;;  %v710_v29 = vld [vmem:[%s979_s1 + $0x40] sm:$0xff]  ;;  %v538_v35 = vld [vmem:[%s981_s0 + $0x10] sm:$0xf0] }
   0xb   :  { %352 = vmatpush.bf16.msra.mxu1 %v715_v9  ;;  %v719_v26 = vld [vmem:[%s979_s1 + $0x88] sm:$0xff]  ;;  %v718_v30 = vld [vmem:[%s979_s1 + $0x80] sm:$0xff]  ;;  %v697_v37 = vld [vmem:[%s981_s0 + $0x14] sm:$0xf0] }
   0xc   :  { %371 = vmatpush.bf16.msra.mxu2 %v723_v10  ;;  %v727_v27 = vld [vmem:[%s979_s1 + $0xc8] sm:$0xff]  ;;  %v726_v31 = vld [vmem:[%s979_s1 + $0xc0] sm:$0xff]  ;;  %v546_v39 = vld [vmem:[%s981_s0 + $0x18] sm:$0xf0] }
   0xd   :  { %390 = vmatpush.bf16.msra.mxu3 %v731_v11  ;;  %v536_v32 = vld [vmem:[%s981_s0] sm:$0xf]  ;;  %v694_v34 = vld [vmem:[%s981_s0 + $0x4] sm:$0xf]  ;;  %v544_v36 = vld [vmem:[%s981_s0 + $0x8] sm:$0xf] }
   0xe   :  { %334 = vmatpush.bf16.msra.mxu0 %v706_v12  ;;  %v695_v38 = vld [vmem:[%s981_s0 + $0xc] sm:$0xf]  ;;  %v537_v40 = vor.u32 %v696_v33, %v536_v32  ;;  %v541_v41 = vor.u32 %v694_v34, %v538_v35  ;;  %v545_v42 = vor.u32 %v697_v37, %v544_v36  ;;  %v552_v44 = vld [vmem:[%s981_s0 + $0x20] sm:$0xf]  ;;  %v700_v45 = vld [vmem:[%s981_s0 + $0x2c] sm:$0xf0] }
   0xf   :  { %353 = vmatpush.bf16.msra.mxu1 %v714_v13  ;;  %v549_v43 = vor.u32 %v695_v38, %v546_v39  ;;  %v698_v46 = vld [vmem:[%s981_s0 + $0x24] sm:$0xf]  ;;  %v554_v47 = vld [vmem:[%s981_s0 + $0x30] sm:$0xf0]  ;;  %v560_v48 = vld [vmem:[%s981_s0 + $0x28] sm:$0xf]  ;;  %v553_v52 = vor.u32 %v700_v45, %v552_v44 }
  0x10   :  { %372 = vmatpush.bf16.msra.mxu2 %v722_v14  ;;  %v701_v49 = vld [vmem:[%s981_s0 + $0x34] sm:$0xf0]  ;;  %v699_v50 = vld [vmem:[%s981_s0 + $0x2c] sm:$0xf]  ;;  %v562_v51 = vld [vmem:[%s981_s0 + $0x38] sm:$0xf0]  ;;  %v557_v53 = vor.u32 %v698_v46, %v554_v47 }
  0x11   :  { %391 = vmatpush.bf16.msra.mxu3 %v730_v15  ;;  %v561_v54 = vor.u32 %v701_v49, %v560_v48  ;;  %v565_v55 = vor.u32 %v699_v50, %v562_v51  ;;  %v755_v56 = vld [vmem:[%s980_s2] ss:$0 sm:$0xff]  ;;  %v768_v35 = vmov 128.0  }
  0x12   :  { %335 = vmatpush.bf16.msra.mxu0 %v705_v16  ;;  %v735_v61 = vld [vmem:[%s982_s3] sm:$0xff]   ;;  %758 = vrcp.f32 %v768_v35 }
  0x13   :  { %354 = vmatpush.bf16.msra.mxu1 %v713_v17  ;;  %v736_v2 = vunpack.c.l.bf16 %v735_v61  ;;  %v737_v12 = vunpack.c.h.bf16 %v735_v61 }
  0x14   :  { %373 = vmatpush.bf16.msra.mxu2 %v721_v18  ;;  %v752_v18 = vld [vmem:[%s982_s3 + $0x8] sm:$0xff]  }
  0x15   :  { %392 = vmatpush.bf16.msra.mxu3 %v729_v19 }
  0x16   :  { %336 = vmatpush.bf16.msra.mxu0 %v704_v20 }
  0x17   :  { %355 = vmatpush.bf16.msra.mxu1 %v712_v21 }
  0x18   :  { %374 = vmatpush.bf16.msra.mxu2 %v720_v22  ;;  %v759_v36 = vpop.eup %758 }
  0x19   :  { %393 = vmatpush.bf16.msra.mxu3 %v728_v23  ;;  %v740_v23 = vunpack.c.l.bf16 %v752_v18  ;;  %v428_v37 = vmul.f32 128.0, %v759_v36  ;;  %vm432_vm0 = vweird.f32 %v759_v36 }
  0x1a   :  { %337 = vmatpush.bf16.msra.mxu0 %v703_v24 }
  0x1b   :  { %356 = vmatpush.bf16.msra.mxu1 %v711_v25  ;;  %v429_v38 = vsub.f32 1.0, %v428_v37 }
  0x1c   :  { %375 = vmatpush.bf16.msra.mxu2 %v719_v26 }
  0x1d   :  { %394 = vmatpush.bf16.msra.mxu3 %v727_v27  ;;  %v430_v39 = vmul.f32 %v759_v36, %v429_v38 }
  0x1e   :  { %338 = vmatpush.bf16.msra.mxu0 %v702_v28 }
  0x1f   :  { %357 = vmatpush.bf16.msra.mxu1 %v710_v29 }
  0x20   :  { %376 = vmatpush.bf16.msra.mxu2 %v718_v30 }
  0x21   :  { %395 = vmatpush.bf16.msra.mxu3 %v726_v31  ;;  %339 = vmatmul.bf16.vlgmr.msra.gmra.mxu0 %v537_v40  ;;  %v741_v31 = vunpack.c.h.bf16 %v752_v18  ;;  %v431_v40 = vadd.f32 %v759_v36, %v430_v39  ;;  %v756_v18 = vld [vmem:[%s983_s4] ss:$0 sm:$0xff] }
  0x22   :  { %358 = vmatmul.bf16.vlgmr.msra.gmra.mxu1 %v541_v41 }
  0x23   :  { %377 = vmatmul.bf16.vlgmr.msra.gmra.mxu2 %v545_v42  ;;  %v433_v41 = vsel %vm432_vm0, %v759_v36, %v431_v40 }
  0x24   :  { %396 = vmatmul.bf16.vlgmr.msra.gmra.mxu3 %v549_v43 }
  0x31   :  { %344 = vmatmul.bf16.gmra.mxu0 %v553_v52 }
  0x32   :  { %363 = vmatmul.bf16.gmra.mxu1 %v557_v53 }
  0x33   :  { %382 = vmatmul.bf16.gmra.mxu2 %v561_v54 }
  0x34   :  { %401 = vmatmul.bf16.gmra.mxu3 %v565_v55 }
  0x9e   :  { %v340_v57 = vpop.f32.mrf.mxu0 }
  0x9f   :  { %v359_v58 = vpop.f32.mrf.mxu1  ;;  %v341_v59 = vadd.f32 %v755_v56, %v340_v57 }
  0xa1   :  { %v360_v60 = vadd.f32 %v359_v58, %v341_v59 }
  0xa6   :  { %v378_v62 = vpop.f32.mrf.mxu2  ;;  %v342_v1 = vpop.f32.mrf.mxu0 }
  0xa7   :  { %v397_v63 = vpop.f32.mrf.mxu3  ;;  %v379_v0 = vadd.f32 %v378_v62, %v360_v60  ;;  %v361_v3 = vpop.f32.mrf.mxu1  ;;  %v343_v5 = vadd.f32 %v755_v56, %v342_v1 }
  0xa9   :  { %v398_v4 = vadd.f32 %v397_v63, %v379_v0  ;;  %v362_v7 = vadd.f32 %v361_v3, %v343_v5 }
  0xab   :  { %v415_v6 = vadd.f32 %v736_v2, %v398_v4 }
  0xad   :  { %419 = vadd.xlane.f32.xlu0 %v415_v6 }
  0xae   :  { %v380_v8 = vpop.f32.mrf.mxu2  ;;  %v345_v11 = vpop.f32.mrf.mxu0 }
  0xaf   :  { %v399_v9 = vpop.f32.mrf.mxu3  ;;  %v381_v10 = vadd.f32 %v380_v8, %v362_v7  ;;  %v346_v13 = vadd.f32 %v755_v56, %v345_v11  ;;  %v364_v15 = vpop.f32.mrf.mxu1 }
  0xb1   :  { %v400_v14 = vadd.f32 %v399_v9, %v381_v10  ;;  %v365_v16 = vadd.f32 %v364_v15, %v346_v13 }
  0xb3   :  { %v416_v17 = vadd.f32 %v737_v12, %v400_v14 }
  0xb5   :  { %421 = vadd.xlane.f32.xlu0 %v416_v17 }
  0xb6   :  { %v383_v19 = vpop.f32.mrf.mxu2  ;;  %v347_v22 = vpop.f32.mrf.mxu0 }
  0xb7   :  { %v402_v20 = vpop.f32.mrf.mxu3  ;;  %v384_v21 = vadd.f32 %v383_v19, %v365_v16  ;;  %v348_v25 = vadd.f32 %v755_v56, %v347_v22  ;;  %v366_v27 = vpop.f32.mrf.mxu1 }
  0xb9   :  { %v403_v24 = vadd.f32 %v402_v20, %v384_v21  ;;  %v367_v28 = vadd.f32 %v366_v27, %v348_v25  ;;  %v757_v25 = vld [vmem:[%s984_s5] ss:$0 sm:$0xff] }
  0xbb   :  { %v417_v26 = vadd.f32 %v740_v23, %v403_v24 }
  0xbd   :  { %423 = vadd.xlane.f32.xlu1 %v417_v26 }
  0xbe   :  { %v385_v29 = vpop.f32.mrf.mxu2 }
  0xbf   :  { %v386_v30 = vadd.f32 %v385_v29, %v367_v28  ;;  %v404_v32 = vpop.f32.mrf.mxu3 }
  0xc1   :  { %v405_v33 = vadd.f32 %v404_v32, %v386_v30 }
  0xc3   :  { %v418_v34 = vadd.f32 %v741_v31, %v405_v33 }
  0xc5   :  { %425 = vadd.xlane.f32.xlu1 %v418_v34 }
 0x120   :  { %v420_v42 = vpop.xlane.xlu0 %419 }
 0x121   :  { %v434_v43 = vmul.f32 %v433_v41, %v420_v42 }
 0x123   :  { %v438_v44 = vsub.f32 %v415_v6, %v434_v43 }
 0x125   :  { %v442_v45 = vmul.f32 %v438_v44, %v438_v44 }
 0x127   :  { %446 = vadd.xlane.f32.xlu2 %v442_v45 }
 0x128   :  { %v422_v46 = vpop.xlane.xlu0 %421 }
 0x129   :  { %v435_v47 = vmul.f32 %v433_v41, %v422_v46 }
 0x12b   :  { %v439_v48 = vsub.f32 %v416_v17, %v435_v47 }
 0x12d   :  { %v443_v49 = vmul.f32 %v439_v48, %v439_v48 }
 0x12f   :  { %448 = vadd.xlane.f32.xlu2 %v443_v49 }
 0x130   :  { %v424_v50 = vpop.xlane.xlu1 %423 }
 0x131   :  { %v436_v51 = vmul.f32 %v433_v41, %v424_v50 }
 0x133   :  { %v957_v52 = vsub.f32 %v417_v26, %v436_v51 }
 0x135   :  { %v444_v53 = vmul.f32 %v957_v52, %v957_v52 }
 0x137   :  { %450 = vadd.xlane.f32.xlu0 %v444_v53 }
 0x138   :  { %v426_v54 = vpop.xlane.xlu1 %425 }
 0x139   :  { %v437_v55 = vmul.f32 %v433_v41, %v426_v54 }
 0x13b   :  { %v961_v56 = vsub.f32 %v418_v34, %v437_v55 }
 0x13d   :  { %v445_v57 = vmul.f32 %v961_v56, %v961_v56 }
 0x13f   :  { %452 = vadd.xlane.f32.xlu1 %v445_v57 }
 0x19a   :  { %v447_v58 = vpop.xlane.xlu2 %446 }
 0x19b   :  { %v454_v59 = vmul.f32 %v447_v58, %v433_v41 }
 0x19d   :  { %v458_v60 = vadd.f32 1e-12, %v454_v59 }
 0x19f   :  { %760 = vrsqrt.f32 %v458_v60  ;;  %vm468_vm2 = vweird.f32 %v458_v60 }
 0x1a2   :  { %v449_v61 = vpop.xlane.xlu2 %448 }
 0x1a3   :  { %v455_v62 = vmul.f32 %v449_v61, %v433_v41 }
 0x1a5   :  { %v761_v63 = vpop.eup %760  ;;  %v459_v0 = vadd.f32 1e-12, %v455_v62 }
 0x1a6   :  { %v463_v1 = vmul.f32 %v761_v63, %v458_v60  ;;  %vm469_vm1 = vweird.f32 %v761_v63 }
 0x1a7   :  { %762 = vrsqrt.f32 %v459_v0  ;;  %vm470_vm3 = vmor %vm468_vm2, %vm469_vm1  ;;  %vm478_vm5 = vweird.f32 %v459_v0 }
 0x1a8   :  { %v464_v2 = vmul.f32 %v761_v63, %v463_v1 }
 0x1aa   :  { %v465_v3 = vmul.f32 0.5, %v464_v2  ;;  %v451_v4 = vpop.xlane.xlu0 %450 }
 0x1ab   :  { %v456_v5 = vmul.f32 %v451_v4, %v433_v41 }
 0x1ac   :  { %v466_v6 = vsub.f32 1.5, %v465_v3 }
 0x1ad   :  { %v763_v7 = vpop.eup %762  ;;  %v460_v8 = vadd.f32 1e-12, %v456_v5 }
 0x1ae   :  { %v467_v9 = vmul.f32 %v761_v63, %v466_v6  ;;  %v473_v10 = vmul.f32 %v763_v7, %v459_v0  ;;  %vm479_vm4 = vweird.f32 %v763_v7 }
 0x1af   :  { %764 = vrsqrt.f32 %v460_v8  ;;  %vm480_vm6 = vmor %vm478_vm5, %vm479_vm4  ;;  %vm488_vm8 = vweird.f32 %v460_v8 }
 0x1b0   :  { %v474_v11 = vmul.f32 %v763_v7, %v473_v10  ;;  %v471_v12 = vsel %vm470_vm3, %v761_v63, %v467_v9 }
 0x1b1   :  { %v502_v19 = vmul.f32 %v471_v12, %v438_v44 }
 0x1b2   :  { %v475_v13 = vmul.f32 0.5, %v474_v11  ;;  %v453_v14 = vpop.xlane.xlu1 %452 }
 0x1b3   :  { %v457_v15 = vmul.f32 %v453_v14, %v433_v41  ;;  %v510_v26 = vmul.f32 %v756_v18, %v502_v19 }
 0x1b4   :  { %v476_v16 = vsub.f32 1.5, %v475_v13 }
 0x1b5   :  { %v765_v17 = vpop.eup %764  ;;  %v461_v20 = vadd.f32 1e-12, %v457_v15  ;;  %v518_v32 = vadd.f32 %v757_v25, %v510_v26 }
 0x1b6   :  { %v477_v21 = vmul.f32 %v763_v7, %v476_v16  ;;  %v483_v22 = vmul.f32 %v765_v17, %v460_v8  ;;  %vm489_vm7 = vweird.f32 %v765_v17 }
 0x1b7   :  { %766 = vrsqrt.f32 %v461_v20  ;;  %vm490_vm9 = vmor %vm488_vm8, %vm489_vm7  ;;  %vm498_vm11 = vweird.f32 %v461_v20 }
 0x1b8   :  { %v481_v23 = vsel %vm480_vm6, %v763_v7, %v477_v21  ;;  %v484_v24 = vmul.f32 %v765_v17, %v483_v22 }
 0x1b9   :  { %v503_v27 = vmul.f32 %v481_v23, %v439_v48 }
 0x1ba   :  { %v485_v28 = vmul.f32 0.5, %v484_v24 }
 0x1bb   :  { %v511_v29 = vmul.f32 %v756_v18, %v503_v27 }
 0x1bc   :  { %v486_v30 = vsub.f32 1.5, %v485_v28 }
 0x1bd   :  { %v767_v31 = vpop.eup %766  ;;  %v519_v33 = vadd.f32 %v757_v25, %v511_v29 }
 0x1be   :  { %v487_v34 = vmul.f32 %v765_v17, %v486_v30  ;;  %v493_v35 = vmul.f32 %v767_v31, %v461_v20  ;;  %vm499_vm10 = vweird.f32 %v767_v31 }
 0x1bf   :  { %v745_v36 = vpack.c.bf16 %v519_v33, %v518_v32  ;;  %vm500_vm12 = vmor %vm498_vm11, %vm499_vm10 }
 0x1c0   :  { %v494_v37 = vmul.f32 %v767_v31, %v493_v35  ;;  %v491_v38 = vsel %vm490_vm9, %v765_v17, %v487_v34 }
 0x1c1   :  { %746 = vst [vmem:[%s985_s6] sm:$0xff] %v745_v36   ;;  %v504_v41 = vmul.f32 %v491_v38, %v957_v52 }
 0x1c2   :  { %v495_v39 = vmul.f32 0.5, %v494_v37 }
 0x1c3   :  { %v512_v44 = vmul.f32 %v756_v18, %v504_v41 }
 0x1c4   :  { %v496_v40 = vsub.f32 1.5, %v495_v39 }
 0x1c5   :  { %v520_v47 = vadd.f32 %v757_v25, %v512_v44 }
 0x1c6   :  { %v497_v42 = vmul.f32 %v767_v31, %v496_v40 }
 0x1c8   :  { %v501_v43 = vsel %vm500_vm12, %v767_v31, %v497_v42 }
 0x1c9   :  { %v505_v45 = vmul.f32 %v501_v43, %v961_v56 }
 0x1cb   :  { %v513_v46 = vmul.f32 %v756_v18, %v505_v45 }
 0x1cd   :  { %v521_v48 = vadd.f32 %v757_v25, %v513_v46 }
 0x1cf   :  { %v750_v49 = vpack.c.bf16 %v521_v48, %v520_v47 }
 0x1d1   :  { %753 = vst [vmem:[%s985_s6 + $0x8] sm:$0xff] %v750_v49  }

// kernel: bert_base_uncased_forward.21
= control target key start
LH: loop header
LB: loop body
LE: loop exit
PB: predicated region body
PF: predicated region fallthrough
CT: control target
= control target key end

     0   :  { %s1261_s0 = inlined_call_operand.vmem [shape: bf16[32,512], index: 0, kind: input, shape index: {}]   ;;  %s1262_s1 = inlined_call_operand.vmem [shape: bf16[512,128], index: 1, kind: input, shape index: {}]   ;;  %s1263_s2 = inlined_call_operand.vmem [shape: f32[1,128], index: 2, kind: input, shape index: {}]   ;;  %s1264_s3 = inlined_call_operand.vmem [shape: bf16[32,128], index: 3, kind: input, shape index: {}]   ;;  %s1265_s4 = inlined_call_operand.vmem [shape: f32[1,128], index: 4, kind: input, shape index: {}]   ;;  %s1266_s5 = inlined_call_operand.vmem [shape: f32[1,128], index: 5, kind: input, shape index: {}]   ;;  %s1267_s6 = inlined_call_operand.vmem [shape: bf16[128,128], index: 6, kind: input, shape index: {}]   ;;  %s1268_s7 = inlined_call_operand.vmem [shape: f32[1,128], index: 7, kind: input, shape index: {}]   ;;  %s1269_s8 = inlined_call_operand.hbm [shape: bf16[32,128], index: 8, kind: output, shape index: {0}]   ;;  %s1270_s9 = inlined_call_operand.vmem [shape: f32[32,128], index: 9, kind: output, shape index: {1}]  }
   0x1   :  { %v871_v0 = vld [vmem:[%s1262_s1 + $0x38] sm:$0xff]  ;;  %v870_v4 = vld [vmem:[%s1262_s1 + $0x30] sm:$0xff]  ;;  %v869_v8 = vld [vmem:[%s1262_s1 + $0x28] sm:$0xff] }
   0x2   :  { %v879_v1 = vld [vmem:[%s1262_s1 + $0x78] sm:$0xff]  ;;  %340 = vmatpush.bf16.msra.mxu0 %v871_v0  ;;  %v878_v5 = vld [vmem:[%s1262_s1 + $0x70] sm:$0xff]  ;;  %v877_v9 = vld [vmem:[%s1262_s1 + $0x68] sm:$0xff] }
   0x3   :  { %v887_v2 = vld [vmem:[%s1262_s1 + $0xb8] sm:$0xff]  ;;  %359 = vmatpush.bf16.msra.mxu1 %v879_v1  ;;  %v886_v6 = vld [vmem:[%s1262_s1 + $0xb0] sm:$0xff]  ;;  %v885_v10 = vld [vmem:[%s1262_s1 + $0xa8] sm:$0xff] }
   0x4   :  { %v895_v3 = vld [vmem:[%s1262_s1 + $0xf8] sm:$0xff]  ;;  %378 = vmatpush.bf16.msra.mxu2 %v887_v2  ;;  %v894_v7 = vld [vmem:[%s1262_s1 + $0xf0] sm:$0xff]  ;;  %v893_v11 = vld [vmem:[%s1262_s1 + $0xe8] sm:$0xff] }
   0x5   :  { %397 = vmatpush.bf16.msra.mxu3 %v895_v3  ;;  %v868_v12 = vld [vmem:[%s1262_s1 + $0x20] sm:$0xff]  ;;  %v867_v16 = vld [vmem:[%s1262_s1 + $0x18] sm:$0xff] }
   0x6   :  { %341 = vmatpush.bf16.msra.mxu0 %v870_v4  ;;  %v876_v13 = vld [vmem:[%s1262_s1 + $0x60] sm:$0xff]  ;;  %v875_v17 = vld [vmem:[%s1262_s1 + $0x58] sm:$0xff] }
   0x7   :  { %360 = vmatpush.bf16.msra.mxu1 %v878_v5  ;;  %v884_v14 = vld [vmem:[%s1262_s1 + $0xa0] sm:$0xff]  ;;  %v883_v18 = vld [vmem:[%s1262_s1 + $0x98] sm:$0xff] }
   0x8   :  { %379 = vmatpush.bf16.msra.mxu2 %v886_v6  ;;  %v892_v15 = vld [vmem:[%s1262_s1 + $0xe0] sm:$0xff]  ;;  %v891_v19 = vld [vmem:[%s1262_s1 + $0xd8] sm:$0xff] }
   0x9   :  { %398 = vmatpush.bf16.msra.mxu3 %v894_v7 }
   0xa   :  { %342 = vmatpush.bf16.msra.mxu0 %v869_v8 }
   0xb   :  { %361 = vmatpush.bf16.msra.mxu1 %v877_v9 }
   0xc   :  { %380 = vmatpush.bf16.msra.mxu2 %v885_v10 }
   0xd   :  { %399 = vmatpush.bf16.msra.mxu3 %v893_v11 }
   0xe   :  { %343 = vmatpush.bf16.msra.mxu0 %v868_v12 }
   0xf   :  { %362 = vmatpush.bf16.msra.mxu1 %v876_v13 }
  0x10   :  { %381 = vmatpush.bf16.msra.mxu2 %v884_v14 }
  0x11   :  { %400 = vmatpush.bf16.msra.mxu3 %v892_v15 }
  0x12   :  { %15 = vsyncpa [#allocation3], 0  ;;  %344 = vmatpush.bf16.msra.mxu0 %v867_v16  ;;  %v866_v20 = vld [vmem:[%s1262_s1 + $0x10] sm:$0xff]  ;;  %v865_v24 = vld [vmem:[%s1262_s1 + $0x8] sm:$0xff]  ;;  %s648_s21 = sshll.u32 %s1269_s8, 4  ;;  %s978_s22 = smov 64   ;;  %s649_s21 = int_to_ptr.hbm [resolvable:$true] %s648_s21 }
  0x13   :  { %363 = vmatpush.bf16.msra.mxu1 %v875_v17  ;;  %v874_v21 = vld [vmem:[%s1262_s1 + $0x50] sm:$0xff]  ;;  %v873_v25 = vld [vmem:[%s1262_s1 + $0x48] sm:$0xff]  ;;  %v864_v28 = vld [vmem:[%s1262_s1] sm:$0xff] }
  0x14   :  { %382 = vmatpush.bf16.msra.mxu2 %v883_v18  ;;  %v882_v22 = vld [vmem:[%s1262_s1 + $0x90] sm:$0xff]  ;;  %v881_v26 = vld [vmem:[%s1262_s1 + $0x88] sm:$0xff]  ;;  %v872_v29 = vld [vmem:[%s1262_s1 + $0x40] sm:$0xff] }
  0x15   :  { %401 = vmatpush.bf16.msra.mxu3 %v891_v19  ;;  %v890_v23 = vld [vmem:[%s1262_s1 + $0xd0] sm:$0xff]  ;;  %v889_v27 = vld [vmem:[%s1262_s1 + $0xc8] sm:$0xff]  ;;  %v880_v30 = vld [vmem:[%s1262_s1 + $0x80] sm:$0xff] }
  0x16   :  { %345 = vmatpush.bf16.msra.mxu0 %v866_v20  ;;  %v888_v31 = vld [vmem:[%s1262_s1 + $0xc0] sm:$0xff]  ;;  %v858_v33 = vld [vmem:[%s1261_s0 + $0xc] sm:$0xf0]  ;;  %v668_v35 = vld [vmem:[%s1261_s0 + $0x10] sm:$0xf0] }
  0x17   :  { %364 = vmatpush.bf16.msra.mxu1 %v874_v21  ;;  %v666_v32 = vld [vmem:[%s1261_s0] sm:$0xf]  ;;  %v856_v34 = vld [vmem:[%s1261_s0 + $0x4] sm:$0xf]  ;;  %v674_v36 = vld [vmem:[%s1261_s0 + $0x8] sm:$0xf] }
  0x18   :  { %383 = vmatpush.bf16.msra.mxu2 %v882_v22  ;;  %v859_v37 = vld [vmem:[%s1261_s0 + $0x14] sm:$0xf0]  ;;  %v857_v38 = vld [vmem:[%s1261_s0 + $0xc] sm:$0xf]  ;;  %v676_v39 = vld [vmem:[%s1261_s0 + $0x18] sm:$0xf0]  ;;  %v667_v40 = vor.u32 %v858_v33, %v666_v32  ;;  %v671_v41 = vor.u32 %v856_v34, %v668_v35 }
  0x19   :  { %402 = vmatpush.bf16.msra.mxu3 %v890_v23  ;;  %v675_v42 = vor.u32 %v859_v37, %v674_v36  ;;  %v679_v43 = vor.u32 %v857_v38, %v676_v39  ;;  %v682_v44 = vld [vmem:[%s1261_s0 + $0x20] sm:$0xf]  ;;  %v862_v45 = vld [vmem:[%s1261_s0 + $0x2c] sm:$0xf0]  ;;  %v860_v46 = vld [vmem:[%s1261_s0 + $0x24] sm:$0xf] }
  0x1a   :  { %346 = vmatpush.bf16.msra.mxu0 %v865_v24  ;;  %v684_v47 = vld [vmem:[%s1261_s0 + $0x30] sm:$0xf0]  ;;  %v690_v48 = vld [vmem:[%s1261_s0 + $0x28] sm:$0xf]  ;;  %v863_v49 = vld [vmem:[%s1261_s0 + $0x34] sm:$0xf0]  ;;  %v683_v52 = vor.u32 %v862_v45, %v682_v44 }
  0x1b   :  { %365 = vmatpush.bf16.msra.mxu1 %v873_v25  ;;  %v861_v50 = vld [vmem:[%s1261_s0 + $0x2c] sm:$0xf]  ;;  %v692_v51 = vld [vmem:[%s1261_s0 + $0x38] sm:$0xf0]  ;;  %v687_v53 = vor.u32 %v860_v46, %v684_v47  ;;  %v691_v54 = vor.u32 %v863_v49, %v690_v48  ;;  %v936_v56 = vld [vmem:[%s1263_s2] ss:$0 sm:$0xff] }
  0x1c   :  { %384 = vmatpush.bf16.msra.mxu2 %v881_v26  ;;  %v695_v55 = vor.u32 %v861_v50, %v692_v51  ;;  %v905_v61 = vld [vmem:[%s1264_s3] sm:$0xff]   ;;  %v922_v18 = vld [vmem:[%s1264_s3 + $0x8] sm:$0xff]   ;;  %v976_v35 = vmov 128.0   ;;  %s979_s0 = smov 4  }
  0x1d   :  { %403 = vmatpush.bf16.msra.mxu3 %v889_v27  ;;  %v906_v2 = vunpack.c.l.bf16 %v905_v61  ;;  %v907_v12 = vunpack.c.h.bf16 %v905_v61  ;;  %v910_v23 = vunpack.c.l.bf16 %v922_v18  ;;  %940 = vrcp.f32 %v976_v35  ;;  %v900_v61 = vld [vmem:[%s1267_s6 + $0x20] sm:$0xff] }
  0x1e   :  { %347 = vmatpush.bf16.msra.mxu0 %v864_v28 }
  0x1f   :  { %366 = vmatpush.bf16.msra.mxu1 %v872_v29 }
  0x20   :  { %385 = vmatpush.bf16.msra.mxu2 %v880_v30 }
  0x21   :  { %404 = vmatpush.bf16.msra.mxu3 %v888_v31  ;;  %348 = vmatmul.bf16.vlgmr.msra.gmra.mxu0 %v667_v40  ;;  %v911_v31 = vunpack.c.h.bf16 %v922_v18 }
  0x22   :  { %367 = vmatmul.bf16.vlgmr.msra.gmra.mxu1 %v671_v41 }
  0x23   :  { %386 = vmatmul.bf16.vlgmr.msra.gmra.mxu2 %v675_v42  ;;  %v941_v36 = vpop.eup %940 }
  0x24   :  { %405 = vmatmul.bf16.vlgmr.msra.gmra.mxu3 %v679_v43  ;;  %v437_v37 = vmul.f32 128.0, %v941_v36  ;;  %vm441_vm0 = vweird.f32 %v941_v36 }
  0x26   :  { %v438_v38 = vsub.f32 1.0, %v437_v37 }
  0x28   :  { %v439_v39 = vmul.f32 %v941_v36, %v438_v38 }
  0x2a   :  { %v440_v40 = vadd.f32 %v941_v36, %v439_v39 }
  0x2c   :  { %v1183_v41 = vsel %vm441_vm0, %v941_v36, %v440_v40 }
  0x31   :  { %353 = vmatmul.bf16.gmra.mxu0 %v683_v52 }
  0x32   :  { %372 = vmatmul.bf16.gmra.mxu1 %v687_v53 }
  0x33   :  { %391 = vmatmul.bf16.gmra.mxu2 %v691_v54 }
  0x34   :  { %410 = vmatmul.bf16.gmra.mxu3 %v695_v55 }
  0x9e   :  { %v349_v57 = vpop.f32.mrf.mxu0 }
  0x9f   :  { %v368_v58 = vpop.f32.mrf.mxu1  ;;  %v350_v59 = vadd.f32 %v936_v56, %v349_v57 }
  0xa1   :  { %v369_v60 = vadd.f32 %v368_v58, %v350_v59  ;;  %v903_v58 = vld [vmem:[%s1267_s6 + $0x38] sm:$0xff]  ;;  %v902_v59 = vld [vmem:[%s1267_s6 + $0x30] sm:$0xff] }
  0xa2   :  { %619 = vmatpush.bf16.msrb.mxu0 %v903_v58  ;;  %924 = vmatpush.bf16.msrb.mxu1 %v903_v58 }
  0xa6   :  { %v387_v62 = vpop.f32.mrf.mxu2  ;;  %v351_v1 = vpop.f32.mrf.mxu0  ;;  %620 = vmatpush.bf16.msrb.mxu0 %v902_v59  ;;  %925 = vmatpush.bf16.msrb.mxu1 %v902_v59 }
  0xa7   :  { %v406_v63 = vpop.f32.mrf.mxu3  ;;  %v388_v0 = vadd.f32 %v387_v62, %v369_v60  ;;  %v370_v3 = vpop.f32.mrf.mxu1  ;;  %v352_v5 = vadd.f32 %v936_v56, %v351_v1  ;;  %v901_v60 = vld [vmem:[%s1267_s6 + $0x28] sm:$0xff]  ;;  %v899_v62 = vld [vmem:[%s1267_s6 + $0x18] sm:$0xff] }
  0xa9   :  { %v407_v4 = vadd.f32 %v406_v63, %v388_v0  ;;  %v371_v7 = vadd.f32 %v370_v3, %v352_v5  ;;  %v898_v63 = vld [vmem:[%s1267_s6 + $0x10] sm:$0xff] }
  0xaa   :  { %621 = vmatpush.bf16.msrb.mxu0 %v901_v60  ;;  %926 = vmatpush.bf16.msrb.mxu1 %v901_v60 }
  0xab   :  { %v424_v6 = vadd.f32 %v906_v2, %v407_v4  ;;  %v897_v2 = vld [vmem:[%s1267_s6 + $0x8] sm:$0xff]  ;;  %v896_v4 = vld [vmem:[%s1267_s6] sm:$0xff] }
  0xad   :  { %428 = vadd.xlane.f32.xlu0 %v424_v6 }
  0xae   :  { %v389_v8 = vpop.f32.mrf.mxu2  ;;  %v354_v11 = vpop.f32.mrf.mxu0  ;;  %622 = vmatpush.bf16.msrb.mxu0 %v900_v61  ;;  %927 = vmatpush.bf16.msrb.mxu1 %v900_v61 }
  0xaf   :  { %v408_v9 = vpop.f32.mrf.mxu3  ;;  %v390_v10 = vadd.f32 %v389_v8, %v371_v7  ;;  %v355_v13 = vadd.f32 %v936_v56, %v354_v11  ;;  %v373_v15 = vpop.f32.mrf.mxu1 }
  0xb1   :  { %v409_v14 = vadd.f32 %v408_v9, %v390_v10  ;;  %v374_v16 = vadd.f32 %v373_v15, %v355_v13 }
  0xb2   :  { %623 = vmatpush.bf16.msrb.mxu0 %v899_v62  ;;  %928 = vmatpush.bf16.msrb.mxu1 %v899_v62 }
  0xb3   :  { %v425_v17 = vadd.f32 %v907_v12, %v409_v14 }
  0xb5   :  { %430 = vadd.xlane.f32.xlu0 %v425_v17 }
  0xb6   :  { %v392_v19 = vpop.f32.mrf.mxu2  ;;  %v356_v22 = vpop.f32.mrf.mxu0  ;;  %624 = vmatpush.bf16.msrb.mxu0 %v898_v63  ;;  %929 = vmatpush.bf16.msrb.mxu1 %v898_v63 }
  0xb7   :  { %v411_v20 = vpop.f32.mrf.mxu3  ;;  %v393_v21 = vadd.f32 %v392_v19, %v374_v16  ;;  %v357_v25 = vadd.f32 %v936_v56, %v356_v22  ;;  %v375_v27 = vpop.f32.mrf.mxu1  ;;  %v937_v22 = vld [vmem:[%s1265_s4] ss:$0 sm:$0xff]  ;;  %s977_s4 = smov [#allocation2]  }
  0xb9   :  { %v412_v24 = vadd.f32 %v411_v20, %v393_v21  ;;  %v376_v28 = vadd.f32 %v375_v27, %v357_v25 }
  0xba   :  { %625 = vmatpush.bf16.msrb.mxu0 %v897_v2  ;;  %930 = vmatpush.bf16.msrb.mxu1 %v897_v2 }
  0xbb   :  { %v426_v26 = vadd.f32 %v910_v23, %v412_v24 }
  0xbd   :  { %432 = vadd.xlane.f32.xlu1 %v426_v26 }
  0xbe   :  { %v394_v29 = vpop.f32.mrf.mxu2  ;;  %626 = vmatpush.bf16.msrb.mxu0 %v896_v4  ;;  %931 = vmatpush.bf16.msrb.mxu1 %v896_v4 }
  0xbf   :  { %v395_v30 = vadd.f32 %v394_v29, %v376_v28  ;;  %v413_v32 = vpop.f32.mrf.mxu3 }
  0xc1   :  { %v414_v33 = vadd.f32 %v413_v32, %v395_v30  ;;  %v938_v30 = vld [vmem:[%s1266_s5] ss:$0 sm:$0xff]  ;;  %s646_s5 = sshll.u32 %s977_s4, 4  ;;  %s647_s5 = int_to_ptr.vmem [resolvable:$true] %s646_s5 }
  0xc3   :  { %v427_v34 = vadd.f32 %v911_v31, %v414_v33 }
  0xc5   :  { %434 = vadd.xlane.f32.xlu1 %v427_v34 }
 0x120   :  { %v429_v42 = vpop.xlane.xlu0 %428 }
 0x121   :  { %v443_v43 = vmul.f32 %v1183_v41, %v429_v42 }
 0x123   :  { %v1186_v44 = vsub.f32 %v424_v6, %v443_v43 }
 0x125   :  { %v451_v45 = vmul.f32 %v1186_v44, %v1186_v44 }
 0x127   :  { %455 = vadd.xlane.f32.xlu2 %v451_v45 }
 0x128   :  { %v431_v46 = vpop.xlane.xlu0 %430 }
 0x129   :  { %v444_v47 = vmul.f32 %v1183_v41, %v431_v46 }
 0x12b   :  { %v1191_v48 = vsub.f32 %v425_v17, %v444_v47 }
 0x12d   :  { %v452_v49 = vmul.f32 %v1191_v48, %v1191_v48 }
 0x12f   :  { %457 = vadd.xlane.f32.xlu2 %v452_v49 }
 0x130   :  { %v433_v50 = vpop.xlane.xlu1 %432 }
 0x131   :  { %v445_v51 = vmul.f32 %v1183_v41, %v433_v50 }
 0x133   :  { %v1196_v52 = vsub.f32 %v426_v26, %v445_v51 }
 0x135   :  { %v453_v53 = vmul.f32 %v1196_v52, %v1196_v52 }
 0x137   :  { %459 = vadd.xlane.f32.xlu0 %v453_v53 }
 0x138   :  { %v435_v54 = vpop.xlane.xlu1 %434 }
 0x139   :  { %v446_v55 = vmul.f32 %v1183_v41, %v435_v54 }
 0x13b   :  { %v1201_v56 = vsub.f32 %v427_v34, %v446_v55 }
 0x13d   :  { %v454_v57 = vmul.f32 %v1201_v56, %v1201_v56 }
 0x13f   :  { %461 = vadd.xlane.f32.xlu1 %v454_v57 }
 0x19a   :  { %v456_v0 = vpop.xlane.xlu2 %455 }
 0x19b   :  { %v463_v1 = vmul.f32 %v456_v0, %v1183_v41 }
 0x19d   :  { %v467_v3 = vadd.f32 1e-12, %v463_v1 }
 0x19f   :  { %942 = vrsqrt.f32 %v467_v3  ;;  %vm477_vm2 = vweird.f32 %v467_v3 }
 0x1a2   :  { %v458_v5 = vpop.xlane.xlu2 %457 }
 0x1a3   :  { %v464_v6 = vmul.f32 %v458_v5, %v1183_v41 }
 0x1a5   :  { %v943_v7 = vpop.eup %942  ;;  %v468_v8 = vadd.f32 1e-12, %v464_v6 }
 0x1a6   :  { %v472_v9 = vmul.f32 %v943_v7, %v467_v3  ;;  %vm478_vm1 = vweird.f32 %v943_v7 }
 0x1a7   :  { %944 = vrsqrt.f32 %v468_v8  ;;  %vm479_vm3 = vmor %vm477_vm2, %vm478_vm1  ;;  %vm487_vm5 = vweird.f32 %v468_v8 }
 0x1a8   :  { %v473_v10 = vmul.f32 %v943_v7, %v472_v9 }
 0x1aa   :  { %v474_v11 = vmul.f32 0.5, %v473_v10  ;;  %v460_v12 = vpop.xlane.xlu0 %459 }
 0x1ab   :  { %v465_v13 = vmul.f32 %v460_v12, %v1183_v41 }
 0x1ac   :  { %v475_v14 = vsub.f32 1.5, %v474_v11 }
 0x1ad   :  { %v945_v15 = vpop.eup %944  ;;  %v469_v16 = vadd.f32 1e-12, %v465_v13 }
 0x1ae   :  { %v476_v17 = vmul.f32 %v943_v7, %v475_v14  ;;  %v482_v18 = vmul.f32 %v945_v15, %v468_v8  ;;  %vm488_vm4 = vweird.f32 %v945_v15 }
 0x1af   :  { %946 = vrsqrt.f32 %v469_v16  ;;  %vm489_vm6 = vmor %vm487_vm5, %vm488_vm4  ;;  %vm497_vm8 = vweird.f32 %v469_v16 }
 0x1b0   :  { %v480_v19 = vsel %vm479_vm3, %v943_v7, %v476_v17  ;;  %v483_v20 = vmul.f32 %v945_v15, %v482_v18 }
 0x1b1   :  { %v511_v21 = vmul.f32 %v480_v19, %v1186_v44 }
 0x1b2   :  { %v484_v23 = vmul.f32 0.5, %v483_v20  ;;  %v462_v24 = vpop.xlane.xlu1 %461 }
 0x1b3   :  { %v466_v25 = vmul.f32 %v462_v24, %v1183_v41  ;;  %v519_v29 = vmul.f32 %v937_v22, %v511_v21 }
 0x1b4   :  { %v485_v26 = vsub.f32 1.5, %v484_v23 }
 0x1b5   :  { %v947_v27 = vpop.eup %946  ;;  %v470_v28 = vadd.f32 1e-12, %v466_v25  ;;  %v527_v36 = vadd.f32 %v938_v30, %v519_v29 }
 0x1b6   :  { %v486_v31 = vmul.f32 %v945_v15, %v485_v26  ;;  %v492_v32 = vmul.f32 %v947_v27, %v469_v16  ;;  %vm498_vm7 = vweird.f32 %v947_v27 }
 0x1b7   :  { %948 = vrsqrt.f32 %v470_v28  ;;  %v531_v42 = vpack.c.bf16 %v527_v36, %v527_v36  ;;  %vm499_vm9 = vmor %vm497_vm8, %vm498_vm7  ;;  %vm507_vm11 = vweird.f32 %v470_v28 }
 0x1b8   :  { %v490_v33 = vsel %vm489_vm6, %v945_v15, %v486_v31  ;;  %v493_v34 = vmul.f32 %v947_v27, %v492_v32 }
 0x1b9   :  { %v512_v35 = vmul.f32 %v490_v33, %v1191_v48  ;;  %v563_v48 = vunpack.c.l.b16 %v531_v42 }
 0x1ba   :  { %v494_v37 = vmul.f32 0.5, %v493_v34 }
 0x1bb   :  { %v520_v38 = vmul.f32 %v937_v22, %v512_v35 }
 0x1bc   :  { %v495_v39 = vsub.f32 1.5, %v494_v37 }
 0x1bd   :  { %v949_v40 = vpop.eup %948  ;;  %v528_v41 = vadd.f32 %v938_v30, %v520_v38 }
 0x1be   :  { %v496_v43 = vmul.f32 %v947_v27, %v495_v39  ;;  %v502_v44 = vmul.f32 %v949_v40, %v470_v28  ;;  %vm508_vm10 = vweird.f32 %v949_v40 }
 0x1bf   :  { %v532_v45 = vpack.c.bf16 %v528_v41, %v528_v41  ;;  %v915_v46 = vpack.c.bf16 %v528_v41, %v527_v36  ;;  %vm509_vm12 = vmor %vm507_vm11, %vm508_vm10 }
 0x1c0   :  { %v500_v47 = vsel %vm499_vm9, %v947_v27, %v496_v43  ;;  %v503_v49 = vmul.f32 %v949_v40, %v502_v44 }
 0x1c1   :  { %v513_v50 = vmul.f32 %v500_v47, %v1196_v52  ;;  %916 = vst [vmem:[#allocation2] sm:$0xff] %v915_v46   ;;  %v564_v51 = vunpack.c.l.b16 %v532_v45 }
 0x1c2   :  { %v504_v53 = vmul.f32 0.5, %v503_v49 }
 0x1c3   :  { %v567_v54 = vpack.c.b16 %v564_v51, %v563_v48  ;;  %v521_v57 = vmul.f32 %v937_v22, %v513_v50 }
 0x1c4   :  { %v505_v55 = vsub.f32 1.5, %v504_v53 }
 0x1c5   :  { %627 = vmatmul.bf16.vlgmr.msrb.gmra.mxu0 %v567_v54  ;;  %v529_v61 = vadd.f32 %v938_v30, %v521_v57 }
 0x1c6   :  { %v506_v58 = vmul.f32 %v949_v40, %v505_v55 }
 0x1c7   :  { %v533_v0 = vpack.c.bf16 %v529_v61, %v529_v61 }
 0x1c8   :  { %v510_v59 = vsel %vm509_vm12, %v949_v40, %v506_v58 }
 0x1c9   :  { %v514_v60 = vmul.f32 %v510_v59, %v1201_v56  ;;  %v565_v2 = vunpack.c.l.b16 %v533_v0  ;;  %v939_v56 = vld [vmem:[%s1268_s7] ss:$0 sm:$0xff] }
 0x1cb   :  { %v522_v62 = vmul.f32 %v937_v22, %v514_v60 }
 0x1cd   :  { %v530_v63 = vadd.f32 %v938_v30, %v522_v62 }
 0x1cf   :  { %v534_v52 = vpack.c.bf16 %v530_v63, %v530_v63  ;;  %v920_v1 = vpack.c.bf16 %v530_v63, %v529_v61 }
 0x1d1   :  { %923 = vst [vmem:[#allocation2 + $0x8] sm:$0xff] %v920_v1   ;;  %v566_v3 = vunpack.c.l.b16 %v534_v52 }
 0x1d2   :  { %654 = dma.vmem_to_hbm [thread:$0]  %s647_s5, 256, %s649_s21, [#allocation3], %s978_s22, %s978_s22, %s979_s0  }
 0x1d3   :  { %v568_v4 = vpack.c.b16 %v566_v3, %v565_v2 }
 0x1d5   :  { %632 = vmatmul.bf16.vlgmr.msrb.gmra.mxu1 %v568_v4 }
 0x242   :  { %v628_v5 = vpop.f32.mrf.mxu0 }
 0x243   :  { %v629_v6 = vadd.f32 %v939_v56, %v628_v5 }
 0x245   :  { %638 = vst [vmem:[%s1270_s9] sm:$0xff] %v629_v6 }
 0x24a   :  { %v630_v7 = vpop.f32.mrf.mxu0 }
 0x24b   :  { %v631_v8 = vadd.f32 %v939_v56, %v630_v7 }
 0x24d   :  { %639 = vst [vmem:[%s1270_s9 + $0x8] sm:$0xff] %v631_v8 }
 0x252   :  { %v633_v9 = vpop.f32.mrf.mxu1 }
 0x253   :  { %v634_v10 = vadd.f32 %v939_v56, %v633_v9 }
 0x255   :  { %640 = vst [vmem:[%s1270_s9 + $0x10] sm:$0xff] %v634_v10 }
 0x25a   :  { %v635_v11 = vpop.f32.mrf.mxu1 }
 0x25b   :  { %v636_v12 = vadd.f32 %v939_v56, %v635_v11 }
 0x25d   :  { %641 = vst [vmem:[%s1270_s9 + $0x18] sm:$0xff] %v636_v12 }
 0x25e   :  { %974 = dma.done.wait [#allocation3], 256  }
 0x25f   :  { %975 = vsyncadd [#allocation3], 4294967040 }
 0x260   :  { %663 = vsyncpa [#allocation3], 1 }

</bundles_post_ra>
